<compile_context>
chip_gen: v5e
topology: v5e:2x2
jax: 0.10.0
libtpu: 0.0.40
codegen_flags: <defaults>
</compile_context>

<pallas_src>
import jax
import jax.numpy as jnp
from jax.experimental import pallas as pl
from jax.experimental.pallas import tpu as pltpu

IN_DIM = 32 * 32 * 3   # 3072 (already a multiple of 128)
HID = 200              # logical hidden width (matches the PyTorch module)
OUT = 10               # logical output width
HID_PAD = 256          # MXU-friendly padded hidden width
OUT_PAD = 128          # lane-dense padded output width
TB_MAX = 256           # batch tile (multiple of 8 and 128)


def _relunet4_kernel(x_ref,
                     w1_ref, b1_ref,
                     w2_ref, b2_ref,
                     w3_ref, b3_ref,
                     w4_ref, b4_ref,
                     w5_ref, b5_ref,
                     o_ref):
    # Matmul operands are cast to bf16 in VMEM (free HBM-wise) for MXU peak on
    # v6e/v7x; accumulation is f32 (preferred_element_type); bias add / ReLU
    # run in f32 on the VPU (v5e has no bf16 VPU path).
    h = x_ref[...].astype(jnp.bfloat16)

    h = jnp.dot(h, w1_ref[...], preferred_element_type=jnp.float32) + b1_ref[...]
    h = jnp.maximum(h, 0.0)

    h = jnp.dot(h.astype(jnp.bfloat16), w2_ref[...],
                preferred_element_type=jnp.float32) + b2_ref[...]
    h = jnp.maximum(h, 0.0)

    h = jnp.dot(h.astype(jnp.bfloat16), w3_ref[...],
                preferred_element_type=jnp.float32) + b3_ref[...]
    h = jnp.maximum(h, 0.0)

    h = jnp.dot(h.astype(jnp.bfloat16), w4_ref[...],
                preferred_element_type=jnp.float32) + b4_ref[...]
    h = jnp.maximum(h, 0.0)

    h = jnp.dot(h.astype(jnp.bfloat16), w5_ref[...],
                preferred_element_type=jnp.float32) + b5_ref[...]

    o_ref[...] = h.astype(o_ref.dtype)


def _pad_weight(w, in_pad, out_pad):
    fi, fo = w.shape
    return jnp.pad(w, ((0, in_pad - fi), (0, out_pad - fo))).astype(jnp.bfloat16)


def _pad_bias(b, out_pad):
    return jnp.pad(b, (0, out_pad - b.shape[0])).reshape(1, out_pad).astype(jnp.float32)


@jax.jit
def relunet4_forward(x, params):
    """x: (B, 3, 32, 32) float32 (NCHW, like PyTorch). Returns (B, 10) f32."""
    B = x.shape[0]
    x_flat = x.reshape(B, -1).astype(jnp.float32)  # same flatten order as torch .view

    (w1, b1), (w2, b2), (w3, b3), (w4, b4), (w5, b5) = params

    # Zero-pad to MXU-friendly widths (semantically a no-op: padded weight
    # columns/rows and biases are zero, and ReLU(0) = 0).
    w1p = _pad_weight(w1, IN_DIM, HID_PAD)
    w2p = _pad_weight(w2, HID_PAD, HID_PAD)
    w3p = _pad_weight(w3, HID_PAD, HID_PAD)
    w4p = _pad_weight(w4, HID_PAD, HID_PAD)
    w5p = _pad_weight(w5, HID_PAD, OUT_PAD)
    b1p = _pad_bias(b1, HID_PAD)
    b2p = _pad_bias(b2, HID_PAD)
    b3p = _pad_bias(b3, HID_PAD)
    b4p = _pad_bias(b4, HID_PAD)
    b5p = _pad_bias(b5, OUT_PAD)

    # Batch tile: full batch if small, else 256-row tiles (partial last block
    # is handled by Pallas; per-row math means OOB rows never pollute results).
    tb = B if B <= TB_MAX else TB_MAX
    grid = (pl.cdiv(B, tb),)

    operands = (x_flat,
                w1p, b1p, w2p, b2p, w3p, b3p, w4p, b4p, w5p, b5p)

    x_spec = pl.BlockSpec((tb, IN_DIM), lambda i: (i, 0))

    def _resident_spec(shape):
        # Constant index_map -> same block every grid step -> DMA'd once,
        # stays resident in VMEM across the whole batch loop.
        return pl.BlockSpec(shape, lambda i: (0, 0))

    in_specs = [x_spec] + [_resident_spec(op.shape) for op in operands[1:]]
    out_spec = pl.BlockSpec((tb, OUT_PAD), lambda i: (i, 0))

    weight_bytes = int(sum(op.size * op.dtype.itemsize for op in operands[1:]))
    flops = 2 * B * (IN_DIM * HID_PAD + 3 * HID_PAD * HID_PAD + HID_PAD * OUT_PAD)
    bytes_accessed = B * IN_DIM * 4 + weight_bytes + B * OUT_PAD * 4
    cost = pl.CostEstimate(flops=flops, transcendentals=0,
                           bytes_accessed=bytes_accessed)

    out_padded = pl.pallas_call(
        _relunet4_kernel,
        out_shape=jax.ShapeDtypeStruct((B, OUT_PAD), jnp.float32),
        grid=grid,
        in_specs=in_specs,
        out_specs=out_spec,
        compiler_params=pltpu.CompilerParams(
            dimension_semantics=("parallel",)),  # 2x on v7x (2 TCs); harmless elsewhere
        cost_estimate=cost,
    )(*operands)

    return out_padded[:, :OUT]


def init_params(key):
    """Deterministic init mirroring nn.Linear's U(-1/sqrt(fan_in), 1/sqrt(fan_in)).

    Weights are stored as (in_features, out_features) (transposed vs torch)."""
    dims = [(IN_DIM, HID), (HID, HID), (HID, HID), (HID, HID), (HID, OUT)]
    params = []
    for (fan_in, fan_out) in dims:
        key, kw, kb = jax.random.split(key, 3)
        bound = 1.0 / jnp.sqrt(fan_in)
        w = jax.random.uniform(kw, (fan_in, fan_out), jnp.float32, -bound, bound)
        b = jax.random.uniform(kb, (fan_out,), jnp.float32, -bound, bound)
        params.append((w, b))
    return params


def reference_forward_f32(x, params):
    """Plain f32 JAX reference (the exact PyTorch semantics)."""
    h = x.reshape(x.shape[0], -1)
    for i, (w, b) in enumerate(params):
        h = h @ w + b
        if i < len(params) - 1:
            h = jnp.maximum(h, 0.0)
    return h


def reference_forward_mixed(x, params):
    """Reference with the same precision recipe as the kernel
    (bf16 matmul operands, f32 accumulation, f32 bias/ReLU)."""
    h = x.reshape(x.shape[0], -1)
    for i, (w, b) in enumerate(params):
        h = jnp.dot(h.astype(jnp.bfloat16), w.astype(jnp.bfloat16),
                    preferred_element_type=jnp.float32) + b
        if i < len(params) - 1:
            h = jnp.maximum(h, 0.0)
    return h


if __name__ == "__main__":
    key = jax.random.PRNGKey(0)
    kp, kx1, kx2 = jax.random.split(key, 3)

    params = init_params(kp)

    # Small example batch (NCHW, as in the PyTorch module).
    x_small = jax.random.normal(kx1, (2, 3, 32, 32), jnp.float32)
    out_small = jax.block_until_ready(relunet4_forward(x_small, params))
    assert out_small.shape == (2, OUT)

    ref_mixed = reference_forward_mixed(x_small, params)
    ref_f32 = reference_forward_f32(x_small, params)
    assert jnp.allclose(out_small, ref_mixed, atol=1e-3, rtol=1e-3), \
        "mismatch vs mixed-precision reference"
    assert jnp.allclose(out_small, ref_f32, atol=5e-2, rtol=5e-2), \
        "mismatch vs f32 reference"

    # Exercise the batch-tiled path (multi-block grid with a partial last tile).
    x_big = jax.random.normal(kx2, (384, 3, 32, 32), jnp.float32)
    out_big = jax.block_until_ready(relunet4_forward(x_big, params))
    assert out_big.shape == (384, OUT)
    ref_big = reference_forward_mixed(x_big, params)
    assert jnp.allclose(out_big, ref_big, atol=1e-3, rtol=1e-3), \
        "mismatch vs mixed-precision reference (tiled batch)"

    print("KERNEL_OK")
</pallas_src>

<mosaic_0001>
module attributes {stable_mosaic.version = 11 : i64} {
  func.func @_relunet4_kernel(%arg0: i32, %arg1: memref<2x3072xf32, #tpu.memory_space<vmem>>, %arg2: memref<3072x256xbf16, #tpu.memory_space<vmem>>, %arg3: memref<1x256xf32, #tpu.memory_space<vmem>>, %arg4: memref<256x256xbf16, #tpu.memory_space<vmem>>, %arg5: memref<1x256xf32, #tpu.memory_space<vmem>>, %arg6: memref<256x256xbf16, #tpu.memory_space<vmem>>, %arg7: memref<1x256xf32, #tpu.memory_space<vmem>>, %arg8: memref<256x256xbf16, #tpu.memory_space<vmem>>, %arg9: memref<1x256xf32, #tpu.memory_space<vmem>>, %arg10: memref<256x128xbf16, #tpu.memory_space<vmem>>, %arg11: memref<1x128xf32, #tpu.memory_space<vmem>>, %arg12: memref<2x128xf32, #tpu.memory_space<vmem>>) attributes {dimension_semantics = [#tpu.dimension_semantics<parallel>], iteration_bounds = array<i64: 1>, scalar_prefetch = 0 : i64, scratch_operands = 0 : i64, tpu.core_type = #tpu.core_type<tc>, window_params = [{transform_indices = @transform_0, window_bounds = array<i64: 2, 3072>}, {pipeline_mode = #tpu.pipeline_mode<synchronous>, transform_indices = @transform_1, window_bounds = array<i64: 3072, 256>}, {pipeline_mode = #tpu.pipeline_mode<synchronous>, transform_indices = @transform_2, window_bounds = array<i64: 1, 256>}, {pipeline_mode = #tpu.pipeline_mode<synchronous>, transform_indices = @transform_3, window_bounds = array<i64: 256, 256>}, {pipeline_mode = #tpu.pipeline_mode<synchronous>, transform_indices = @transform_4, window_bounds = array<i64: 1, 256>}, {pipeline_mode = #tpu.pipeline_mode<synchronous>, transform_indices = @transform_5, window_bounds = array<i64: 256, 256>}, {pipeline_mode = #tpu.pipeline_mode<synchronous>, transform_indices = @transform_6, window_bounds = array<i64: 1, 256>}, {pipeline_mode = #tpu.pipeline_mode<synchronous>, transform_indices = @transform_7, window_bounds = array<i64: 256, 256>}, {pipeline_mode = #tpu.pipeline_mode<synchronous>, transform_indices = @transform_8, window_bounds = array<i64: 1, 256>}, {pipeline_mode = #tpu.pipeline_mode<synchronous>, transform_indices = @transform_9, window_bounds = array<i64: 256, 128>}, {pipeline_mode = #tpu.pipeline_mode<synchronous>, transform_indices = @transform_10, window_bounds = array<i64: 1, 128>}, {transform_indices = @transform_11, window_bounds = array<i64: 2, 128>}]} {
    %c0 = arith.constant 0 : index
    %c0_0 = arith.constant 0 : index
    %0 = vector.load %arg1[%c0, %c0_0] : memref<2x3072xf32, #tpu.memory_space<vmem>>, vector<2x3072xf32>
    %1 = arith.truncf %0 : vector<2x3072xf32> to vector<2x3072xbf16>
    %c0_1 = arith.constant 0 : index
    %c0_2 = arith.constant 0 : index
    %2 = vector.load %arg2[%c0_1, %c0_2] : memref<3072x256xbf16, #tpu.memory_space<vmem>>, vector<3072x256xbf16>
    %cst = arith.constant dense<0.000000e+00> : vector<2x256xf32>
    %3 = tpu.matmul %1, %2, %cst {dimension_numbers = #tpu.dot_dimension_numbers<[1], [0], [0], [1], [0, 0, 1, 1], [], []>} : vector<2x3072xbf16>, vector<3072x256xbf16>, vector<2x256xf32> -> vector<2x256xf32>
    %c0_3 = arith.constant 0 : index
    %c0_4 = arith.constant 0 : index
    %4 = vector.load %arg3[%c0_3, %c0_4] : memref<1x256xf32, #tpu.memory_space<vmem>>, vector<1x256xf32>
    %5 = vector.broadcast %4 : vector<1x256xf32> to vector<2x256xf32>
    %6 = arith.addf %3, %5 : vector<2x256xf32>
    %cst_5 = arith.constant 0.000000e+00 : f32
    %7 = vector.broadcast %cst_5 : f32 to vector<2x256xf32>
    %8 = arith.maximumf %6, %7 : vector<2x256xf32>
    %9 = arith.truncf %8 : vector<2x256xf32> to vector<2x256xbf16>
    %c0_6 = arith.constant 0 : index
    %c0_7 = arith.constant 0 : index
    %10 = vector.load %arg4[%c0_6, %c0_7] : memref<256x256xbf16, #tpu.memory_space<vmem>>, vector<256x256xbf16>
    %cst_8 = arith.constant dense<0.000000e+00> : vector<2x256xf32>
    %11 = tpu.matmul %9, %10, %cst_8 {dimension_numbers = #tpu.dot_dimension_numbers<[1], [0], [0], [1], [0, 0, 1, 1], [], []>} : vector<2x256xbf16>, vector<256x256xbf16>, vector<2x256xf32> -> vector<2x256xf32>
    %c0_9 = arith.constant 0 : index
    %c0_10 = arith.constant 0 : index
    %12 = vector.load %arg5[%c0_9, %c0_10] : memref<1x256xf32, #tpu.memory_space<vmem>>, vector<1x256xf32>
    %13 = vector.broadcast %12 : vector<1x256xf32> to vector<2x256xf32>
    %14 = arith.addf %11, %13 : vector<2x256xf32>
    %cst_11 = arith.constant 0.000000e+00 : f32
    %15 = vector.broadcast %cst_11 : f32 to vector<2x256xf32>
    %16 = arith.maximumf %14, %15 : vector<2x256xf32>
    %17 = arith.truncf %16 : vector<2x256xf32> to vector<2x256xbf16>
    %c0_12 = arith.constant 0 : index
    %c0_13 = arith.constant 0 : index
    %18 = vector.load %arg6[%c0_12, %c0_13] : memref<256x256xbf16, #tpu.memory_space<vmem>>, vector<256x256xbf16>
    %cst_14 = arith.constant dense<0.000000e+00> : vector<2x256xf32>
    %19 = tpu.matmul %17, %18, %cst_14 {dimension_numbers = #tpu.dot_dimension_numbers<[1], [0], [0], [1], [0, 0, 1, 1], [], []>} : vector<2x256xbf16>, vector<256x256xbf16>, vector<2x256xf32> -> vector<2x256xf32>
    %c0_15 = arith.constant 0 : index
    %c0_16 = arith.constant 0 : index
    %20 = vector.load %arg7[%c0_15, %c0_16] : memref<1x256xf32, #tpu.memory_space<vmem>>, vector<1x256xf32>
    %21 = vector.broadcast %20 : vector<1x256xf32> to vector<2x256xf32>
    %22 = arith.addf %19, %21 : vector<2x256xf32>
    %cst_17 = arith.constant 0.000000e+00 : f32
    %23 = vector.broadcast %cst_17 : f32 to vector<2x256xf32>
    %24 = arith.maximumf %22, %23 : vector<2x256xf32>
    %25 = arith.truncf %24 : vector<2x256xf32> to vector<2x256xbf16>
    %c0_18 = arith.constant 0 : index
    %c0_19 = arith.constant 0 : index
    %26 = vector.load %arg8[%c0_18, %c0_19] : memref<256x256xbf16, #tpu.memory_space<vmem>>, vector<256x256xbf16>
    %cst_20 = arith.constant dense<0.000000e+00> : vector<2x256xf32>
    %27 = tpu.matmul %25, %26, %cst_20 {dimension_numbers = #tpu.dot_dimension_numbers<[1], [0], [0], [1], [0, 0, 1, 1], [], []>} : vector<2x256xbf16>, vector<256x256xbf16>, vector<2x256xf32> -> vector<2x256xf32>
    %c0_21 = arith.constant 0 : index
    %c0_22 = arith.constant 0 : index
    %28 = vector.load %arg9[%c0_21, %c0_22] : memref<1x256xf32, #tpu.memory_space<vmem>>, vector<1x256xf32>
    %29 = vector.broadcast %28 : vector<1x256xf32> to vector<2x256xf32>
    %30 = arith.addf %27, %29 : vector<2x256xf32>
    %cst_23 = arith.constant 0.000000e+00 : f32
    %31 = vector.broadcast %cst_23 : f32 to vector<2x256xf32>
    %32 = arith.maximumf %30, %31 : vector<2x256xf32>
    %33 = arith.truncf %32 : vector<2x256xf32> to vector<2x256xbf16>
    %c0_24 = arith.constant 0 : index
    %c0_25 = arith.constant 0 : index
    %34 = vector.load %arg10[%c0_24, %c0_25] : memref<256x128xbf16, #tpu.memory_space<vmem>>, vector<256x128xbf16>
    %cst_26 = arith.constant dense<0.000000e+00> : vector<2x128xf32>
    %35 = tpu.matmul %33, %34, %cst_26 {dimension_numbers = #tpu.dot_dimension_numbers<[1], [0], [0], [1], [0, 0, 1, 1], [], []>} : vector<2x256xbf16>, vector<256x128xbf16>, vector<2x128xf32> -> vector<2x128xf32>
    %c0_27 = arith.constant 0 : index
    %c0_28 = arith.constant 0 : index
    %36 = vector.load %arg11[%c0_27, %c0_28] : memref<1x128xf32, #tpu.memory_space<vmem>>, vector<1x128xf32>
    %37 = vector.broadcast %36 : vector<1x128xf32> to vector<2x128xf32>
    %38 = arith.addf %35, %37 : vector<2x128xf32>
    %c0_29 = arith.constant 0 : index
    %c0_30 = arith.constant 0 : index
    %39 = vector.load %arg12[%c0_29, %c0_30] : memref<2x128xf32, #tpu.memory_space<vmem>>, vector<2x128xf32>
    tpu.vector_store %arg12[%c0_29, %c0_30], %38 {strides = array<i32>} : memref<2x128xf32, #tpu.memory_space<vmem>>, vector<2x128xf32>,
    return
  }
  func.func @transform_0(%arg0: i32) -> (i32, i32) {
    %c0_i32 = arith.constant 0 : i32
    %c0_i32_0 = arith.constant 0 : i32
    return %arg0, %c0_i32 : i32, i32
  }
  func.func @transform_1(%arg0: i32) -> (i32, i32) {
    %c0_i32 = arith.constant 0 : i32
    %c0_i32_0 = arith.constant 0 : i32
    %c0_i32_1 = arith.constant 0 : i32
    return %c0_i32, %c0_i32_0 : i32, i32
  }
  func.func @transform_2(%arg0: i32) -> (i32, i32) {
    %c0_i32 = arith.constant 0 : i32
    %c0_i32_0 = arith.constant 0 : i32
    %c0_i32_1 = arith.constant 0 : i32
    return %c0_i32, %c0_i32_0 : i32, i32
  }
  func.func @transform_3(%arg0: i32) -> (i32, i32) {
    %c0_i32 = arith.constant 0 : i32
    %c0_i32_0 = arith.constant 0 : i32
    %c0_i32_1 = arith.constant 0 : i32
    return %c0_i32, %c0_i32_0 : i32, i32
  }
  func.func @transform_4(%arg0: i32) -> (i32, i32) {
    %c0_i32 = arith.constant 0 : i32
    %c0_i32_0 = arith.constant 0 : i32
    %c0_i32_1 = arith.constant 0 : i32
    return %c0_i32, %c0_i32_0 : i32, i32
  }
  func.func @transform_5(%arg0: i32) -> (i32, i32) {
    %c0_i32 = arith.constant 0 : i32
    %c0_i32_0 = arith.constant 0 : i32
    %c0_i32_1 = arith.constant 0 : i32
    return %c0_i32, %c0_i32_0 : i32, i32
  }
  func.func @transform_6(%arg0: i32) -> (i32, i32) {
    %c0_i32 = arith.constant 0 : i32
    %c0_i32_0 = arith.constant 0 : i32
    %c0_i32_1 = arith.constant 0 : i32
    return %c0_i32, %c0_i32_0 : i32, i32
  }
  func.func @transform_7(%arg0: i32) -> (i32, i32) {
    %c0_i32 = arith.constant 0 : i32
    %c0_i32_0 = arith.constant 0 : i32
    %c0_i32_1 = arith.constant 0 : i32
    return %c0_i32, %c0_i32_0 : i32, i32
  }
  func.func @transform_8(%arg0: i32) -> (i32, i32) {
    %c0_i32 = arith.constant 0 : i32
    %c0_i32_0 = arith.constant 0 : i32
    %c0_i32_1 = arith.constant 0 : i32
    return %c0_i32, %c0_i32_0 : i32, i32
  }
  func.func @transform_9(%arg0: i32) -> (i32, i32) {
    %c0_i32 = arith.constant 0 : i32
    %c0_i32_0 = arith.constant 0 : i32
    %c0_i32_1 = arith.constant 0 : i32
    return %c0_i32, %c0_i32_0 : i32, i32
  }
  func.func @transform_10(%arg0: i32) -> (i32, i32) {
    %c0_i32 = arith.constant 0 : i32
    %c0_i32_0 = arith.constant 0 : i32
    %c0_i32_1 = arith.constant 0 : i32
    return %c0_i32, %c0_i32_0 : i32, i32
  }
  func.func @transform_11(%arg0: i32) -> (i32, i32) {
    %c0_i32 = arith.constant 0 : i32
    %c0_i32_0 = arith.constant 0 : i32
    return %arg0, %c0_i32 : i32, i32
  }
}

</mosaic_0001>

<bundles_post_ra>
// kernel: relunet4_forward.1
= control target key start
LH: loop header
LB: loop body
LE: loop exit
PB: predicated region body
PF: predicated region fallthrough
CT: control target
= control target key end

     0   :  { %s9709_s0 = inlined_call_operand.vmem [shape: f32[2,3072], index: 0, kind: input, shape index: {}]   ;;  %s9710_s1 = inlined_call_operand.vmem [shape: bf16[3072,256], index: 1, kind: input, shape index: {}]   ;;  %s9711_s2 = inlined_call_operand.vmem [shape: f32[1,256], index: 2, kind: input, shape index: {}]   ;;  %s9712_s3 = inlined_call_operand.vmem [shape: bf16[256,256], index: 3, kind: input, shape index: {}]   ;;  %s9713_s4 = inlined_call_operand.vmem [shape: f32[1,256], index: 4, kind: input, shape index: {}]   ;;  %s9714_s5 = inlined_call_operand.vmem [shape: bf16[256,256], index: 5, kind: input, shape index: {}]   ;;  %s9715_s6 = inlined_call_operand.vmem [shape: f32[1,256], index: 6, kind: input, shape index: {}]   ;;  %s9716_s7 = inlined_call_operand.vmem [shape: bf16[256,256], index: 7, kind: input, shape index: {}]   ;;  %s9717_s8 = inlined_call_operand.vmem [shape: f32[1,256], index: 8, kind: input, shape index: {}]   ;;  %s9718_s9 = inlined_call_operand.vmem [shape: bf16[256,128], index: 9, kind: input, shape index: {}]   ;;  %s9719_s10 = inlined_call_operand.vmem [shape: f32[1,128], index: 10, kind: input, shape index: {}]   ;;  %s9720_s11 = inlined_call_operand.hbm [shape: f32[2,128], index: 11, kind: output, shape index: {}]  }
   0x1   :  { %v4063_v0 = vld [vmem:[%s9710_s1 + $0x70] sm:$0xf]  ;;  %v6004_v1 = vld [vmem:[%s9710_s1 + $0x74] sm:$0xf0]  ;;  %v4055_v11 = vld [vmem:[%s9710_s1 + $0x60] sm:$0xf] }
   0x2   :  { %v4127_v2 = vld [vmem:[%s9710_s1 + $0xf0] sm:$0xf]  ;;  %v4064_v3 = vor.u32 %v6004_v1, %v4063_v0  ;;  %v6020_v4 = vld [vmem:[%s9710_s1 + $0xf4] sm:$0xf0]  ;;  %v6002_v13 = vld [vmem:[%s9710_s1 + $0x64] sm:$0xf0] }
   0x3   :  { %v4191_v5 = vld [vmem:[%s9710_s1 + $0x170] sm:$0xf]  ;;  %v6036_v6 = vld [vmem:[%s9710_s1 + $0x174] sm:$0xf0]  ;;  %v4128_v7 = vor.u32 %v6020_v4, %v4127_v2  ;;  %v4119_v14 = vld [vmem:[%s9710_s1 + $0xe0] sm:$0xf]  ;;  %v4056_v16 = vor.u32 %v6002_v13, %v4055_v11 }
   0x4   :  { %v4192_v8 = vor.u32 %v6036_v6, %v4191_v5  ;;  %v4255_v9 = vld [vmem:[%s9710_s1 + $0x1f0] sm:$0xf]  ;;  %v6052_v10 = vld [vmem:[%s9710_s1 + $0x1f4] sm:$0xf0]  ;;  %2440 = vmatpush.bf16.msra.mxu0 %v4064_v3  ;;  %v6018_v15 = vld [vmem:[%s9710_s1 + $0xe4] sm:$0xf0] }
   0x5   :  { %v4256_v12 = vor.u32 %v6052_v10, %v4255_v9  ;;  %2453 = vmatpush.bf16.msra.mxu1 %v4128_v7  ;;  %v4120_v17 = vor.u32 %v6018_v15, %v4119_v14  ;;  %v4183_v18 = vld [vmem:[%s9710_s1 + $0x160] sm:$0xf]  ;;  %v6034_v19 = vld [vmem:[%s9710_s1 + $0x164] sm:$0xf0]  ;;  %v4047_v23 = vld [vmem:[%s9710_s1 + $0x50] sm:$0xf] }
   0x6   :  { %2466 = vmatpush.bf16.msra.mxu2 %v4192_v8  ;;  %v4247_v20 = vld [vmem:[%s9710_s1 + $0x1e0] sm:$0xf]  ;;  %v4184_v21 = vor.u32 %v6034_v19, %v4183_v18  ;;  %v6050_v22 = vld [vmem:[%s9710_s1 + $0x1e4] sm:$0xf0]  ;;  %v6000_v24 = vld [vmem:[%s9710_s1 + $0x54] sm:$0xf0] }
   0x7   :  { %2479 = vmatpush.bf16.msra.mxu3 %v4256_v12  ;;  %v4248_v25 = vor.u32 %v6050_v22, %v4247_v20  ;;  %v4111_v26 = vld [vmem:[%s9710_s1 + $0xd0] sm:$0xf]  ;;  %v6016_v27 = vld [vmem:[%s9710_s1 + $0xd4] sm:$0xf0]  ;;  %v4048_v29 = vor.u32 %v6000_v24, %v4047_v23  ;;  %v4039_v35 = vld [vmem:[%s9710_s1 + $0x40] sm:$0xf] }
   0x8   :  { %v4175_v28 = vld [vmem:[%s9710_s1 + $0x150] sm:$0xf]  ;;  %2441 = vmatpush.bf16.msra.mxu0 %v4056_v16  ;;  %v6032_v30 = vld [vmem:[%s9710_s1 + $0x154] sm:$0xf0]  ;;  %v4112_v33 = vor.u32 %v6016_v27, %v4111_v26  ;;  %v5998_v36 = vld [vmem:[%s9710_s1 + $0x44] sm:$0xf0] }
   0x9   :  { %v4239_v31 = vld [vmem:[%s9710_s1 + $0x1d0] sm:$0xf]  ;;  %v6048_v32 = vld [vmem:[%s9710_s1 + $0x1d4] sm:$0xf0]  ;;  %2454 = vmatpush.bf16.msra.mxu1 %v4120_v17  ;;  %v4176_v34 = vor.u32 %v6032_v30, %v4175_v28  ;;  %v4103_v37 = vld [vmem:[%s9710_s1 + $0xc0] sm:$0xf]  ;;  %v4040_v44 = vor.u32 %v5998_v36, %v4039_v35 }
   0xa   :  { %2467 = vmatpush.bf16.msra.mxu2 %v4184_v21  ;;  %v4240_v38 = vor.u32 %v6048_v32, %v4239_v31  ;;  %v6014_v39 = vld [vmem:[%s9710_s1 + $0xc4] sm:$0xf0]  ;;  %v4167_v40 = vld [vmem:[%s9710_s1 + $0x140] sm:$0xf]  ;;  %v4031_v47 = vld [vmem:[%s9710_s1 + $0x30] sm:$0xf] }
   0xb   :  { %2480 = vmatpush.bf16.msra.mxu3 %v4248_v25  ;;  %v6030_v41 = vld [vmem:[%s9710_s1 + $0x144] sm:$0xf0]  ;;  %v4231_v42 = vld [vmem:[%s9710_s1 + $0x1c0] sm:$0xf]  ;;  %v4104_v45 = vor.u32 %v6014_v39, %v4103_v37  ;;  %v5996_v48 = vld [vmem:[%s9710_s1 + $0x34] sm:$0xf0] }
   0xc   :  { %v6046_v43 = vld [vmem:[%s9710_s1 + $0x1c4] sm:$0xf0]  ;;  %2442 = vmatpush.bf16.msra.mxu0 %v4048_v29  ;;  %v4168_v46 = vor.u32 %v6030_v41, %v4167_v40  ;;  %v4095_v49 = vld [vmem:[%s9710_s1 + $0xb0] sm:$0xf]  ;;  %v6012_v51 = vld [vmem:[%s9710_s1 + $0xb4] sm:$0xf0]  ;;  %v4032_v56 = vor.u32 %v5996_v48, %v4031_v47 }
   0xd   :  { %2455 = vmatpush.bf16.msra.mxu1 %v4112_v33  ;;  %v4232_v50 = vor.u32 %v6046_v43, %v4231_v42  ;;  %v4159_v52 = vld [vmem:[%s9710_s1 + $0x130] sm:$0xf]  ;;  %v6028_v53 = vld [vmem:[%s9710_s1 + $0x134] sm:$0xf0]  ;;  %v4096_v57 = vor.u32 %v6012_v51, %v4095_v49  ;;  %v4023_v59 = vld [vmem:[%s9710_s1 + $0x20] sm:$0xf] }
   0xe   :  { %2468 = vmatpush.bf16.msra.mxu2 %v4176_v34  ;;  %v4223_v54 = vld [vmem:[%s9710_s1 + $0x1b0] sm:$0xf]  ;;  %v6044_v55 = vld [vmem:[%s9710_s1 + $0x1b4] sm:$0xf0]  ;;  %v4160_v58 = vor.u32 %v6028_v53, %v4159_v52  ;;  %v5994_v60 = vld [vmem:[%s9710_s1 + $0x24] sm:$0xf0] }
   0xf   :  { %2481 = vmatpush.bf16.msra.mxu3 %v4240_v38  ;;  %v4087_v61 = vld [vmem:[%s9710_s1 + $0xa0] sm:$0xf]  ;;  %v4224_v62 = vor.u32 %v6044_v55, %v4223_v54  ;;  %v6010_v63 = vld [vmem:[%s9710_s1 + $0xa4] sm:$0xf0]  ;;  %v4024_v4 = vor.u32 %v5994_v60, %v4023_v59  ;;  %v4015_v7 = vld [vmem:[%s9710_s1 + $0x10] sm:$0xf] }
  0x10   :  { %2443 = vmatpush.bf16.msra.mxu0 %v4040_v44  ;;  %v4151_v0 = vld [vmem:[%s9710_s1 + $0x120] sm:$0xf]  ;;  %v6026_v1 = vld [vmem:[%s9710_s1 + $0x124] sm:$0xf0]  ;;  %v4088_v5 = vor.u32 %v6010_v63, %v4087_v61  ;;  %v5992_v8 = vld [vmem:[%s9710_s1 + $0x14] sm:$0xf0] }
  0x11   :  { %2456 = vmatpush.bf16.msra.mxu1 %v4104_v45  ;;  %v4215_v2 = vld [vmem:[%s9710_s1 + $0x1a0] sm:$0xf]  ;;  %v6042_v3 = vld [vmem:[%s9710_s1 + $0x1a4] sm:$0xf0]  ;;  %v4152_v6 = vor.u32 %v6026_v1, %v4151_v0  ;;  %v4079_v9 = vld [vmem:[%s9710_s1 + $0x90] sm:$0xf]  ;;  %v4016_v16 = vor.u32 %v5992_v8, %v4015_v7 }
  0x12   :  { %2469 = vmatpush.bf16.msra.mxu2 %v4168_v46  ;;  %v4216_v10 = vor.u32 %v6042_v3, %v4215_v2  ;;  %v6008_v11 = vld [vmem:[%s9710_s1 + $0x94] sm:$0xf0]  ;;  %v4143_v12 = vld [vmem:[%s9710_s1 + $0x110] sm:$0xf]  ;;  %v4007_v17 = vld [vmem:[%s9710_s1] sm:$0xf] }
  0x13   :  { %2482 = vmatpush.bf16.msra.mxu3 %v4232_v50  ;;  %v6024_v13 = vld [vmem:[%s9710_s1 + $0x114] sm:$0xf0]  ;;  %v4207_v14 = vld [vmem:[%s9710_s1 + $0x190] sm:$0xf]  ;;  %v5990_v18 = vld [vmem:[%s9710_s1 + $0x4] sm:$0xf0]  ;;  %v4080_v19 = vor.u32 %v6008_v11, %v4079_v9 }
  0x14   :  { %2444 = vmatpush.bf16.msra.mxu0 %v4032_v56  ;;  %v6040_v15 = vld [vmem:[%s9710_s1 + $0x194] sm:$0xf0]  ;;  %v4144_v20 = vor.u32 %v6024_v13, %v4143_v12  ;;  %v4071_v21 = vld [vmem:[%s9710_s1 + $0x80] sm:$0xf]  ;;  %v6006_v22 = vld [vmem:[%s9710_s1 + $0x84] sm:$0xf0]  ;;  %v4008_v31 = vor.u32 %v5990_v18, %v4007_v17 }
  0x15   :  { %2457 = vmatpush.bf16.msra.mxu1 %v4096_v57  ;;  %v4135_v23 = vld [vmem:[%s9710_s1 + $0x100] sm:$0xf]  ;;  %v4208_v24 = vor.u32 %v6040_v15, %v4207_v14  ;;  %v6022_v25 = vld [vmem:[%s9710_s1 + $0x104] sm:$0xf0]  ;;  %v4319_v28 = vld [vmem:[%s9710_s1 + $0x270] sm:$0xf]  ;;  %v4072_v35 = vor.u32 %v6006_v22, %v4071_v21 }
  0x16   :  { %2470 = vmatpush.bf16.msra.mxu2 %v4160_v58  ;;  %v4199_v26 = vld [vmem:[%s9710_s1 + $0x180] sm:$0xf]  ;;  %v6038_v27 = vld [vmem:[%s9710_s1 + $0x184] sm:$0xf0]  ;;  %v6068_v29 = vld [vmem:[%s9710_s1 + $0x274] sm:$0xf0]  ;;  %v4136_v36 = vor.u32 %v6022_v25, %v4135_v23 }
  0x17   :  { %2483 = vmatpush.bf16.msra.mxu3 %v4224_v62  ;;  %v4383_v30 = vld [vmem:[%s9710_s1 + $0x2f0] sm:$0xf]  ;;  %v6084_v32 = vld [vmem:[%s9710_s1 + $0x2f4] sm:$0xf0]  ;;  %v4200_v39 = vor.u32 %v6038_v27, %v4199_v26  ;;  %v4320_v40 = vor.u32 %v6068_v29, %v4319_v28  ;;  %v4311_v43 = vld [vmem:[%s9710_s1 + $0x260] sm:$0xf] }
  0x18   :  { %2445 = vmatpush.bf16.msra.mxu0 %v4024_v4  ;;  %v4447_v33 = vld [vmem:[%s9710_s1 + $0x370] sm:$0xf]  ;;  %v6100_v34 = vld [vmem:[%s9710_s1 + $0x374] sm:$0xf0]  ;;  %v4384_v41 = vor.u32 %v6084_v32, %v4383_v30  ;;  %v6066_v44 = vld [vmem:[%s9710_s1 + $0x264] sm:$0xf0] }
  0x19   :  { %2458 = vmatpush.bf16.msra.mxu1 %v4088_v5  ;;  %v4511_v37 = vld [vmem:[%s9710_s1 + $0x3f0] sm:$0xf]  ;;  %v6116_v38 = vld [vmem:[%s9710_s1 + $0x3f4] sm:$0xf0]  ;;  %v4448_v42 = vor.u32 %v6100_v34, %v4447_v33  ;;  %v4375_v45 = vld [vmem:[%s9710_s1 + $0x2e0] sm:$0xf]  ;;  %v4312_v52 = vor.u32 %v6066_v44, %v4311_v43 }
  0x1a   :  { %2471 = vmatpush.bf16.msra.mxu2 %v4152_v6  ;;  %v4512_v46 = vor.u32 %v6116_v38, %v4511_v37  ;;  %v6082_v47 = vld [vmem:[%s9710_s1 + $0x2e4] sm:$0xf0]  ;;  %v4439_v48 = vld [vmem:[%s9710_s1 + $0x360] sm:$0xf]  ;;  %v4303_v55 = vld [vmem:[%s9710_s1 + $0x250] sm:$0xf] }
  0x1b   :  { %2484 = vmatpush.bf16.msra.mxu3 %v4216_v10  ;;  %v6098_v49 = vld [vmem:[%s9710_s1 + $0x364] sm:$0xf0]  ;;  %v4503_v50 = vld [vmem:[%s9710_s1 + $0x3e0] sm:$0xf]  ;;  %v4376_v53 = vor.u32 %v6082_v47, %v4375_v45  ;;  %v6064_v56 = vld [vmem:[%s9710_s1 + $0x254] sm:$0xf0] }
  0x1c   :  { %2446 = vmatpush.bf16.msra.mxu0 %v4016_v16  ;;  %v6114_v51 = vld [vmem:[%s9710_s1 + $0x3e4] sm:$0xf0]  ;;  %v4440_v54 = vor.u32 %v6098_v49, %v4439_v48  ;;  %v4367_v57 = vld [vmem:[%s9710_s1 + $0x2d0] sm:$0xf]  ;;  %v6080_v59 = vld [vmem:[%s9710_s1 + $0x2d4] sm:$0xf0]  ;;  %v4304_v0 = vor.u32 %v6064_v56, %v4303_v55 }
  0x1d   :  { %2459 = vmatpush.bf16.msra.mxu1 %v4080_v19  ;;  %v4504_v58 = vor.u32 %v6114_v51, %v4503_v50  ;;  %v4431_v60 = vld [vmem:[%s9710_s1 + $0x350] sm:$0xf]  ;;  %v6096_v61 = vld [vmem:[%s9710_s1 + $0x354] sm:$0xf0]  ;;  %v4295_v1 = vld [vmem:[%s9710_s1 + $0x240] sm:$0xf]  ;;  %v4368_v3 = vor.u32 %v6080_v59, %v4367_v57 }
  0x1e   :  { %2472 = vmatpush.bf16.msra.mxu2 %v4144_v20  ;;  %v4495_v62 = vld [vmem:[%s9710_s1 + $0x3d0] sm:$0xf]  ;;  %v6112_v63 = vld [vmem:[%s9710_s1 + $0x3d4] sm:$0xf0]  ;;  %v39_v2 = vld [vmem:[%s9709_s0] sm:$0xff]  ;;  %v4432_v4 = vor.u32 %v6096_v61, %v4431_v60 }
  0x1f   :  { %2485 = vmatpush.bf16.msra.mxu3 %v4208_v24  ;;  %v6062_v5 = vld [vmem:[%s9710_s1 + $0x244] sm:$0xf0]  ;;  %v4359_v6 = vld [vmem:[%s9710_s1 + $0x2c0] sm:$0xf]  ;;  %51 = vst [vmem:[#allocation1] ss:$4 sm:$0xff] %v39_v2  ;;  %v4496_v7 = vor.u32 %v6112_v63, %v4495_v62 }
  0x20   :  { %2447 = vmatpush.bf16.msra.mxu0 %v4008_v31  ;;  %v6078_v8 = vld [vmem:[%s9710_s1 + $0x2c4] sm:$0xf0]  ;;  %v4423_v9 = vld [vmem:[%s9710_s1 + $0x340] sm:$0xf]  ;;  %v4296_v13 = vor.u32 %v6062_v5, %v4295_v1  ;;  %v4287_v14 = vld [vmem:[%s9710_s1 + $0x230] sm:$0xf] }
  0x21   :  { %2460 = vmatpush.bf16.msra.mxu1 %v4072_v35  ;;  %v6094_v10 = vld [vmem:[%s9710_s1 + $0x344] sm:$0xf0]  ;;  %v4487_v11 = vld [vmem:[%s9710_s1 + $0x3c0] sm:$0xf]  ;;  %v6060_v15 = vld [vmem:[%s9710_s1 + $0x234] sm:$0xf0]  ;;  %v4360_v16 = vor.u32 %v6078_v8, %v4359_v6 }
  0x22   :  { %2473 = vmatpush.bf16.msra.mxu2 %v4136_v36  ;;  %v6110_v12 = vld [vmem:[%s9710_s1 + $0x3c4] sm:$0xf0]  ;;  %v4424_v17 = vor.u32 %v6094_v10, %v4423_v9  ;;  %v4351_v18 = vld [vmem:[%s9710_s1 + $0x2b0] sm:$0xf]  ;;  %v6076_v19 = vld [vmem:[%s9710_s1 + $0x2b4] sm:$0xf0]  ;;  %v4288_v28 = vor.u32 %v6060_v15, %v4287_v14 }
  0x23   :  { %2486 = vmatpush.bf16.msra.mxu3 %v4200_v39  ;;  %v4415_v20 = vld [vmem:[%s9710_s1 + $0x330] sm:$0xf]  ;;  %v4488_v21 = vor.u32 %v6110_v12, %v4487_v11  ;;  %v6092_v22 = vld [vmem:[%s9710_s1 + $0x334] sm:$0xf0]  ;;  %v4279_v25 = vld [vmem:[%s9710_s1 + $0x220] sm:$0xf]  ;;  %v4352_v29 = vor.u32 %v6076_v19, %v4351_v18 }
  0x24   :  { %2492 = vmatpush.bf16.msrb.mxu0 %v4320_v40  ;;  %v4479_v23 = vld [vmem:[%s9710_s1 + $0x3b0] sm:$0xf]  ;;  %v6108_v24 = vld [vmem:[%s9710_s1 + $0x3b4] sm:$0xf0]  ;;  %v6058_v26 = vld [vmem:[%s9710_s1 + $0x224] sm:$0xf0]  ;;  %v4416_v34 = vor.u32 %v6092_v22, %v4415_v20 }
  0x25   :  { %2505 = vmatpush.bf16.msrb.mxu1 %v4384_v41  ;;  %v41_v27 = vld [vmem:[%s9709_s0 + $0x10] sm:$0xff]  ;;  %v4343_v30 = vld [vmem:[%s9710_s1 + $0x2a0] sm:$0xf]  ;;  %v6074_v31 = vld [vmem:[%s9710_s1 + $0x2a4] sm:$0xf0]  ;;  %v4480_v39 = vor.u32 %v6108_v24, %v4479_v23 }
  0x26   :  { %2518 = vmatpush.bf16.msrb.mxu2 %v4448_v42  ;;  %v56_v32 = vld.sshfl [vmem:[#allocation1 + $0x10] sm:$0xff pattern:$0x73625140]  ;;  %v54_v33 = vld.sshfl [vmem:[#allocation1] sm:$0xff pattern:$0x73625140]  ;;  %v4344_v49 = vor.u32 %v6074_v31, %v4343_v30 }
  0x27   :  { %2531 = vmatpush.bf16.msrb.mxu3 %v4512_v46  ;;  %v6905_v35 = vpack.c.bf16 %v56_v32, %v56_v32  ;;  %v6907_v36 = vpack.c.bf16 %v54_v33, %v54_v33  ;;  %v57_v37 = vld.sshfl [vmem:[#allocation1 + $0x18] sm:$0xff pattern:$0x73625140]  ;;  %v55_v38 = vld.sshfl [vmem:[#allocation1 + $0x8] sm:$0xff pattern:$0x73625140]  ;;  %v4280_v46 = vor.u32 %v6058_v26, %v4279_v25 }
  0x28   :  { %2493 = vmatpush.bf16.msrb.mxu0 %v4312_v52  ;;  %v4407_v40 = vld [vmem:[%s9710_s1 + $0x320] sm:$0xf]  ;;  %v6090_v41 = vld [vmem:[%s9710_s1 + $0x324] sm:$0xf0]  ;;  %v6915_v42 = vpack.c.bf16 %v57_v37, %v57_v37  ;;  %62 = vst [vmem:[#allocation1] ss:$4 sm:$0xff] %v41_v27  ;;  %v6917_v43 = vpack.c.bf16 %v55_v38, %v55_v38 }
  0x29   :  { %2506 = vmatpush.bf16.msrb.mxu1 %v4376_v53  ;;  %v4471_v44 = vld [vmem:[%s9710_s1 + $0x3a0] sm:$0xf]  ;;  %v6106_v45 = vld [vmem:[%s9710_s1 + $0x3a4] sm:$0xf0]  ;;  %2474 = vmatmul.bf16.vlgmr.msra.gmra.mxu2 %v6905_v35  ;;  %v4271_v47 = vld [vmem:[%s9710_s1 + $0x210] sm:$0xf]  ;;  %v4408_v50 = vor.u32 %v6090_v41, %v4407_v40 }
  0x2a   :  { %2519 = vmatpush.bf16.msrb.mxu2 %v4440_v54  ;;  %2448 = vmatmul.bf16.vlgmr.msra.gmra.mxu0 %v6907_v36  ;;  %v6056_v48 = vld [vmem:[%s9710_s1 + $0x214] sm:$0xf0]  ;;  %v4335_v51 = vld [vmem:[%s9710_s1 + $0x290] sm:$0xf]  ;;  %v4472_v54 = vor.u32 %v6106_v45, %v4471_v44  ;;  %v40_v57 = vld [vmem:[%s9709_s0 + $0x8] sm:$0xff] }
  0x2b   :  { %2532 = vmatpush.bf16.msrb.mxu3 %v4504_v58  ;;  %v6072_v52 = vld [vmem:[%s9710_s1 + $0x294] sm:$0xf0]  ;;  %v4399_v53 = vld [vmem:[%s9710_s1 + $0x310] sm:$0xf]  ;;  %2461 = vmatmul.bf16.vlgmr.msra.gmra.mxu1 %v6917_v43  ;;  %v4263_v59 = vld [vmem:[%s9710_s1 + $0x200] sm:$0xf]  ;;  %v4272_v60 = vor.u32 %v6056_v48, %v4271_v47 }
  0x2c   :  { %2494 = vmatpush.bf16.msrb.mxu0 %v4304_v0  ;;  %2487 = vmatmul.bf16.vlgmr.msra.gmra.mxu3 %v6915_v42  ;;  %v6088_v55 = vld [vmem:[%s9710_s1 + $0x314] sm:$0xf0]  ;;  %v4463_v56 = vld [vmem:[%s9710_s1 + $0x390] sm:$0xf]  ;;  %53 = vst [vmem:[#allocation1 + $0x20] ss:$4 sm:$0xff] %v40_v57  ;;  %v4336_v0 = vor.u32 %v6072_v52, %v4335_v51 }
  0x2d   :  { %2507 = vmatpush.bf16.msrb.mxu1 %v4368_v3  ;;  %v6104_v58 = vld [vmem:[%s9710_s1 + $0x394] sm:$0xf0]  ;;  %v6054_v61 = vld [vmem:[%s9710_s1 + $0x204] sm:$0xf0]  ;;  %v4327_v62 = vld [vmem:[%s9710_s1 + $0x280] sm:$0xf]  ;;  %v4400_v1 = vor.u32 %v6088_v55, %v4399_v53 }
  0x2e   :  { %2520 = vmatpush.bf16.msrb.mxu2 %v4432_v4  ;;  %v6070_v63 = vld [vmem:[%s9710_s1 + $0x284] sm:$0xf0]  ;;  %v4391_v2 = vld [vmem:[%s9710_s1 + $0x300] sm:$0xf]  ;;  %v4464_v5 = vor.u32 %v6104_v58, %v4463_v56  ;;  %v6132_v8 = vld [vmem:[%s9710_s1 + $0x474] sm:$0xf0]  ;;  %v4264_v12 = vor.u32 %v6054_v61, %v4263_v59 }
  0x2f   :  { %2533 = vmatpush.bf16.msrb.mxu3 %v4496_v7  ;;  %v6086_v3 = vld [vmem:[%s9710_s1 + $0x304] sm:$0xf0]  ;;  %v4455_v4 = vld [vmem:[%s9710_s1 + $0x380] sm:$0xf]  ;;  %v4575_v7 = vld [vmem:[%s9710_s1 + $0x470] sm:$0xf] }
  0x30   :  { %2495 = vmatpush.bf16.msrb.mxu0 %v4296_v13  ;;  %v6102_v6 = vld [vmem:[%s9710_s1 + $0x384] sm:$0xf0]  ;;  %v4639_v9 = vld [vmem:[%s9710_s1 + $0x4f0] sm:$0xf]  ;;  %v6148_v10 = vld [vmem:[%s9710_s1 + $0x4f4] sm:$0xf0]  ;;  %v4576_v22 = vor.u32 %v6132_v8, %v4575_v7 }
  0x31   :  { %2508 = vmatpush.bf16.msrb.mxu1 %v4360_v16  ;;  %v4703_v11 = vld [vmem:[%s9710_s1 + $0x570] sm:$0xf]  ;;  %v6164_v13 = vld [vmem:[%s9710_s1 + $0x574] sm:$0xf0]  ;;  %v4328_v16 = vor.u32 %v6070_v63, %v4327_v62  ;;  %v4567_v18 = vld [vmem:[%s9710_s1 + $0x460] sm:$0xf]  ;;  %v4640_v27 = vor.u32 %v6148_v10, %v4639_v9 }
  0x32   :  { %2521 = vmatpush.bf16.msrb.mxu2 %v4424_v17  ;;  %v4767_v14 = vld [vmem:[%s9710_s1 + $0x5f0] sm:$0xf]  ;;  %v6180_v15 = vld [vmem:[%s9710_s1 + $0x5f4] sm:$0xf0]  ;;  %v4392_v17 = vor.u32 %v6086_v3, %v4391_v2  ;;  %v6130_v19 = vld [vmem:[%s9710_s1 + $0x464] sm:$0xf0] }
  0x33   :  { %2534 = vmatpush.bf16.msrb.mxu3 %v4488_v21  ;;  %v42_v20 = vld [vmem:[%s9709_s0 + $0x18] sm:$0xff]  ;;  %v4456_v21 = vor.u32 %v6102_v6, %v4455_v4  ;;  %v4631_v23 = vld [vmem:[%s9710_s1 + $0x4e0] sm:$0xf]  ;;  %v6146_v24 = vld [vmem:[%s9710_s1 + $0x4e4] sm:$0xf0]  ;;  %v4768_v31 = vor.u32 %v6180_v15, %v4767_v14  ;;  %v4568_v41 = vor.u32 %v6130_v19, %v4567_v18 }
  0x34   :  { %2496 = vmatpush.bf16.msrb.mxu0 %v4288_v28  ;;  %v60_v25 = vld.sshfl [vmem:[#allocation1 + $0x30] sm:$0xff pattern:$0x73625140]  ;;  %v58_v26 = vld.sshfl [vmem:[#allocation1 + $0x20] sm:$0xff pattern:$0x73625140]  ;;  %v4704_v28 = vor.u32 %v6164_v13, %v4703_v11  ;;  %v4632_v45 = vor.u32 %v6146_v24, %v4631_v23 }
  0x35   :  { %2509 = vmatpush.bf16.msrb.mxu1 %v4352_v29  ;;  %v61_v29 = vld.sshfl [vmem:[#allocation1 + $0x38] sm:$0xff pattern:$0x73625140]  ;;  %v59_v30 = vld.sshfl [vmem:[#allocation1 + $0x28] sm:$0xff pattern:$0x73625140] }
  0x36   :  { %2522 = vmatpush.bf16.msrb.mxu2 %v4416_v34  ;;  %v4695_v32 = vld [vmem:[%s9710_s1 + $0x560] sm:$0xf]  ;;  %v6162_v33 = vld [vmem:[%s9710_s1 + $0x564] sm:$0xf0]  ;;  %v7025_v34 = vpack.c.bf16 %v60_v25, %v60_v25  ;;  %63 = vst [vmem:[#allocation1 + $0x20] ss:$4 sm:$0xff] %v42_v20  ;;  %v7035_v40 = vpack.c.bf16 %v61_v29, %v61_v29  ;;  %v7037_v44 = vpack.c.bf16 %v59_v30, %v59_v30 }
  0x37   :  { %2535 = vmatpush.bf16.msrb.mxu3 %v4480_v39  ;;  %v4759_v37 = vld [vmem:[%s9710_s1 + $0x5e0] sm:$0xf]  ;;  %v6178_v38 = vld [vmem:[%s9710_s1 + $0x5e4] sm:$0xf0]  ;;  %v7033_v39 = vpack.c.bf16 %v58_v26, %v58_v26  ;;  %v4559_v47 = vld [vmem:[%s9710_s1 + $0x450] sm:$0xf] }
  0x38   :  { %2497 = vmatpush.bf16.msrb.mxu0 %v4280_v46  ;;  %v4696_v46 = vor.u32 %v6162_v33, %v4695_v32  ;;  %v6128_v48 = vld [vmem:[%s9710_s1 + $0x454] sm:$0xf0]  ;;  %v4687_v52 = vld [vmem:[%s9710_s1 + $0x550] sm:$0xf]  ;;  %v4551_v59 = vld [vmem:[%s9710_s1 + $0x440] sm:$0xf] }
  0x39   :  { %2510 = vmatpush.bf16.msrb.mxu1 %v4344_v49  ;;  %v4623_v49 = vld [vmem:[%s9710_s1 + $0x4d0] sm:$0xf]  ;;  %v6144_v51 = vld [vmem:[%s9710_s1 + $0x4d4] sm:$0xf0]  ;;  %v4560_v56 = vor.u32 %v6128_v48, %v4559_v47  ;;  %v4615_v61 = vld [vmem:[%s9710_s1 + $0x4c0] sm:$0xf] }
  0x3a   :  { %2523 = vmatpush.bf16.msrb.mxu2 %v4408_v50  ;;  %v4760_v50 = vor.u32 %v6178_v38, %v4759_v37  ;;  %v6160_v53 = vld [vmem:[%s9710_s1 + $0x554] sm:$0xf0]  ;;  %v4624_v57 = vor.u32 %v6144_v51, %v4623_v49  ;;  %v6142_v63 = vld [vmem:[%s9710_s1 + $0x4c4] sm:$0xf0]  ;;  %v4743_v2 = vld [vmem:[%s9710_s1 + $0x5c0] sm:$0xf] }
  0x3b   :  { %2536 = vmatpush.bf16.msrb.mxu3 %v4472_v54  ;;  %v4751_v54 = vld [vmem:[%s9710_s1 + $0x5d0] sm:$0xf]  ;;  %v6176_v55 = vld [vmem:[%s9710_s1 + $0x5d4] sm:$0xf0]  ;;  %v4688_v58 = vor.u32 %v6160_v53, %v4687_v52  ;;  %v6174_v3 = vld [vmem:[%s9710_s1 + $0x5c4] sm:$0xf0]  ;;  %v4616_v8 = vor.u32 %v6142_v63, %v4615_v61 }
  0x3c   :  { %2498 = vmatpush.bf16.msrb.mxu0 %v4272_v60  ;;  %v6126_v60 = vld [vmem:[%s9710_s1 + $0x444] sm:$0xf0]  ;;  %v4752_v62 = vor.u32 %v6176_v55, %v4751_v54  ;;  %v6124_v6 = vld [vmem:[%s9710_s1 + $0x434] sm:$0xf0]  ;;  %v4607_v7 = vld [vmem:[%s9710_s1 + $0x4b0] sm:$0xf]  ;;  %v4744_v13 = vor.u32 %v6174_v3, %v4743_v2 }
  0x3d   :  { %2511 = vmatpush.bf16.msrb.mxu1 %v4336_v0  ;;  %v4679_v0 = vld [vmem:[%s9710_s1 + $0x540] sm:$0xf]  ;;  %v4552_v4 = vor.u32 %v6126_v60, %v4551_v59  ;;  %v6140_v10 = vld [vmem:[%s9710_s1 + $0x4b4] sm:$0xf0]  ;;  %v4671_v11 = vld [vmem:[%s9710_s1 + $0x530] sm:$0xf] }
  0x3e   :  { %2524 = vmatpush.bf16.msrb.mxu2 %v4400_v1  ;;  %v6158_v1 = vld [vmem:[%s9710_s1 + $0x544] sm:$0xf0]  ;;  %v4735_v14 = vld [vmem:[%s9710_s1 + $0x5b0] sm:$0xf]  ;;  %v6172_v15 = vld [vmem:[%s9710_s1 + $0x5b4] sm:$0xf0]  ;;  %v4608_v23 = vor.u32 %v6140_v10, %v4607_v7 }
  0x3f   :  { %2537 = vmatpush.bf16.msrb.mxu3 %v4464_v5  ;;  %v4543_v5 = vld [vmem:[%s9710_s1 + $0x430] sm:$0xf]  ;;  %v4680_v9 = vor.u32 %v6158_v1, %v4679_v0  ;;  %v7121_v18 = vld.sshfl [vmem:[#allocation1] sm:$0xff pattern:$0x73625140] }
  0x40   :  { %2499 = vmatpush.bf16.msrb.mxu0 %v4264_v12  ;;  %v6156_v12 = vld [vmem:[%s9710_s1 + $0x534] sm:$0xf0]  ;;  %v7123_v19 = vld.sshfl [vmem:[#allocation1 + $0x10] sm:$0xff pattern:$0x73625140]  ;;  %v4544_v20 = vor.u32 %v6124_v6, %v4543_v5 }
  0x41   :  { %2512 = vmatpush.bf16.msrb.mxu1 %v4328_v16  ;;  %v43_v16 = vld [vmem:[%s9709_s0 + $0x20] sm:$0xff]  ;;  %v4672_v24 = vor.u32 %v6156_v12, %v4671_v11  ;;  %v6122_v25 = vld [vmem:[%s9710_s1 + $0x424] sm:$0xf0]  ;;  %v6136_v48 = vld [vmem:[%s9710_s1 + $0x494] sm:$0xf0] }
  0x42   :  { %2525 = vmatpush.bf16.msrb.mxu2 %v4392_v17  ;;  %v4535_v17 = vld [vmem:[%s9710_s1 + $0x420] sm:$0xf]  ;;  %v6154_v30 = vld [vmem:[%s9710_s1 + $0x524] sm:$0xf0]  ;;  %v4655_v49 = vld [vmem:[%s9710_s1 + $0x510] sm:$0xf] }
  0x43   :  { %2538 = vmatpush.bf16.msrb.mxu3 %v4456_v21  ;;  %2500 = vmatmul.bf16.vlgmr.msrb.gmra.mxu0 %v7033_v39  ;;  %v7125_v21 = vld.sshfl [vmem:[#allocation1 + $0x8] sm:$0xff pattern:$0x73625140]  ;;  %v4599_v26 = vld [vmem:[%s9710_s1 + $0x4a0] sm:$0xf]  ;;  %v4536_v33 = vor.u32 %v6122_v25, %v4535_v17 }
  0x44   :  { %2544 = vmatpush.bf16.msra.mxu0 %v4576_v22  ;;  %2513 = vmatmul.bf16.vlgmr.msrb.gmra.mxu1 %v7037_v44  ;;  %v7127_v22 = vld.sshfl [vmem:[#allocation1 + $0x18] sm:$0xff pattern:$0x73625140]  ;;  %v4663_v29 = vld [vmem:[%s9710_s1 + $0x520] sm:$0xf] }
  0x45   :  { %2557 = vmatpush.bf16.msra.mxu1 %v4640_v27  ;;  %2526 = vmatmul.bf16.vlgmr.msrb.gmra.mxu2 %v7025_v34  ;;  %72 = vst [vmem:[#allocation1] ss:$4 sm:$0xff] %v43_v16  ;;  %v4736_v27 = vor.u32 %v6172_v15, %v4735_v14  ;;  %v6170_v32 = vld [vmem:[%s9710_s1 + $0x5a4] sm:$0xf0]  ;;  %v4664_v38 = vor.u32 %v6154_v30, %v4663_v29  ;;  %v4719_v51 = vld [vmem:[%s9710_s1 + $0x590] sm:$0xf] }
  0x46   :  { %2570 = vmatpush.bf16.msra.mxu2 %v4704_v28  ;;  %2539 = vmatmul.bf16.vlgmr.msrb.gmra.mxu3 %v7035_v40  ;;  %v6138_v28 = vld [vmem:[%s9710_s1 + $0x4a4] sm:$0xf0]  ;;  %v6168_v52 = vld [vmem:[%s9710_s1 + $0x594] sm:$0xf0]  ;;  %v4519_v54 = vld [vmem:[%s9710_s1 + $0x400] sm:$0xf] }
  0x47   :  { %2583 = vmatpush.bf16.msra.mxu3 %v4768_v31  ;;  %v4727_v31 = vld [vmem:[%s9710_s1 + $0x5a0] sm:$0xf]  ;;  %v4600_v37 = vor.u32 %v6138_v28, %v4599_v26  ;;  %v6118_v55 = vld [vmem:[%s9710_s1 + $0x404] sm:$0xf0]  ;;  %v4720_v61 = vor.u32 %v6168_v52, %v4719_v51  ;;  %v4831_v1 = vld [vmem:[%s9710_s1 + $0x670] sm:$0xf]  ;;  %v7246_v28 = vpack.c.bf16 %v7123_v19, %v7123_v19 }
  0x48   :  { %2545 = vmatpush.bf16.msra.mxu0 %v4568_v41  ;;  %v4527_v41 = vld [vmem:[%s9710_s1 + $0x410] sm:$0xf]  ;;  %v4728_v47 = vor.u32 %v6170_v32, %v4727_v31  ;;  %v6134_v59 = vld [vmem:[%s9710_s1 + $0x484] sm:$0xf0]  ;;  %v4647_v60 = vld [vmem:[%s9710_s1 + $0x500] sm:$0xf]  ;;  %v7260_v31 = vpack.c.bf16 %v7127_v22, %v7127_v22 }
  0x49   :  { %2558 = vmatpush.bf16.msra.mxu1 %v4632_v45  ;;  %v6120_v45 = vld [vmem:[%s9710_s1 + $0x414] sm:$0xf0]  ;;  %v4711_v63 = vld [vmem:[%s9710_s1 + $0x580] sm:$0xf]  ;;  %v6166_v0 = vld [vmem:[%s9710_s1 + $0x584] sm:$0xf0] }
  0x4a   :  { %2571 = vmatpush.bf16.msra.mxu2 %v4696_v46  ;;  %v4591_v46 = vld [vmem:[%s9710_s1 + $0x490] sm:$0xf]  ;;  %v4528_v53 = vor.u32 %v6120_v45, %v4527_v41  ;;  %v6196_v2 = vld [vmem:[%s9710_s1 + $0x674] sm:$0xf0]  ;;  %v4712_v12 = vor.u32 %v6166_v0, %v4711_v63  ;;  %v4823_v16 = vld [vmem:[%s9710_s1 + $0x660] sm:$0xf] }
  0x4b   :  { %2584 = vmatpush.bf16.msra.mxu3 %v4760_v50  ;;  %v6152_v50 = vld [vmem:[%s9710_s1 + $0x514] sm:$0xf0]  ;;  %v4895_v3 = vld [vmem:[%s9710_s1 + $0x6f0] sm:$0xf]  ;;  %v6194_v17 = vld [vmem:[%s9710_s1 + $0x664] sm:$0xf0] }
  0x4c   :  { %2546 = vmatpush.bf16.msra.mxu0 %v4560_v56  ;;  %v4592_v56 = vor.u32 %v6136_v48, %v4591_v46  ;;  %v6212_v5 = vld [vmem:[%s9710_s1 + $0x6f4] sm:$0xf0]  ;;  %v4959_v6 = vld [vmem:[%s9710_s1 + $0x770] sm:$0xf]  ;;  %v6210_v25 = vld [vmem:[%s9710_s1 + $0x6e4] sm:$0xf0]  ;;  %v4824_v19 = vor.u32 %v6194_v17, %v4823_v16 }
  0x4d   :  { %2559 = vmatpush.bf16.msra.mxu1 %v4624_v57  ;;  %v4656_v57 = vor.u32 %v6152_v50, %v4655_v49  ;;  %v6228_v7 = vld [vmem:[%s9710_s1 + $0x774] sm:$0xf0]  ;;  %v5023_v10 = vld [vmem:[%s9710_s1 + $0x7f0] sm:$0xf]  ;;  %v4896_v14 = vor.u32 %v6212_v5, %v4895_v3  ;;  %v4951_v26 = vld [vmem:[%s9710_s1 + $0x760] sm:$0xf] }
  0x4e   :  { %2572 = vmatpush.bf16.msra.mxu2 %v4688_v58  ;;  %v4583_v58 = vld [vmem:[%s9710_s1 + $0x480] sm:$0xf]  ;;  %v6244_v11 = vld [vmem:[%s9710_s1 + $0x7f4] sm:$0xf0]  ;;  %v4960_v15 = vor.u32 %v6228_v7, %v4959_v6  ;;  %v6242_v30 = vld [vmem:[%s9710_s1 + $0x7e4] sm:$0xf0] }
  0x4f   :  { %2585 = vmatpush.bf16.msra.mxu3 %v4752_v62  ;;  %v6150_v62 = vld [vmem:[%s9710_s1 + $0x504] sm:$0xf0]  ;;  %v5015_v29 = vld [vmem:[%s9710_s1 + $0x7e0] sm:$0xf]  ;;  %v6208_v22 = vld [vmem:[%s9710_s1 + $0x6d4] sm:$0xf0] }
  0x50   :  { %2547 = vmatpush.bf16.msra.mxu0 %v4552_v4  ;;  %v4520_v4 = vor.u32 %v6118_v55, %v4519_v54  ;;  %v5016_v41 = vor.u32 %v6242_v30, %v5015_v29  ;;  %v4943_v45 = vld [vmem:[%s9710_s1 + $0x750] sm:$0xf]  ;;  %v6224_v46 = vld [vmem:[%s9710_s1 + $0x754] sm:$0xf0]  ;;  %v4807_v49 = vld [vmem:[%s9710_s1 + $0x640] sm:$0xf] }
  0x51   :  { %2560 = vmatpush.bf16.msra.mxu1 %v4616_v8  ;;  %v4584_v8 = vor.u32 %v6134_v59, %v4583_v58  ;;  %v6240_v48 = vld [vmem:[%s9710_s1 + $0x7d4] sm:$0xf0]  ;;  %v6190_v50 = vld [vmem:[%s9710_s1 + $0x644] sm:$0xf0]  ;;  %v4871_v52 = vld [vmem:[%s9710_s1 + $0x6c0] sm:$0xf]  ;;  %v4944_v58 = vor.u32 %v6224_v46, %v4943_v45 }
  0x52   :  { %2573 = vmatpush.bf16.msra.mxu2 %v4680_v9  ;;  %v4648_v9 = vor.u32 %v6150_v62, %v4647_v60  ;;  %v4935_v54 = vld [vmem:[%s9710_s1 + $0x740] sm:$0xf]  ;;  %v6222_v55 = vld [vmem:[%s9710_s1 + $0x744] sm:$0xf0]  ;;  %v4799_v5 = vld [vmem:[%s9710_s1 + $0x630] sm:$0xf] }
  0x53   :  { %2586 = vmatpush.bf16.msra.mxu3 %v4744_v13  ;;  %v4832_v13 = vor.u32 %v6196_v2, %v4831_v1  ;;  %v7311_v59 = vld.sshfl [vmem:[#allocation1 + $0x20] sm:$0xff pattern:$0x73625140]  ;;  %v7313_v60 = vld.sshfl [vmem:[#allocation1 + $0x30] sm:$0xff pattern:$0x73625140]  ;;  %v4808_v2 = vor.u32 %v6190_v50, %v4807_v49 }
  0x54   :  { %2548 = vmatpush.bf16.msra.mxu0 %v4544_v20  ;;  %v4887_v20 = vld [vmem:[%s9710_s1 + $0x6e0] sm:$0xf]  ;;  %v7315_v62 = vld.sshfl [vmem:[#allocation1 + $0x28] sm:$0xff pattern:$0x73625140] }
  0x55   :  { %2561 = vmatpush.bf16.msra.mxu1 %v4608_v23  ;;  %v5024_v23 = vor.u32 %v6244_v11, %v5023_v10  ;;  %v4888_v32 = vor.u32 %v6210_v25, %v4887_v20  ;;  %v7317_v63 = vld.sshfl [vmem:[#allocation1 + $0x38] sm:$0xff pattern:$0x73625140]  ;;  %v4999_v0 = vld [vmem:[%s9710_s1 + $0x7c0] sm:$0xf] }
  0x56   :  { %2574 = vmatpush.bf16.msra.mxu2 %v4672_v24  ;;  %v7233_v24 = vpack.c.bf16 %v7121_v18, %v7121_v18  ;;  %v7250_v18 = vpack.c.bf16 %v7125_v21, %v7125_v21  ;;  %v4815_v21 = vld [vmem:[%s9710_s1 + $0x650] sm:$0xf]  ;;  %v6238_v1 = vld [vmem:[%s9710_s1 + $0x7c4] sm:$0xf0]  ;;  %v6188_v6 = vld [vmem:[%s9710_s1 + $0x634] sm:$0xf0] }
  0x57   :  { %2587 = vmatpush.bf16.msra.mxu3 %v4736_v27  ;;  %v6226_v27 = vld [vmem:[%s9710_s1 + $0x764] sm:$0xf0]  ;;  %v4863_v7 = vld [vmem:[%s9710_s1 + $0x6b0] sm:$0xf]  ;;  %v6220_v11 = vld [vmem:[%s9710_s1 + $0x734] sm:$0xf0] }
  0x58   :  { %2549 = vmatpush.bf16.msra.mxu0 %v4536_v33  ;;  %v4952_v33 = vor.u32 %v6226_v27, %v4951_v26  ;;  %v4927_v10 = vld [vmem:[%s9710_s1 + $0x730] sm:$0xf]  ;;  %v4791_v17 = vld [vmem:[%s9710_s1 + $0x620] sm:$0xf]  ;;  %v6186_v20 = vld [vmem:[%s9710_s1 + $0x624] sm:$0xf0] }
  0x59   :  { %2562 = vmatpush.bf16.msra.mxu1 %v4600_v37  ;;  %v6192_v37 = vld [vmem:[%s9710_s1 + $0x654] sm:$0xf0]  ;;  %v4928_v16 = vor.u32 %v6220_v11, %v4927_v10  ;;  %v6202_v26 = vld [vmem:[%s9710_s1 + $0x6a4] sm:$0xf0]  ;;  %v4919_v27 = vld [vmem:[%s9710_s1 + $0x720] sm:$0xf] }
  0x5a   :  { %2575 = vmatpush.bf16.msra.mxu2 %v4664_v38  ;;  %v4879_v38 = vld [vmem:[%s9710_s1 + $0x6d0] sm:$0xf]  ;;  %v4816_v51 = vor.u32 %v6192_v37, %v4815_v21  ;;  %v6218_v29 = vld [vmem:[%s9710_s1 + $0x724] sm:$0xf0]  ;;  %v4983_v30 = vld [vmem:[%s9710_s1 + $0x7a0] sm:$0xf]  ;;  %v4792_v21 = vor.u32 %v6186_v20, %v4791_v17 }
  0x5b   :  { %2588 = vmatpush.bf16.msra.mxu3 %v4728_v47  ;;  %v5007_v47 = vld [vmem:[%s9710_s1 + $0x7d0] sm:$0xf]  ;;  %v6200_v45 = vld [vmem:[%s9710_s1 + $0x694] sm:$0xf0]  ;;  %v4775_v50 = vld [vmem:[%s9710_s1 + $0x600] sm:$0xf] }
  0x5c   :  { %2550 = vmatpush.bf16.msra.mxu0 %v4528_v53  ;;  %v6206_v53 = vld [vmem:[%s9710_s1 + $0x6c4] sm:$0xf0]  ;;  %v4783_v37 = vld [vmem:[%s9710_s1 + $0x610] sm:$0xf]  ;;  %v6232_v49 = vld [vmem:[%s9710_s1 + $0x794] sm:$0xf0] }
  0x5d   :  { %2563 = vmatpush.bf16.msra.mxu1 %v4592_v56  ;;  %v44_v56 = vld [vmem:[%s9709_s0 + $0x28] sm:$0xff]  ;;  %v4872_v3 = vor.u32 %v6206_v53, %v4871_v52  ;;  %v4911_v46 = vld [vmem:[%s9710_s1 + $0x710] sm:$0xf]  ;;  %v4839_v53 = vld [vmem:[%s9710_s1 + $0x680] sm:$0xf] }
  0x5e   :  { %2576 = vmatpush.bf16.msra.mxu2 %v4656_v57  ;;  %v4880_v57 = vor.u32 %v6208_v22, %v4879_v38  ;;  %73 = vst [vmem:[#allocation1 + $0x20] ss:$4 sm:$0xff] %v44_v56  ;;  %v6184_v38 = vld [vmem:[%s9710_s1 + $0x614] sm:$0xf0]  ;;  %v4847_v22 = vld [vmem:[%s9710_s1 + $0x690] sm:$0xf] }
  0x5f   :  { %2589 = vmatpush.bf16.msra.mxu3 %v4720_v61  ;;  %v5008_v61 = vor.u32 %v6240_v48, %v5007_v47  ;;  %v6216_v47 = vld [vmem:[%s9710_s1 + $0x714] sm:$0xf0]  ;;  %v4975_v48 = vld [vmem:[%s9710_s1 + $0x790] sm:$0xf]  ;;  %v6182_v52 = vld [vmem:[%s9710_s1 + $0x604] sm:$0xf0] }
  0x60   :  { %2551 = vmatpush.bf16.msra.mxu0 %v4520_v4  ;;  %v4936_v4 = vor.u32 %v6222_v55, %v4935_v54  ;;  %v6198_v54 = vld [vmem:[%s9710_s1 + $0x684] sm:$0xf0]  ;;  %v4848_v55 = vor.u32 %v6200_v45, %v4847_v22  ;;  %v4912_v56 = vor.u32 %v6216_v47, %v4911_v46 }
  0x61   :  { %2564 = vmatpush.bf16.msra.mxu1 %v4584_v8  ;;  %v5000_v8 = vor.u32 %v6238_v1, %v4999_v0  ;;  %v4976_v0 = vor.u32 %v6232_v49, %v4975_v48  ;;  %v6230_v1 = vld [vmem:[%s9710_s1 + $0x784] sm:$0xf0] }
  0x62   :  { %2577 = vmatpush.bf16.msra.mxu2 %v4648_v9  ;;  %v6204_v9 = vld [vmem:[%s9710_s1 + $0x6b4] sm:$0xf0] }
  0x63   :  { %2590 = vmatpush.bf16.msra.mxu3 %v4712_v12  ;;  %2552 = vmatmul.bf16.vlgmr.msra.gmra.mxu0 %v7233_v24  ;;  %v4991_v12 = vld [vmem:[%s9710_s1 + $0x7b0] sm:$0xf] }
  0x64   :  { %2596 = vmatpush.bf16.msrb.mxu0 %v4832_v13  ;;  %2565 = vmatmul.bf16.vlgmr.msra.gmra.mxu1 %v7250_v18  ;;  %v6236_v13 = vld [vmem:[%s9710_s1 + $0x7b4] sm:$0xf0] }
  0x65   :  { %2609 = vmatpush.bf16.msrb.mxu1 %v4896_v14  ;;  %2578 = vmatmul.bf16.vlgmr.msra.gmra.mxu2 %v7246_v28  ;;  %v4800_v14 = vor.u32 %v6188_v6, %v4799_v5  ;;  %v4992_v25 = vor.u32 %v6236_v13, %v4991_v12 }
  0x66   :  { %2622 = vmatpush.bf16.msrb.mxu2 %v4960_v15  ;;  %2591 = vmatmul.bf16.vlgmr.msra.gmra.mxu3 %v7260_v31  ;;  %v4864_v15 = vor.u32 %v6204_v9, %v4863_v7 }
  0x67   :  { %2635 = vmatpush.bf16.msrb.mxu3 %v5024_v23  ;;  %v4855_v23 = vld [vmem:[%s9710_s1 + $0x6a0] sm:$0xf] }
  0x68   :  { %2597 = vmatpush.bf16.msrb.mxu0 %v4824_v19  ;;  %v6234_v19 = vld [vmem:[%s9710_s1 + $0x7a4] sm:$0xf0] }
  0x69   :  { %2610 = vmatpush.bf16.msrb.mxu1 %v4888_v32  ;;  %v4856_v32 = vor.u32 %v6202_v26, %v4855_v23 }
  0x6a   :  { %2623 = vmatpush.bf16.msrb.mxu2 %v4952_v33  ;;  %v4920_v33 = vor.u32 %v6218_v29, %v4919_v27 }
  0x6b   :  { %2636 = vmatpush.bf16.msrb.mxu3 %v5016_v41  ;;  %v4984_v41 = vor.u32 %v6234_v19, %v4983_v30 }
  0x6c   :  { %2598 = vmatpush.bf16.msrb.mxu0 %v4816_v51  ;;  %v4784_v51 = vor.u32 %v6184_v38, %v4783_v37 }
  0x6d   :  { %2611 = vmatpush.bf16.msrb.mxu1 %v4880_v57  ;;  %v4903_v57 = vld [vmem:[%s9710_s1 + $0x700] sm:$0xf] }
  0x6e   :  { %2624 = vmatpush.bf16.msrb.mxu2 %v4944_v58  ;;  %v6214_v58 = vld [vmem:[%s9710_s1 + $0x704] sm:$0xf0] }
  0x6f   :  { %2637 = vmatpush.bf16.msrb.mxu3 %v5008_v61  ;;  %v4967_v61 = vld [vmem:[%s9710_s1 + $0x780] sm:$0xf] }
  0x70   :  { %2599 = vmatpush.bf16.msrb.mxu0 %v4808_v2  ;;  %v5087_v2 = vld [vmem:[%s9710_s1 + $0x870] sm:$0xf] }
  0x71   :  { %2612 = vmatpush.bf16.msrb.mxu1 %v4872_v3  ;;  %v6260_v3 = vld [vmem:[%s9710_s1 + $0x874] sm:$0xf0] }
  0x72   :  { %2625 = vmatpush.bf16.msrb.mxu2 %v4936_v4  ;;  %v5151_v4 = vld [vmem:[%s9710_s1 + $0x8f0] sm:$0xf] }
  0x73   :  { %2638 = vmatpush.bf16.msrb.mxu3 %v5000_v8 }
  0x74   :  { %2600 = vmatpush.bf16.msrb.mxu0 %v4800_v14 }
  0x75   :  { %2613 = vmatpush.bf16.msrb.mxu1 %v4864_v15 }
  0x76   :  { %2626 = vmatpush.bf16.msrb.mxu2 %v4928_v16 }
  0x77   :  { %2639 = vmatpush.bf16.msrb.mxu3 %v4992_v25 }
  0x78   :  { %2601 = vmatpush.bf16.msrb.mxu0 %v4792_v21 }
  0x79   :  { %2614 = vmatpush.bf16.msrb.mxu1 %v4856_v32 }
  0x7a   :  { %2627 = vmatpush.bf16.msrb.mxu2 %v4920_v33 }
  0x7b   :  { %2640 = vmatpush.bf16.msrb.mxu3 %v4984_v41 }
  0x7c   :  { %16 = vsyncpa [#allocation3], 0  ;;  %2602 = vmatpush.bf16.msrb.mxu0 %v4784_v51  ;;  %v4776_v5 = vor.u32 %v6182_v52, %v4775_v50  ;;  %v6276_v6 = vld [vmem:[%s9710_s1 + $0x8f4] sm:$0xf0]  ;;  %v5215_v7 = vld [vmem:[%s9710_s1 + $0x970] sm:$0xf]  ;;  %v4840_v9 = vor.u32 %v6198_v54, %v4839_v53  ;;  %v4904_v10 = vor.u32 %v6214_v58, %v4903_v57  ;;  %v4968_v13 = vor.u32 %v6230_v1, %v4967_v61 }
  0x7d   :  { %v6292_v8 = vld [vmem:[%s9710_s1 + $0x974] sm:$0xf0]  ;;  %2615 = vmatpush.bf16.msrb.mxu1 %v4848_v55  ;;  %v5279_v11 = vld [vmem:[%s9710_s1 + $0x9f0] sm:$0xf]  ;;  %v5088_v14 = vor.u32 %v6260_v3, %v5087_v2  ;;  %v5152_v15 = vor.u32 %v6276_v6, %v5151_v4  ;;  %v5079_v17 = vld [vmem:[%s9710_s1 + $0x860] sm:$0xf]  ;;  %v7456_v26 = vpack.c.bf16 %v7311_v59, %v7311_v59  ;;  %v7469_v19 = vpack.c.bf16 %v7313_v60, %v7313_v60 }
  0x7e   :  { %2628 = vmatpush.bf16.msrb.mxu2 %v4912_v56  ;;  %v6308_v12 = vld [vmem:[%s9710_s1 + $0x9f4] sm:$0xf0]  ;;  %v5216_v16 = vor.u32 %v6292_v8, %v5215_v7  ;;  %v6258_v20 = vld [vmem:[%s9710_s1 + $0x864] sm:$0xf0]  ;;  %v5143_v23 = vld [vmem:[%s9710_s1 + $0x8e0] sm:$0xf]  ;;  %v7473_v59 = vpack.c.bf16 %v7315_v62, %v7315_v62  ;;  %v7483_v33 = vpack.c.bf16 %v7317_v63, %v7317_v63 }
  0x7f   :  { %2641 = vmatpush.bf16.msrb.mxu3 %v4976_v0  ;;  %v5280_v25 = vor.u32 %v6308_v12, %v5279_v11  ;;  %v6274_v27 = vld [vmem:[%s9710_s1 + $0x8e4] sm:$0xf0]  ;;  %v5207_v29 = vld [vmem:[%s9710_s1 + $0x960] sm:$0xf]  ;;  %v5080_v60 = vor.u32 %v6258_v20, %v5079_v17  ;;  %v5071_v38 = vld [vmem:[%s9710_s1 + $0x850] sm:$0xf] }
  0x80   :  { %2603 = vmatpush.bf16.msrb.mxu0 %v4776_v5  ;;  %v6290_v30 = vld [vmem:[%s9710_s1 + $0x964] sm:$0xf0]  ;;  %v5271_v21 = vld [vmem:[%s9710_s1 + $0x9e0] sm:$0xf]  ;;  %v5144_v37 = vor.u32 %v6274_v27, %v5143_v23  ;;  %v6256_v22 = vld [vmem:[%s9710_s1 + $0x854] sm:$0xf0] }
  0x81   :  { %2616 = vmatpush.bf16.msrb.mxu1 %v4840_v9  ;;  %v6306_v32 = vld [vmem:[%s9710_s1 + $0x9e4] sm:$0xf0]  ;;  %v5208_v62 = vor.u32 %v6290_v30, %v5207_v29  ;;  %v5135_v41 = vld [vmem:[%s9710_s1 + $0x8d0] sm:$0xf]  ;;  %v6272_v45 = vld [vmem:[%s9710_s1 + $0x8d4] sm:$0xf0]  ;;  %v5072_v50 = vor.u32 %v6256_v22, %v5071_v38 }
  0x82   :  { %2629 = vmatpush.bf16.msrb.mxu2 %v4904_v10  ;;  %v5272_v63 = vor.u32 %v6306_v32, %v5271_v21  ;;  %v5199_v46 = vld [vmem:[%s9710_s1 + $0x950] sm:$0xf]  ;;  %v6288_v47 = vld [vmem:[%s9710_s1 + $0x954] sm:$0xf0]  ;;  %v5136_v51 = vor.u32 %v6272_v45, %v5135_v41  ;;  %v5063_v53 = vld [vmem:[%s9710_s1 + $0x840] sm:$0xf] }
  0x83   :  { %2642 = vmatpush.bf16.msrb.mxu3 %v4968_v13  ;;  %2604 = vmatmul.bf16.vlgmr.msrb.gmra.mxu0 %v7456_v26  ;;  %v5263_v48 = vld [vmem:[%s9710_s1 + $0x9d0] sm:$0xf]  ;;  %v6304_v49 = vld [vmem:[%s9710_s1 + $0x9d4] sm:$0xf0]  ;;  %v5200_v52 = vor.u32 %v6288_v47, %v5199_v46  ;;  %v6254_v54 = vld [vmem:[%s9710_s1 + $0x844] sm:$0xf0] }
  0x84   :  { %2648 = vmatpush.bf16.msra.mxu0 %v5088_v14  ;;  %2617 = vmatmul.bf16.vlgmr.msrb.gmra.mxu1 %v7473_v59  ;;  %v5127_v55 = vld [vmem:[%s9710_s1 + $0x8c0] sm:$0xf]  ;;  %v5264_v56 = vor.u32 %v6304_v49, %v5263_v48  ;;  %v6270_v57 = vld [vmem:[%s9710_s1 + $0x8c4] sm:$0xf0]  ;;  %v5064_v2 = vor.u32 %v6254_v54, %v5063_v53  ;;  %v5055_v5 = vld [vmem:[%s9710_s1 + $0x830] sm:$0xf] }
  0x85   :  { %2661 = vmatpush.bf16.msra.mxu1 %v5152_v15  ;;  %2630 = vmatmul.bf16.vlgmr.msrb.gmra.mxu2 %v7469_v19  ;;  %v5191_v58 = vld [vmem:[%s9710_s1 + $0x940] sm:$0xf]  ;;  %v6286_v61 = vld [vmem:[%s9710_s1 + $0x944] sm:$0xf0]  ;;  %v5128_v3 = vor.u32 %v6270_v57, %v5127_v55  ;;  %v6252_v6 = vld [vmem:[%s9710_s1 + $0x834] sm:$0xf0] }
  0x86   :  { %2674 = vmatpush.bf16.msra.mxu2 %v5216_v16  ;;  %2643 = vmatmul.bf16.vlgmr.msrb.gmra.mxu3 %v7483_v33  ;;  %v5255_v0 = vld [vmem:[%s9710_s1 + $0x9c0] sm:$0xf]  ;;  %v6302_v1 = vld [vmem:[%s9710_s1 + $0x9c4] sm:$0xf0]  ;;  %v5192_v4 = vor.u32 %v6286_v61, %v5191_v58  ;;  %v5119_v7 = vld [vmem:[%s9710_s1 + $0x8b0] sm:$0xf]  ;;  %v5056_v14 = vor.u32 %v6252_v6, %v5055_v5 }
  0x87   :  { %2687 = vmatpush.bf16.msra.mxu3 %v5280_v25  ;;  %v5256_v8 = vor.u32 %v6302_v1, %v5255_v0  ;;  %v6268_v9 = vld [vmem:[%s9710_s1 + $0x8b4] sm:$0xf0]  ;;  %v5183_v10 = vld [vmem:[%s9710_s1 + $0x930] sm:$0xf]  ;;  %v5047_v17 = vld [vmem:[%s9710_s1 + $0x820] sm:$0xf] }
  0x88   :  { %2649 = vmatpush.bf16.msra.mxu0 %v5080_v60  ;;  %v6284_v11 = vld [vmem:[%s9710_s1 + $0x934] sm:$0xf0]  ;;  %v5247_v12 = vld [vmem:[%s9710_s1 + $0x9b0] sm:$0xf]  ;;  %v5120_v15 = vor.u32 %v6268_v9, %v5119_v7  ;;  %v6250_v20 = vld [vmem:[%s9710_s1 + $0x824] sm:$0xf0] }
  0x89   :  { %2662 = vmatpush.bf16.msra.mxu1 %v5144_v37  ;;  %v6300_v13 = vld [vmem:[%s9710_s1 + $0x9b4] sm:$0xf0]  ;;  %v5184_v16 = vor.u32 %v6284_v11, %v5183_v10  ;;  %v5111_v23 = vld [vmem:[%s9710_s1 + $0x8a0] sm:$0xf]  ;;  %v6266_v27 = vld [vmem:[%s9710_s1 + $0x8a4] sm:$0xf0]  ;;  %v5048_v60 = vor.u32 %v6250_v20, %v5047_v17 }
  0x8a   :  { %2675 = vmatpush.bf16.msra.mxu2 %v5208_v62  ;;  %v5248_v25 = vor.u32 %v6300_v13, %v5247_v12  ;;  %v5175_v29 = vld [vmem:[%s9710_s1 + $0x920] sm:$0xf]  ;;  %v6282_v30 = vld [vmem:[%s9710_s1 + $0x924] sm:$0xf0]  ;;  %v5112_v37 = vor.u32 %v6266_v27, %v5111_v23  ;;  %v5039_v38 = vld [vmem:[%s9710_s1 + $0x810] sm:$0xf] }
  0x8b   :  { %2688 = vmatpush.bf16.msra.mxu3 %v5272_v63  ;;  %v5239_v21 = vld [vmem:[%s9710_s1 + $0x9a0] sm:$0xf]  ;;  %v6298_v32 = vld [vmem:[%s9710_s1 + $0x9a4] sm:$0xf0]  ;;  %v5176_v62 = vor.u32 %v6282_v30, %v5175_v29  ;;  %v6248_v22 = vld [vmem:[%s9710_s1 + $0x814] sm:$0xf0] }
  0x8c   :  { %2650 = vmatpush.bf16.msra.mxu0 %v5072_v50  ;;  %v5103_v41 = vld [vmem:[%s9710_s1 + $0x890] sm:$0xf]  ;;  %v5240_v63 = vor.u32 %v6298_v32, %v5239_v21  ;;  %v6264_v45 = vld [vmem:[%s9710_s1 + $0x894] sm:$0xf0]  ;;  %v5031_v50 = vld [vmem:[%s9710_s1 + $0x800] sm:$0xf] }
  0x8d   :  { %2663 = vmatpush.bf16.msra.mxu1 %v5136_v51  ;;  %v5167_v46 = vld [vmem:[%s9710_s1 + $0x910] sm:$0xf]  ;;  %v6280_v47 = vld [vmem:[%s9710_s1 + $0x914] sm:$0xf0]  ;;  %v5040_v51 = vor.u32 %v6248_v22, %v5039_v38  ;;  %v5095_v53 = vld [vmem:[%s9710_s1 + $0x880] sm:$0xf]  ;;  %v5104_v55 = vor.u32 %v6264_v45, %v5103_v41 }
  0x8e   :  { %2676 = vmatpush.bf16.msra.mxu2 %v5200_v52  ;;  %v5231_v48 = vld [vmem:[%s9710_s1 + $0x990] sm:$0xf]  ;;  %v6296_v49 = vld [vmem:[%s9710_s1 + $0x994] sm:$0xf0]  ;;  %v6246_v52 = vld [vmem:[%s9710_s1 + $0x804] sm:$0xf0] }
  0x8f   :  { %2689 = vmatpush.bf16.msra.mxu3 %v5264_v56  ;;  %v6262_v54 = vld [vmem:[%s9710_s1 + $0x884] sm:$0xf0]  ;;  %v5168_v56 = vor.u32 %v6280_v47, %v5167_v46  ;;  %v5159_v57 = vld [vmem:[%s9710_s1 + $0x900] sm:$0xf]  ;;  %v5232_v0 = vor.u32 %v6296_v49, %v5231_v48  ;;  %v6340_v5 = vld [vmem:[%s9710_s1 + $0xaf4] sm:$0xf0]  ;;  %v5032_v7 = vor.u32 %v6246_v52, %v5031_v50 }
  0x90   :  { %2651 = vmatpush.bf16.msra.mxu0 %v5064_v2  ;;  %v6278_v58 = vld [vmem:[%s9710_s1 + $0x904] sm:$0xf0]  ;;  %v5223_v61 = vld [vmem:[%s9710_s1 + $0x980] sm:$0xf]  ;;  %v5343_v2 = vld [vmem:[%s9710_s1 + $0xa70] sm:$0xf]  ;;  %v5096_v11 = vor.u32 %v6262_v54, %v5095_v53 }
  0x91   :  { %2664 = vmatpush.bf16.msra.mxu1 %v5128_v3  ;;  %v6294_v1 = vld [vmem:[%s9710_s1 + $0x984] sm:$0xf0]  ;;  %v6324_v3 = vld [vmem:[%s9710_s1 + $0xa74] sm:$0xf0]  ;;  %v5471_v6 = vld [vmem:[%s9710_s1 + $0xb70] sm:$0xf]  ;;  %v5160_v12 = vor.u32 %v6278_v58, %v5159_v57 }
  0x92   :  { %2677 = vmatpush.bf16.msra.mxu2 %v5192_v4  ;;  %v5407_v4 = vld [vmem:[%s9710_s1 + $0xaf0] sm:$0xf]  ;;  %v6372_v10 = vld [vmem:[%s9710_s1 + $0xbf4] sm:$0xf0]  ;;  %v5335_v27 = vld [vmem:[%s9710_s1 + $0xa60] sm:$0xf] }
  0x93   :  { %2690 = vmatpush.bf16.msra.mxu3 %v5256_v8  ;;  %v6356_v8 = vld [vmem:[%s9710_s1 + $0xb74] sm:$0xf0]  ;;  %v5535_v9 = vld [vmem:[%s9710_s1 + $0xbf0] sm:$0xf]  ;;  %v5408_v23 = vor.u32 %v6340_v5, %v5407_v4  ;;  %v6322_v29 = vld [vmem:[%s9710_s1 + $0xa64] sm:$0xf0] }
  0x94   :  { %2652 = vmatpush.bf16.msra.mxu0 %v5056_v14  ;;  %v74_v13 = vld.sshfl [vmem:[#allocation1] sm:$0xff pattern:$0x73625140]  ;;  %v76_v14 = vld.sshfl [vmem:[#allocation1 + $0x10] sm:$0xff pattern:$0x73625140]  ;;  %v5536_v21 = vor.u32 %v6372_v10, %v5535_v9  ;;  %v5336_v46 = vor.u32 %v6322_v29, %v5335_v27 }
  0x95   :  { %2665 = vmatpush.bf16.msra.mxu1 %v5120_v15  ;;  %v5224_v15 = vor.u32 %v6294_v1, %v5223_v61  ;;  %v75_v17 = vld.sshfl [vmem:[#allocation1 + $0x8] sm:$0xff pattern:$0x73625140]  ;;  %v77_v20 = vld.sshfl [vmem:[#allocation1 + $0x18] sm:$0xff pattern:$0x73625140]  ;;  %v7666_v32 = vpack.c.bf16 %v74_v13, %v74_v13  ;;  %v7677_v38 = vpack.c.bf16 %v76_v14, %v76_v14 }
  0x96   :  { %2678 = vmatpush.bf16.msra.mxu2 %v5184_v16  ;;  %v5344_v16 = vor.u32 %v6324_v3, %v5343_v2  ;;  %v5399_v30 = vld [vmem:[%s9710_s1 + $0xae0] sm:$0xf]  ;;  %v7679_v22 = vpack.c.bf16 %v75_v17, %v75_v17  ;;  %v7687_v45 = vpack.c.bf16 %v77_v20, %v77_v20  ;;  %v5327_v49 = vld [vmem:[%s9710_s1 + $0xa50] sm:$0xf]  ;;  %v6320_v50 = vld [vmem:[%s9710_s1 + $0xa54] sm:$0xf0] }
  0x97   :  { %2691 = vmatpush.bf16.msra.mxu3 %v5248_v25  ;;  %v5472_v25 = vor.u32 %v6356_v8, %v5471_v6  ;;  %v5527_v41 = vld [vmem:[%s9710_s1 + $0xbe0] sm:$0xf]  ;;  %v6336_v53 = vld [vmem:[%s9710_s1 + $0xad4] sm:$0xf0]  ;;  %v5455_v54 = vld [vmem:[%s9710_s1 + $0xb50] sm:$0xf]  ;;  %v5328_v58 = vor.u32 %v6320_v50, %v5327_v49 }
  0x98   :  { %2653 = vmatpush.bf16.msra.mxu0 %v5048_v60  ;;  %v6338_v60 = vld [vmem:[%s9710_s1 + $0xae4] sm:$0xf0]  ;;  %v6368_v57 = vld [vmem:[%s9710_s1 + $0xbd4] sm:$0xf0]  ;;  %v5319_v1 = vld [vmem:[%s9710_s1 + $0xa40] sm:$0xf] }
  0x99   :  { %2666 = vmatpush.bf16.msra.mxu1 %v5112_v37  ;;  %v5463_v37 = vld [vmem:[%s9710_s1 + $0xb60] sm:$0xf]  ;;  %v5400_v47 = vor.u32 %v6338_v60, %v5399_v30  ;;  %v6318_v2 = vld [vmem:[%s9710_s1 + $0xa44] sm:$0xf0]  ;;  %v5311_v13 = vld [vmem:[%s9710_s1 + $0xa30] sm:$0xf] }
  0x9a   :  { %2679 = vmatpush.bf16.msra.mxu2 %v5176_v62  ;;  %v6354_v62 = vld [vmem:[%s9710_s1 + $0xb64] sm:$0xf0]  ;;  %v5383_v3 = vld [vmem:[%s9710_s1 + $0xac0] sm:$0xf]  ;;  %v5320_v10 = vor.u32 %v6318_v2, %v5319_v1  ;;  %v6316_v14 = vld [vmem:[%s9710_s1 + $0xa34] sm:$0xf0] }
  0x9b   :  { %2692 = vmatpush.bf16.msra.mxu3 %v5240_v63  ;;  %v6370_v63 = vld [vmem:[%s9710_s1 + $0xbe4] sm:$0xf0]  ;;  %v5464_v48 = vor.u32 %v6354_v62, %v5463_v37  ;;  %v5447_v6 = vld [vmem:[%s9710_s1 + $0xb40] sm:$0xf]  ;;  %v6332_v17 = vld [vmem:[%s9710_s1 + $0xab4] sm:$0xf0]  ;;  %v5312_v29 = vor.u32 %v6316_v14, %v5311_v13 }
  0x9c   :  { %2654 = vmatpush.bf16.msra.mxu0 %v5040_v51  ;;  %v5391_v51 = vld [vmem:[%s9710_s1 + $0xad0] sm:$0xf]  ;;  %v5528_v52 = vor.u32 %v6370_v63, %v5527_v41  ;;  %v6334_v5 = vld [vmem:[%s9710_s1 + $0xac4] sm:$0xf0]  ;;  %v5511_v8 = vld [vmem:[%s9710_s1 + $0xbc0] sm:$0xf] }
  0x9d   :  { %2667 = vmatpush.bf16.msra.mxu1 %v5104_v55  ;;  %v6352_v55 = vld [vmem:[%s9710_s1 + $0xb54] sm:$0xf0]  ;;  %v5392_v61 = vor.u32 %v6336_v53, %v5391_v51  ;;  %v6366_v9 = vld [vmem:[%s9710_s1 + $0xbc4] sm:$0xf0]  ;;  %v5439_v20 = vld [vmem:[%s9710_s1 + $0xb30] sm:$0xf] }
  0x9e   :  { %2680 = vmatpush.bf16.msra.mxu2 %v5168_v56  ;;  %v5519_v56 = vld [vmem:[%s9710_s1 + $0xbd0] sm:$0xf]  ;;  %v6364_v27 = vld [vmem:[%s9710_s1 + $0xbb4] sm:$0xf0]  ;;  %v5303_v30 = vld [vmem:[%s9710_s1 + $0xa20] sm:$0xf] }
  0x9f   :  { %2693 = vmatpush.bf16.msra.mxu3 %v5232_v0  ;;  %v5456_v0 = vor.u32 %v6352_v55, %v5455_v54  ;;  %v5520_v4 = vor.u32 %v6368_v57, %v5519_v56  ;;  %v6314_v37 = vld [vmem:[%s9710_s1 + $0xa24] sm:$0xf0]  ;;  %v5367_v62 = vld [vmem:[%s9710_s1 + $0xaa0] sm:$0xf]  ;;  %v6312_v55 = vld [vmem:[%s9710_s1 + $0xa14] sm:$0xf0] }
  0xa0   :  { %2655 = vmatpush.bf16.msra.mxu0 %v5032_v7  ;;  %v6350_v7 = vld [vmem:[%s9710_s1 + $0xb44] sm:$0xf0]  ;;  %v5495_v49 = vld [vmem:[%s9710_s1 + $0xba0] sm:$0xf]  ;;  %v5304_v51 = vor.u32 %v6314_v37, %v5303_v30  ;;  %v5359_v56 = vld [vmem:[%s9710_s1 + $0xa90] sm:$0xf] }
  0xa1   :  { %2668 = vmatpush.bf16.msra.mxu1 %v5096_v11  ;;  %v5384_v11 = vor.u32 %v6334_v5, %v5383_v3  ;;  %v6330_v41 = vld [vmem:[%s9710_s1 + $0xaa4] sm:$0xf0]  ;;  %v6344_v1 = vld [vmem:[%s9710_s1 + $0xb14] sm:$0xf0]  ;;  %v5487_v2 = vld [vmem:[%s9710_s1 + $0xb90] sm:$0xf] }
  0xa2   :  { %2681 = vmatpush.bf16.msra.mxu2 %v5160_v12  ;;  %v5448_v12 = vor.u32 %v6350_v7, %v5447_v6  ;;  %v6362_v50 = vld [vmem:[%s9710_s1 + $0xba4] sm:$0xf0]  ;;  %v5368_v53 = vor.u32 %v6330_v41, %v5367_v62  ;;  %v6360_v3 = vld [vmem:[%s9710_s1 + $0xb94] sm:$0xf0]  ;;  %v5351_v7 = vld [vmem:[%s9710_s1 + $0xa80] sm:$0xf] }
  0xa3   :  { %2694 = vmatpush.bf16.msra.mxu3 %v5224_v15  ;;  %2656 = vmatmul.bf16.vlgmr.msra.gmra.mxu0 %v7666_v32  ;;  %v5375_v15 = vld [vmem:[%s9710_s1 + $0xab0] sm:$0xf]  ;;  %v6310_v6 = vld [vmem:[%s9710_s1 + $0xa04] sm:$0xf0]  ;;  %v5479_v14 = vld [vmem:[%s9710_s1 + $0xb80] sm:$0xf] }
  0xa4   :  { %2700 = vmatpush.bf16.msrb.mxu0 %v5344_v16  ;;  %2669 = vmatmul.bf16.vlgmr.msra.gmra.mxu1 %v7679_v22  ;;  %v5512_v16 = vor.u32 %v6366_v9, %v5511_v8  ;;  %v6326_v8 = vld [vmem:[%s9710_s1 + $0xa84] sm:$0xf0]  ;;  %v6051_v37 = vld [vmem:[%s9710_s1 + $0x1f4] sm:$0xf]  ;;  %v4257_v62 = vld [vmem:[%s9710_s1 + $0x1f8] sm:$0xf0] }
  0xa5   :  { %2713 = vmatpush.bf16.msrb.mxu1 %v5408_v23  ;;  %2682 = vmatmul.bf16.vlgmr.msra.gmra.mxu2 %v7677_v38  ;;  %v6348_v23 = vld [vmem:[%s9710_s1 + $0xb34] sm:$0xf0]  ;;  %v6342_v13 = vld [vmem:[%s9710_s1 + $0xb04] sm:$0xf0]  ;;  %s6514_s27 = smov [#allocation2]   ;;  %s3996_s30 = sshll.u32 %s9720_s11, 4  ;;  %s3997_s30 = int_to_ptr.hbm [resolvable:$true] %s3996_s30 }
  0xa6   :  { %2726 = vmatpush.bf16.msrb.mxu2 %v5472_v25  ;;  %2695 = vmatmul.bf16.vlgmr.msra.gmra.mxu3 %v7687_v45  ;;  %v5503_v25 = vld [vmem:[%s9710_s1 + $0xbb0] sm:$0xf]  ;;  %v5440_v60 = vor.u32 %v6348_v23, %v5439_v20  ;;  %v6003_v20 = vld [vmem:[%s9710_s1 + $0x74] sm:$0xf]  ;;  %v4065_v23 = vld [vmem:[%s9710_s1 + $0x78] sm:$0xf0] }
  0xa7   :  { %2739 = vmatpush.bf16.msrb.mxu3 %v5536_v21  ;;  %v5376_v21 = vor.u32 %v6332_v17, %v5375_v15  ;;  %v5504_v63 = vor.u32 %v6364_v27, %v5503_v25  ;;  %v2449_v9 = vpop.f32.mrf.mxu0  ;;  %v6358_v17 = vld [vmem:[%s9710_s1 + $0xb84] sm:$0xf0]  ;;  %v6019_v25 = vld [vmem:[%s9710_s1 + $0xf4] sm:$0xf]  ;;  %v4129_v27 = vld [vmem:[%s9710_s1 + $0xf8] sm:$0xf0] }
  0xa8   :  { %2701 = vmatpush.bf16.msrb.mxu0 %v5336_v46  ;;  %v5431_v46 = vld [vmem:[%s9710_s1 + $0xb20] sm:$0xf]  ;;  %v2462_v30 = vpop.f32.mrf.mxu1 }
  0xa9   :  { %2714 = vmatpush.bf16.msrb.mxu1 %v5400_v47  ;;  %v6346_v47 = vld [vmem:[%s9710_s1 + $0xb24] sm:$0xf0] }
  0xaa   :  { %2727 = vmatpush.bf16.msrb.mxu2 %v5464_v48  ;;  %v514_v48 = vld [vmem:[%s9711_s2] sm:$0x3]  ;;  %v5432_v54 = vor.u32 %v6346_v47, %v5431_v46 }
  0xab   :  { %2740 = vmatpush.bf16.msrb.mxu3 %v5528_v52  ;;  %v5295_v52 = vld [vmem:[%s9710_s1 + $0xa10] sm:$0xf]  ;;  %v516_v57 = vperm.slane %v514_v48, 0  ;;  %v78_v47 = vld.sshfl [vmem:[#allocation1 + $0x20] sm:$0xff pattern:$0x73625140] }
  0xac   :  { %2702 = vmatpush.bf16.msrb.mxu0 %v5328_v58  ;;  %v5496_v58 = vor.u32 %v6362_v50, %v5495_v49  ;;  %v5296_v5 = vor.u32 %v6312_v55, %v5295_v52  ;;  %v80_v48 = vld.sshfl [vmem:[#allocation1 + $0x30] sm:$0xff pattern:$0x73625140]  ;;  %v5480_v49 = vor.u32 %v6358_v17, %v5479_v14  ;;  %v4068_v50 = vor.u32 %v6003_v20, %v4065_v23  ;;  %v81_v52 = vld.sshfl [vmem:[#allocation1 + $0x38] sm:$0xff pattern:$0x73625140] }
  0xad   :  { %2715 = vmatpush.bf16.msrb.mxu1 %v5392_v61  ;;  %v6328_v61 = vld [vmem:[%s9710_s1 + $0xa94] sm:$0xf0]  ;;  %v2450_v15 = vadd.f32 %v2449_v9, %v516_v57  ;;  %v4057_v57 = vld [vmem:[%s9710_s1 + $0x68] sm:$0xf0]  ;;  %v6049_v9 = vld [vmem:[%s9710_s1 + $0x1e4] sm:$0xf] }
  0xae   :  { %2728 = vmatpush.bf16.msrb.mxu2 %v5456_v0  ;;  %v5423_v0 = vld [vmem:[%s9710_s1 + $0xb10] sm:$0xf]  ;;  %v4049_v17 = vld [vmem:[%s9710_s1 + $0x58] sm:$0xf0]  ;;  %v6015_v20 = vld [vmem:[%s9710_s1 + $0xd4] sm:$0xf] }
  0xaf   :  { %2741 = vmatpush.bf16.msrb.mxu3 %v5520_v4  ;;  %v5287_v4 = vld [vmem:[%s9710_s1 + $0xa00] sm:$0xf]  ;;  %v2463_v41 = vadd.f32 %v2462_v30, %v2450_v15  ;;  %v4177_v30 = vld [vmem:[%s9710_s1 + $0x158] sm:$0xf0] }
  0xb0   :  { %2703 = vmatpush.bf16.msrb.mxu0 %v5320_v10  ;;  %v5360_v10 = vor.u32 %v6328_v61, %v5359_v56  ;;  %v6001_v56 = vld [vmem:[%s9710_s1 + $0x64] sm:$0xf]  ;;  %v2464_v23 = vpop.f32.mrf.mxu1 }
  0xb1   :  { %2716 = vmatpush.bf16.msrb.mxu1 %v5384_v11  ;;  %v5424_v11 = vor.u32 %v6344_v1, %v5423_v0  ;;  %v2488_v0 = vpop.f32.mrf.mxu3  ;;  %v4260_v1 = vor.u32 %v6051_v37, %v4257_v62  ;;  %v5993_v23 = vld [vmem:[%s9710_s1 + $0x24] sm:$0xf] }
  0xb2   :  { %2729 = vmatpush.bf16.msrb.mxu2 %v5448_v12  ;;  %v5415_v12 = vld [vmem:[%s9710_s1 + $0xb00] sm:$0xf] }
  0xb3   :  { %2742 = vmatpush.bf16.msrb.mxu3 %v5512_v16  ;;  %v5488_v16 = vor.u32 %v6360_v3, %v5487_v2  ;;  %v5416_v46 = vor.u32 %v6342_v13, %v5415_v12  ;;  %v7873_v2 = vpack.c.bf16 %v78_v47, %v78_v47  ;;  %v4121_v3 = vld [vmem:[%s9710_s1 + $0xe8] sm:$0xf0]  ;;  %v7894_v12 = vpack.c.bf16 %v81_v52, %v81_v52  ;;  %v6029_v52 = vld [vmem:[%s9710_s1 + $0x144] sm:$0xf] }
  0xb4   :  { %2704 = vmatpush.bf16.msrb.mxu0 %v5312_v29  ;;  %v6035_v29 = vld [vmem:[%s9710_s1 + $0x174] sm:$0xf]  ;;  %v4060_v13 = vor.u32 %v6001_v56, %v4057_v57  ;;  %v4041_v47 = vld [vmem:[%s9710_s1 + $0x48] sm:$0xf0] }
  0xb5   :  { %2717 = vmatpush.bf16.msrb.mxu1 %v5376_v21  ;;  %v5288_v21 = vor.u32 %v6310_v6, %v5287_v4  ;;  %v6033_v4 = vld [vmem:[%s9710_s1 + $0x164] sm:$0xf]  ;;  %v2451_v6 = vpop.f32.mrf.mxu0 }
  0xb6   :  { %2730 = vmatpush.bf16.msrb.mxu2 %v5440_v60  ;;  %v4193_v60 = vld [vmem:[%s9710_s1 + $0x178] sm:$0xf0] }
  0xb7   :  { %2743 = vmatpush.bf16.msrb.mxu3 %v5504_v63  ;;  %v5352_v63 = vor.u32 %v6326_v8, %v5351_v7  ;;  %v4196_v55 = vor.u32 %v6035_v29, %v4193_v60  ;;  %v7884_v7 = vpack.c.bf16 %v80_v48, %v80_v48  ;;  %v6031_v29 = vld [vmem:[%s9710_s1 + $0x154] sm:$0xf]  ;;  %v4241_v60 = vld [vmem:[%s9710_s1 + $0x1d8] sm:$0xf0]  ;;  %v6013_v48 = vld [vmem:[%s9710_s1 + $0xc4] sm:$0xf] }
  0xb8   :  { %2705 = vmatpush.bf16.msrb.mxu0 %v5304_v51  ;;  %v79_v51 = vld.sshfl [vmem:[#allocation1 + $0x28] sm:$0xff pattern:$0x73625140] }
  0xb9   :  { %2718 = vmatpush.bf16.msrb.mxu1 %v5368_v53  ;;  %v2475_v53 = vpop.f32.mrf.mxu2  ;;  %v7886_v8 = vpack.c.bf16 %v79_v51, %v79_v51  ;;  %v4105_v51 = vld [vmem:[%s9710_s1 + $0xc8] sm:$0xf0] }
  0xba   :  { %2731 = vmatpush.bf16.msrb.mxu2 %v5432_v54  ;;  %v4132_v54 = vor.u32 %v6019_v25, %v4129_v27  ;;  %v2476_v61 = vadd.f32 %v2475_v53, %v2463_v41  ;;  %v4113_v27 = vld [vmem:[%s9710_s1 + $0xd8] sm:$0xf0]  ;;  %v4169_v53 = vld [vmem:[%s9710_s1 + $0x148] sm:$0xf0] }
  0xbb   :  { %2744 = vmatpush.bf16.msrb.mxu3 %v5496_v58  ;;  %v6017_v58 = vld [vmem:[%s9710_s1 + $0xe4] sm:$0xf]  ;;  %v4116_v41 = vor.u32 %v6015_v20, %v4113_v27 }
  0xbc   :  { %2706 = vmatpush.bf16.msrb.mxu0 %v5296_v5  ;;  %v4185_v5 = vld [vmem:[%s9710_s1 + $0x168] sm:$0xf0]  ;;  %v4124_v14 = vor.u32 %v6017_v58, %v4121_v3  ;;  %v4108_v58 = vor.u32 %v6013_v48, %v4105_v51  ;;  %v6011_v3 = vld [vmem:[%s9710_s1 + $0xb4] sm:$0xf]  ;;  %v6009_v27 = vld [vmem:[%s9710_s1 + $0xa4] sm:$0xf] }
  0xbd   :  { %2719 = vmatpush.bf16.msrb.mxu1 %v5360_v10  ;;  %v4249_v10 = vld [vmem:[%s9710_s1 + $0x1e8] sm:$0xf0]  ;;  %v4188_v15 = vor.u32 %v6033_v4, %v4185_v5 }
  0xbe   :  { %2732 = vmatpush.bf16.msrb.mxu2 %v5424_v11  ;;  %v2489_v11 = vadd.f32 %v2488_v0, %v2476_v61  ;;  %v4252_v25 = vor.u32 %v6049_v9, %v4249_v10  ;;  %v4172_v61 = vor.u32 %v6029_v52, %v4169_v53  ;;  %v5995_v0 = vld [vmem:[%s9710_s1 + $0x34] sm:$0xf]  ;;  %v4097_v9 = vld [vmem:[%s9710_s1 + $0xb8] sm:$0xf0] }
  0xbf   :  { %2745 = vmatpush.bf16.msrb.mxu3 %v5488_v16  ;;  %v5999_v16 = vld [vmem:[%s9710_s1 + $0x54] sm:$0xf]  ;;  %v4017_v53 = vld [vmem:[%s9710_s1 + $0x18] sm:$0xf0] }
  0xc0   :  { %2707 = vmatpush.bf16.msrb.mxu0 %v5288_v21  ;;  %v6047_v21 = vld [vmem:[%s9710_s1 + $0x1d4] sm:$0xf]  ;;  %v4052_v37 = vor.u32 %v5999_v16, %v4049_v17  ;;  %v2501_v57 = vpop.f32.mrf.mxu0  ;;  %v4100_v17 = vor.u32 %v6011_v3, %v4097_v9 }
  0xc1   :  { %2720 = vmatpush.bf16.msrb.mxu1 %v5352_v63  ;;  %v2477_v62 = vpop.f32.mrf.mxu2  ;;  %v4180_v63 = vor.u32 %v6031_v29, %v4177_v30  ;;  %v2502_v4 = vadd.f32 %v2501_v57, %v2489_v11  ;;  %v2514_v5 = vpop.f32.mrf.mxu1  ;;  %v6027_v10 = vld [vmem:[%s9710_s1 + $0x134] sm:$0xf]  ;;  %v4225_v11 = vld [vmem:[%s9710_s1 + $0x1b8] sm:$0xf0] }
  0xc2   :  { %2733 = vmatpush.bf16.msrb.mxu2 %v5416_v46  ;;  %v5997_v46 = vld [vmem:[%s9710_s1 + $0x44] sm:$0xf]  ;;  %v5991_v52 = vld [vmem:[%s9710_s1 + $0x14] sm:$0xf]  ;;  %v4081_v57 = vld [vmem:[%s9710_s1 + $0x98] sm:$0xf0] }
  0xc3   :  { %2746 = vmatpush.bf16.msrb.mxu3 %v5480_v49  ;;  %2708 = vmatmul.bf16.vlgmr.msrb.gmra.mxu0 %v7873_v2  ;;  %v2490_v49 = vpop.f32.mrf.mxu3  ;;  %v4044_v56 = vor.u32 %v5997_v46, %v4041_v47  ;;  %v4217_v46 = vld [vmem:[%s9710_s1 + $0x1a8] sm:$0xf0]  ;;  %v4020_v3 = vor.u32 %v5991_v52, %v4017_v53  ;;  %v6065_v52 = vld [vmem:[%s9710_s1 + $0x264] sm:$0xf] }
  0xc4   :  { %2752 = vmatpush.bf16.msra.mxu0 %v4068_v50  ;;  %2721 = vmatmul.bf16.vlgmr.msrb.gmra.mxu1 %v7886_v8  ;;  %v4244_v50 = vor.u32 %v6047_v21, %v4241_v60  ;;  %v4089_v21 = vld [vmem:[%s9710_s1 + $0xa8] sm:$0xf0]  ;;  %v6025_v60 = vld [vmem:[%s9710_s1 + $0x124] sm:$0xf] }
  0xc5   :  { %2765 = vmatpush.bf16.msra.mxu1 %v4132_v54  ;;  %2734 = vmatmul.bf16.vlgmr.msrb.gmra.mxu2 %v7884_v7  ;;  %v6045_v54 = vld [vmem:[%s9710_s1 + $0x1c4] sm:$0xf]  ;;  %v4313_v53 = vld [vmem:[%s9710_s1 + $0x268] sm:$0xf0] }
  0xc6   :  { %2778 = vmatpush.bf16.msra.mxu2 %v4196_v55  ;;  %2747 = vmatmul.bf16.vlgmr.msrb.gmra.mxu3 %v7894_v12  ;;  %v4233_v55 = vld [vmem:[%s9710_s1 + $0x1c8] sm:$0xf0] }
  0xc7   :  { %2791 = vmatpush.bf16.msra.mxu3 %v4260_v1  ;;  %v4033_v1 = vld [vmem:[%s9710_s1 + $0x38] sm:$0xf0]  ;;  %v4236_v6 = vor.u32 %v6045_v54, %v4233_v55  ;;  %v6007_v54 = vld [vmem:[%s9710_s1 + $0x94] sm:$0xf] }
  0xc8   :  { %2753 = vmatpush.bf16.msra.mxu0 %v4060_v13  ;;  %v4161_v13 = vld [vmem:[%s9710_s1 + $0x138] sm:$0xf0]  ;;  %v4036_v16 = vor.u32 %v5995_v0, %v4033_v1  ;;  %v2503_v49 = vpop.f32.mrf.mxu0  ;;  %v6039_v0 = vld [vmem:[%s9710_s1 + $0x194] sm:$0xf] }
  0xc9   :  { %2766 = vmatpush.bf16.msra.mxu1 %v4124_v14  ;;  %v6043_v14 = vld [vmem:[%s9710_s1 + $0x1b4] sm:$0xf]  ;;  %v4164_v20 = vor.u32 %v6027_v10, %v4161_v13  ;;  %v2527_v29 = vpop.f32.mrf.mxu2  ;;  %v2516_v55 = vpop.f32.mrf.mxu1  ;;  %v4209_v1 = vld [vmem:[%s9710_s1 + $0x198] sm:$0xf0]  ;;  %v6005_v10 = vld [vmem:[%s9710_s1 + $0x84] sm:$0xf] }
  0xca   :  { %2779 = vmatpush.bf16.msra.mxu2 %v4188_v15  ;;  %v2515_v15 = vadd.f32 %v2514_v5, %v2502_v4  ;;  %v4228_v30 = vor.u32 %v6043_v14, %v4225_v11  ;;  %v5989_v4 = vld [vmem:[%s9710_s1 + $0x4] sm:$0xf]  ;;  %v4009_v5 = vld [vmem:[%s9710_s1 + $0x8] sm:$0xf0] }
  0xcb   :  { %2792 = vmatpush.bf16.msra.mxu3 %v4252_v25  ;;  %v4025_v25 = vld [vmem:[%s9710_s1 + $0x28] sm:$0xf0]  ;;  %v6021_v14 = vld [vmem:[%s9710_s1 + $0x104] sm:$0xf] }
  0xcc   :  { %2754 = vmatpush.bf16.msra.mxu0 %v4052_v37  ;;  %v4153_v37 = vld [vmem:[%s9710_s1 + $0x128] sm:$0xf0]  ;;  %v2528_v62 = vadd.f32 %v2527_v29, %v2515_v15  ;;  %v4028_v47 = vor.u32 %v5993_v23, %v4025_v25  ;;  %v4212_v15 = vor.u32 %v6039_v0, %v4209_v1  ;;  %v6067_v25 = vld [vmem:[%s9710_s1 + $0x274] sm:$0xf]  ;;  %v4316_v1 = vor.u32 %v6065_v52, %v4313_v53  ;;  %v4353_v52 = vld [vmem:[%s9710_s1 + $0x2b8] sm:$0xf0] }
  0xcd   :  { %2767 = vmatpush.bf16.msra.mxu1 %v4116_v41  ;;  %v2540_v41 = vpop.f32.mrf.mxu3  ;;  %v4156_v51 = vor.u32 %v6025_v60, %v4153_v37  ;;  %v4073_v13 = vld [vmem:[%s9710_s1 + $0x88] sm:$0xf0]  ;;  %v6083_v29 = vld [vmem:[%s9710_s1 + $0x2f4] sm:$0xf]  ;;  %v4449_v37 = vld [vmem:[%s9710_s1 + $0x378] sm:$0xf0] }
  0xce   :  { %2780 = vmatpush.bf16.msra.mxu2 %v4180_v63  ;;  %v6041_v63 = vld [vmem:[%s9710_s1 + $0x1a4] sm:$0xf]  ;;  %v7996_v48 = vadd.f32 %v2540_v41, %v2528_v62  ;;  %v6099_v60 = vld [vmem:[%s9710_s1 + $0x374] sm:$0xf]  ;;  %v4076_v62 = vor.u32 %v6005_v10, %v4073_v13  ;;  %v4505_v0 = vld [vmem:[%s9710_s1 + $0x3e8] sm:$0xf0] }
  0xcf   :  { %2793 = vmatpush.bf16.msra.mxu3 %v4244_v50  ;;  %v4092_v50 = vor.u32 %v6009_v27, %v4089_v21  ;;  %v4321_v27 = vld [vmem:[%s9710_s1 + $0x278] sm:$0xf0]  ;;  %v6091_v53 = vld [vmem:[%s9710_s1 + $0x334] sm:$0xf] }
  0xd0   :  { %2755 = vmatpush.bf16.msra.mxu0 %v4044_v56  ;;  %v4220_v56 = vor.u32 %v6041_v63, %v4217_v46  ;;  %v4385_v21 = vld [vmem:[%s9710_s1 + $0x2f8] sm:$0xf0]  ;;  %v6115_v63 = vld [vmem:[%s9710_s1 + $0x3f4] sm:$0xf]  ;;  %v4324_v49 = vor.u32 %v6067_v25, %v4321_v27  ;;  %v4297_v25 = vld [vmem:[%s9710_s1 + $0x248] sm:$0xf0] }
  0xd1   :  { %2768 = vmatpush.bf16.msra.mxu1 %v4108_v58  ;;  %v6023_v58 = vld [vmem:[%s9710_s1 + $0x114] sm:$0xf]  ;;  %v2529_v11 = vpop.f32.mrf.mxu2  ;;  %v4513_v46 = vld [vmem:[%s9710_s1 + $0x3f8] sm:$0xf0]  ;;  %v6093_v27 = vld [vmem:[%s9710_s1 + $0x344] sm:$0xf] }
  0xd2   :  { %2781 = vmatpush.bf16.msra.mxu2 %v4172_v61  ;;  %v4145_v61 = vld [vmem:[%s9710_s1 + $0x118] sm:$0xf0]  ;;  %v4516_v55 = vor.u32 %v6115_v63, %v4513_v46 }
  0xd3   :  { %2794 = vmatpush.bf16.msra.mxu3 %v4236_v6  ;;  %v4084_v6 = vor.u32 %v6007_v54, %v4081_v57  ;;  %v4148_v9 = vor.u32 %v6023_v58, %v4145_v61  ;;  %v6081_v54 = vld [vmem:[%s9710_s1 + $0x2e4] sm:$0xf]  ;;  %v4441_v58 = vld [vmem:[%s9710_s1 + $0x368] sm:$0xf0]  ;;  %v4369_v13 = vld [vmem:[%s9710_s1 + $0x2d8] sm:$0xf0] }
  0xd4   :  { %2756 = vmatpush.bf16.msra.mxu0 %v4036_v16  ;;  %v4137_v16 = vld [vmem:[%s9710_s1 + $0x108] sm:$0xf0]  ;;  %v6097_v57 = vld [vmem:[%s9710_s1 + $0x364] sm:$0xf]  ;;  %v4433_v11 = vld [vmem:[%s9710_s1 + $0x358] sm:$0xf0] }
  0xd5   :  { %2769 = vmatpush.bf16.msra.mxu1 %v4100_v17  ;;  %v6037_v17 = vld [vmem:[%s9710_s1 + $0x184] sm:$0xf]  ;;  %v2542_v23 = vpop.f32.mrf.mxu3  ;;  %v4140_v41 = vor.u32 %v6021_v14, %v4137_v16  ;;  %v6095_v14 = vld [vmem:[%s9710_s1 + $0x354] sm:$0xf]  ;;  %v4497_v16 = vld [vmem:[%s9710_s1 + $0x3d8] sm:$0xf0] }
  0xd6   :  { %2782 = vmatpush.bf16.msra.mxu2 %v4164_v20  ;;  %v4201_v20 = vld [vmem:[%s9710_s1 + $0x188] sm:$0xf0]  ;;  %v6113_v61 = vld [vmem:[%s9710_s1 + $0x3e4] sm:$0xf] }
  0xd7   :  { %2795 = vmatpush.bf16.msra.mxu3 %v4228_v30  ;;  %v4012_v30 = vor.u32 %v5989_v4, %v4009_v5  ;;  %v4444_v4 = vor.u32 %v6097_v57, %v4441_v58  ;;  %v6063_v5 = vld [vmem:[%s9710_s1 + $0x254] sm:$0xf]  ;;  %v4508_v10 = vor.u32 %v6113_v61, %v4505_v0  ;;  %v6061_v23 = vld [vmem:[%s9710_s1 + $0x244] sm:$0xf] }
  0xd8   :  { %2757 = vmatpush.bf16.msra.mxu0 %v4028_v47  ;;  %v4204_v47 = vor.u32 %v6037_v17, %v4201_v20  ;;  %v6057_v0 = vld [vmem:[%s9710_s1 + $0x224] sm:$0xf] }
  0xd9   :  { %2770 = vmatpush.bf16.msra.mxu1 %v4092_v50  ;;  %v4388_v50 = vor.u32 %v6083_v29, %v4385_v21  ;;  %v4425_v29 = vld [vmem:[%s9710_s1 + $0x348] sm:$0xf0]  ;;  %v6109_v21 = vld [vmem:[%s9710_s1 + $0x3c4] sm:$0xf] }
  0xda   :  { %2783 = vmatpush.bf16.msra.mxu2 %v4156_v51  ;;  %v4452_v51 = vor.u32 %v6099_v60, %v4449_v37  ;;  %v4489_v60 = vld [vmem:[%s9710_s1 + $0x3c8] sm:$0xf0]  ;;  %v4428_v46 = vor.u32 %v6093_v27, %v4425_v29  ;;  %v4337_v29 = vld [vmem:[%s9710_s1 + $0x298] sm:$0xf0] }
  0xdb   :  { %2796 = vmatpush.bf16.msra.mxu3 %v4220_v56  ;;  %v4377_v56 = vld [vmem:[%s9710_s1 + $0x2e8] sm:$0xf0] }
  0xdc   :  { %2758 = vmatpush.bf16.msra.mxu0 %v4020_v3  ;;  %v4380_v3 = vor.u32 %v6081_v54, %v4377_v56  ;;  %v4417_v54 = vld [vmem:[%s9710_s1 + $0x338] sm:$0xf0] }
  0xdd   :  { %2771 = vmatpush.bf16.msra.mxu1 %v4084_v6  ;;  %v4305_v6 = vld [vmem:[%s9710_s1 + $0x258] sm:$0xf0]  ;;  %v4420_v61 = vor.u32 %v6091_v53, %v4417_v54  ;;  %v6101_v53 = vld [vmem:[%s9710_s1 + $0x384] sm:$0xf]  ;;  %v4457_v54 = vld [vmem:[%s9710_s1 + $0x388] sm:$0xf0] }
  0xde   :  { %2784 = vmatpush.bf16.msra.mxu2 %v4148_v9  ;;  %v6079_v9 = vld [vmem:[%s9710_s1 + $0x2d4] sm:$0xf]  ;;  %v4308_v17 = vor.u32 %v6063_v5, %v4305_v6  ;;  %v4481_v56 = vld [vmem:[%s9710_s1 + $0x3b8] sm:$0xf0]  ;;  %v4345_v6 = vld [vmem:[%s9710_s1 + $0x2a8] sm:$0xf0] }
  0xdf   :  { %2797 = vmatpush.bf16.msra.mxu3 %v4212_v15  ;;  %v6111_v15 = vld [vmem:[%s9710_s1 + $0x3d4] sm:$0xf]  ;;  %v4372_v20 = vor.u32 %v6079_v9, %v4369_v13  ;;  %v6089_v9 = vld [vmem:[%s9710_s1 + $0x324] sm:$0xf] }
  0xe0   :  { %2759 = vmatpush.bf16.msra.mxu0 %v4012_v30  ;;  %v2553_v30 = vpop.f32.mrf.mxu0 }
  0xe1   :  { %2772 = vmatpush.bf16.msra.mxu1 %v4076_v62  ;;  %v2554_v37 = vadd.f32 %v2553_v30, %v7996_v48  ;;  %v4300_v62 = vor.u32 %v6061_v23, %v4297_v25  ;;  %v4492_v48 = vor.u32 %v6109_v21, %v4489_v60  ;;  %v6087_v30 = vld [vmem:[%s9710_s1 + $0x314] sm:$0xf]  ;;  %v4401_v21 = vld [vmem:[%s9710_s1 + $0x318] sm:$0xf0] }
  0xe2   :  { %2785 = vmatpush.bf16.msra.mxu2 %v4140_v41  ;;  %v2566_v41 = vpop.f32.mrf.mxu1  ;;  %v6103_v60 = vld [vmem:[%s9710_s1 + $0x394] sm:$0xf] }
  0xe3   :  { %2798 = vmatpush.bf16.msra.mxu3 %v4204_v47  ;;  %2760 = vmatmul.bf16.vlgmr.msra.gmra.mxu0 %v6907_v36  ;;  %v6077_v36 = vld [vmem:[%s9710_s1 + $0x2c4] sm:$0xf]  ;;  %v6059_v47 = vld [vmem:[%s9710_s1 + $0x234] sm:$0xf] }
  0xe4   :  { %2804 = vmatpush.bf16.msrb.mxu0 %v4324_v49  ;;  %2773 = vmatmul.bf16.vlgmr.msra.gmra.mxu1 %v6917_v43  ;;  %v4361_v43 = vld [vmem:[%s9710_s1 + $0x2c8] sm:$0xf0]  ;;  %v4289_v49 = vld [vmem:[%s9710_s1 + $0x238] sm:$0xf0] }
  0xe5   :  { %2817 = vmatpush.bf16.msrb.mxu1 %v4388_v50  ;;  %2786 = vmatmul.bf16.vlgmr.msra.gmra.mxu2 %v6905_v35  ;;  %v4436_v35 = vor.u32 %v6095_v14, %v4433_v11  ;;  %v4364_v63 = vor.u32 %v6077_v36, %v4361_v43  ;;  %v6075_v50 = vld [vmem:[%s9710_s1 + $0x2b4] sm:$0xf]  ;;  %v4292_v57 = vor.u32 %v6059_v47, %v4289_v49  ;;  %v6105_v11 = vld [vmem:[%s9710_s1 + $0x3a4] sm:$0xf] }
  0xe6   :  { %2830 = vmatpush.bf16.msrb.mxu2 %v4452_v51  ;;  %2799 = vmatmul.bf16.vlgmr.msra.gmra.mxu3 %v6915_v42  ;;  %v4500_v42 = vor.u32 %v6111_v15, %v4497_v16  ;;  %v2567_v51 = vadd.f32 %v2566_v41, %v2554_v37  ;;  %v4356_v58 = vor.u32 %v6075_v50, %v4353_v52  ;;  %v4473_v15 = vld [vmem:[%s9710_s1 + $0x3a8] sm:$0xf0]  ;;  %v6055_v36 = vld [vmem:[%s9710_s1 + $0x214] sm:$0xf]  ;;  %v4465_v37 = vld [vmem:[%s9710_s1 + $0x398] sm:$0xf0] }
  0xe7   :  { %2843 = vmatpush.bf16.msrb.mxu3 %v4516_v55  ;;  %v6107_v55 = vld [vmem:[%s9710_s1 + $0x3b4] sm:$0xf]  ;;  %v4476_v27 = vor.u32 %v6105_v11, %v4473_v15  ;;  %v6053_v41 = vld [vmem:[%s9710_s1 + $0x204] sm:$0xf]  ;;  %v4404_v47 = vor.u32 %v6087_v30, %v4401_v21  ;;  %v4329_v50 = vld [vmem:[%s9710_s1 + $0x288] sm:$0xf0] }
  0xe8   :  { %2805 = vmatpush.bf16.msrb.mxu0 %v4316_v1  ;;  %v4281_v1 = vld [vmem:[%s9710_s1 + $0x228] sm:$0xf0]  ;;  %v2579_v5 = vpop.f32.mrf.mxu2  ;;  %v2555_v16 = vpop.f32.mrf.mxu0  ;;  %v6071_v43 = vld [vmem:[%s9710_s1 + $0x294] sm:$0xf]  ;;  %v6069_v49 = vld [vmem:[%s9710_s1 + $0x284] sm:$0xf] }
  0xe9   :  { %2818 = vmatpush.bf16.msrb.mxu1 %v4380_v3  ;;  %v6073_v3 = vld [vmem:[%s9710_s1 + $0x2a4] sm:$0xf]  ;;  %v2580_v13 = vadd.f32 %v2579_v5, %v2567_v51  ;;  %v2592_v14 = vpop.f32.mrf.mxu3  ;;  %v4468_v51 = vor.u32 %v6103_v60, %v4465_v37  ;;  %v4393_v52 = vld [vmem:[%s9710_s1 + $0x308] sm:$0xf0]  ;;  %v4332_v5 = vor.u32 %v6069_v49, %v4329_v50  ;;  %v6127_v60 = vld [vmem:[%s9710_s1 + $0x454] sm:$0xf] }
  0xea   :  { %2831 = vmatpush.bf16.msrb.mxu2 %v4444_v4  ;;  %v4484_v4 = vor.u32 %v6107_v55, %v4481_v56  ;;  %v4348_v23 = vor.u32 %v6073_v3, %v4345_v6  ;;  %v6131_v56 = vld [vmem:[%s9710_s1 + $0x474] sm:$0xf]  ;;  %v6129_v16 = vld [vmem:[%s9710_s1 + $0x464] sm:$0xf]  ;;  %v4561_v37 = vld [vmem:[%s9710_s1 + $0x458] sm:$0xf0] }
  0xeb   :  { %2844 = vmatpush.bf16.msrb.mxu3 %v4508_v10  ;;  %v4409_v10 = vld [vmem:[%s9710_s1 + $0x328] sm:$0xf0]  ;;  %v6163_v3 = vld [vmem:[%s9710_s1 + $0x574] sm:$0xf]  ;;  %v4564_v50 = vor.u32 %v6127_v60, %v4561_v37 }
  0xec   :  { %2806 = vmatpush.bf16.msrb.mxu0 %v4308_v17  ;;  %v4284_v17 = vor.u32 %v6057_v0, %v4281_v1  ;;  %v4412_v25 = vor.u32 %v6089_v9, %v4409_v10  ;;  %v4641_v1 = vld [vmem:[%s9710_s1 + $0x4f8] sm:$0xf0]  ;;  %v6179_v9 = vld [vmem:[%s9710_s1 + $0x5f4] sm:$0xf] }
  0xed   :  { %2819 = vmatpush.bf16.msrb.mxu1 %v4372_v20  ;;  %v2568_v20 = vpop.f32.mrf.mxu1  ;;  %v4769_v10 = vld [vmem:[%s9710_s1 + $0x5f8] sm:$0xf0]  ;;  %v6175_v49 = vld [vmem:[%s9710_s1 + $0x5d4] sm:$0xf] }
  0xee   :  { %2832 = vmatpush.bf16.msrb.mxu2 %v4436_v35  ;;  %v8195_v35 = vadd.f32 %v2592_v14, %v2580_v13  ;;  %v4460_v13 = vor.u32 %v6101_v53, %v4457_v54  ;;  %v6145_v20 = vld [vmem:[%s9710_s1 + $0x4e4] sm:$0xf]  ;;  %v4553_v53 = vld [vmem:[%s9710_s1 + $0x448] sm:$0xf0] }
  0xef   :  { %2845 = vmatpush.bf16.msrb.mxu3 %v4500_v42  ;;  %v4273_v42 = vld [vmem:[%s9710_s1 + $0x218] sm:$0xf0]  ;;  %v6157_v54 = vld [vmem:[%s9710_s1 + $0x544] sm:$0xf] }
  0xf0   :  { %2807 = vmatpush.bf16.msrb.mxu0 %v4300_v62  ;;  %v4276_v62 = vor.u32 %v6055_v36, %v4273_v42  ;;  %v2581_v55 = vpop.f32.mrf.mxu2  ;;  %v6161_v36 = vld [vmem:[%s9710_s1 + $0x564] sm:$0xf]  ;;  %v4697_v42 = vld [vmem:[%s9710_s1 + $0x568] sm:$0xf0] }
  0xf1   :  { %2820 = vmatpush.bf16.msrb.mxu1 %v4364_v63  ;;  %v4265_v63 = vld [vmem:[%s9710_s1 + $0x208] sm:$0xf0]  ;;  %v4700_v21 = vor.u32 %v6161_v36, %v4697_v42  ;;  %v6137_v42 = vld [vmem:[%s9710_s1 + $0x4a4] sm:$0xf] }
  0xf2   :  { %2833 = vmatpush.bf16.msrb.mxu2 %v4428_v46  ;;  %v4340_v46 = vor.u32 %v6071_v43, %v4337_v29  ;;  %v4268_v0 = vor.u32 %v6053_v41, %v4265_v63  ;;  %v6177_v43 = vld [vmem:[%s9710_s1 + $0x5e4] sm:$0xf]  ;;  %v4625_v63 = vld [vmem:[%s9710_s1 + $0x4d8] sm:$0xf0]  ;;  %v4681_v55 = vld [vmem:[%s9710_s1 + $0x548] sm:$0xf0] }
  0xf3   :  { %2846 = vmatpush.bf16.msrb.mxu3 %v4492_v48  ;;  %v6085_v48 = vld [vmem:[%s9710_s1 + $0x304] sm:$0xf]  ;;  %v4537_v36 = vld [vmem:[%s9710_s1 + $0x428] sm:$0xf0] }
  0xf4   :  { %2808 = vmatpush.bf16.msrb.mxu0 %v4292_v57  ;;  %v4577_v57 = vld [vmem:[%s9710_s1 + $0x478] sm:$0xf0]  ;;  %v4396_v6 = vor.u32 %v6085_v48, %v4393_v52  ;;  %v6125_v52 = vld [vmem:[%s9710_s1 + $0x444] sm:$0xf] }
  0xf5   :  { %2821 = vmatpush.bf16.msrb.mxu1 %v4356_v58  ;;  %v6147_v58 = vld [vmem:[%s9710_s1 + $0x4f4] sm:$0xf]  ;;  %v4580_v14 = vor.u32 %v6131_v56, %v4577_v57  ;;  %v6173_v57 = vld [vmem:[%s9710_s1 + $0x5c4] sm:$0xf] }
  0xf6   :  { %2834 = vmatpush.bf16.msrb.mxu2 %v4420_v61  ;;  %v2594_v61 = vpop.f32.mrf.mxu3  ;;  %v4644_v11 = vor.u32 %v6147_v58, %v4641_v1  ;;  %v4745_v58 = vld [vmem:[%s9710_s1 + $0x5c8] sm:$0xf0] }
  0xf7   :  { %2847 = vmatpush.bf16.msrb.mxu3 %v4484_v4  ;;  %v4705_v4 = vld [vmem:[%s9710_s1 + $0x578] sm:$0xf0] }
  0xf8   :  { %2809 = vmatpush.bf16.msrb.mxu0 %v4284_v17  ;;  %v4708_v15 = vor.u32 %v6163_v3, %v4705_v4  ;;  %v4569_v17 = vld [vmem:[%s9710_s1 + $0x468] sm:$0xf0]  ;;  %v4684_v4 = vor.u32 %v6157_v54, %v4681_v55  ;;  %v6167_v54 = vld [vmem:[%s9710_s1 + $0x594] sm:$0xf]  ;;  %v4721_v55 = vld [vmem:[%s9710_s1 + $0x598] sm:$0xf0] }
  0xf9   :  { %2822 = vmatpush.bf16.msrb.mxu1 %v4348_v23  ;;  %v4772_v23 = vor.u32 %v6179_v9, %v4769_v10  ;;  %v4572_v29 = vor.u32 %v6129_v16, %v4569_v17  ;;  %v6139_v9 = vld [vmem:[%s9710_s1 + $0x4b4] sm:$0xf]  ;;  %v4737_v16 = vld [vmem:[%s9710_s1 + $0x5b8] sm:$0xf0] }
  0xfa   :  { %2835 = vmatpush.bf16.msrb.mxu2 %v4412_v25  ;;  %v4633_v25 = vld [vmem:[%s9710_s1 + $0x4e8] sm:$0xf0] }
  0xfb   :  { %2848 = vmatpush.bf16.msrb.mxu3 %v4476_v27  ;;  %v4761_v27 = vld [vmem:[%s9710_s1 + $0x5e8] sm:$0xf0]  ;;  %v4636_v30 = vor.u32 %v6145_v20, %v4633_v25  ;;  %v6121_v25 = vld [vmem:[%s9710_s1 + $0x424] sm:$0xf] }
  0xfc   :  { %2810 = vmatpush.bf16.msrb.mxu0 %v4276_v62  ;;  %v6143_v62 = vld [vmem:[%s9710_s1 + $0x4d4] sm:$0xf]  ;;  %v4764_v41 = vor.u32 %v6177_v43, %v4761_v27 }
  0xfd   :  { %2823 = vmatpush.bf16.msrb.mxu1 %v4340_v46  ;;  %v6159_v46 = vld [vmem:[%s9710_s1 + $0x554] sm:$0xf]  ;;  %v4628_v48 = vor.u32 %v6143_v62, %v4625_v63  ;;  %v6169_v62 = vld [vmem:[%s9710_s1 + $0x5a4] sm:$0xf] }
  0xfe   :  { %2836 = vmatpush.bf16.msrb.mxu2 %v4404_v47  ;;  %v4689_v47 = vld [vmem:[%s9710_s1 + $0x558] sm:$0xf0] }
  0xff   :  { %2849 = vmatpush.bf16.msrb.mxu3 %v4468_v51  ;;  %v4692_v51 = vor.u32 %v6159_v46, %v4689_v47  ;;  %v4540_v46 = vor.u32 %v6121_v25, %v4537_v36 }
 0x100   :  { %2811 = vmatpush.bf16.msrb.mxu0 %v4268_v0  ;;  %v2605_v56 = vpop.f32.mrf.mxu0  ;;  %v4556_v0 = vor.u32 %v6125_v52, %v4553_v53  ;;  %v6135_v52 = vld [vmem:[%s9710_s1 + $0x494] sm:$0xf] }
 0x101   :  { %2824 = vmatpush.bf16.msrb.mxu1 %v4332_v5  ;;  %v2606_v61 = vadd.f32 %v2605_v56, %v8195_v35  ;;  %v2618_v1 = vpop.f32.mrf.mxu1  ;;  %v6123_v5 = vld [vmem:[%s9710_s1 + $0x434] sm:$0xf]  ;;  %v4748_v35 = vor.u32 %v6173_v57, %v4745_v58  ;;  %v6117_v57 = vld [vmem:[%s9710_s1 + $0x404] sm:$0xf]  ;;  %v4521_v58 = vld [vmem:[%s9710_s1 + $0x408] sm:$0xf0] }
 0x102   :  { %2837 = vmatpush.bf16.msrb.mxu2 %v4396_v6  ;;  %v4545_v6 = vld [vmem:[%s9710_s1 + $0x438] sm:$0xf0] }
 0x103   :  { %2850 = vmatpush.bf16.msrb.mxu3 %v4460_v13  ;;  %2812 = vmatmul.bf16.vlgmr.msrb.gmra.mxu0 %v7033_v39  ;;  %v6141_v39 = vld [vmem:[%s9710_s1 + $0x4c4] sm:$0xf]  ;;  %v2619_v10 = vadd.f32 %v2618_v1, %v2606_v61  ;;  %v4609_v13 = vld [vmem:[%s9710_s1 + $0x4b8] sm:$0xf0]  ;;  %v4548_v17 = vor.u32 %v6123_v5, %v4545_v6  ;;  %v4724_v5 = vor.u32 %v6167_v54, %v4721_v55  ;;  %v4649_v6 = vld [vmem:[%s9710_s1 + $0x508] sm:$0xf0] }
 0x104   :  { %2856 = vmatpush.bf16.msra.mxu0 %v4580_v14  ;;  %2825 = vmatmul.bf16.vlgmr.msrb.gmra.mxu1 %v7037_v44  ;;  %v4617_v44 = vld [vmem:[%s9710_s1 + $0x4c8] sm:$0xf0]  ;;  %v6155_v14 = vld [vmem:[%s9710_s1 + $0x534] sm:$0xf]  ;;  %v4612_v20 = vor.u32 %v6139_v9, %v4609_v13  ;;  %v6133_v1 = vld [vmem:[%s9710_s1 + $0x484] sm:$0xf] }
 0x105   :  { %2869 = vmatpush.bf16.msra.mxu1 %v4644_v11  ;;  %2838 = vmatmul.bf16.vlgmr.msrb.gmra.mxu2 %v7025_v34  ;;  %v4753_v34 = vld [vmem:[%s9710_s1 + $0x5d8] sm:$0xf0]  ;;  %v4620_v3 = vor.u32 %v6141_v39, %v4617_v44  ;;  %v6165_v9 = vld [vmem:[%s9710_s1 + $0x584] sm:$0xf]  ;;  %v6195_v13 = vld [vmem:[%s9710_s1 + $0x674] sm:$0xf] }
 0x106   :  { %2882 = vmatpush.bf16.msra.mxu2 %v4708_v15  ;;  %2851 = vmatmul.bf16.vlgmr.msrb.gmra.mxu3 %v7035_v40  ;;  %v4756_v40 = vor.u32 %v6175_v49, %v4753_v34  ;;  %v4673_v11 = vld [vmem:[%s9710_s1 + $0x538] sm:$0xf0]  ;;  %v6171_v15 = vld [vmem:[%s9710_s1 + $0x5b4] sm:$0xf] }
 0x107   :  { %2895 = vmatpush.bf16.msra.mxu3 %v4772_v23  ;;  %v4676_v23 = vor.u32 %v6155_v14, %v4673_v11  ;;  %v4740_v43 = vor.u32 %v6171_v15, %v4737_v16  ;;  %v4593_v39 = vld [vmem:[%s9710_s1 + $0x498] sm:$0xf0]  ;;  %v6211_v11 = vld [vmem:[%s9710_s1 + $0x6f4] sm:$0xf]  ;;  %v4524_v16 = vor.u32 %v6117_v57, %v4521_v58 }
 0x108   :  { %2857 = vmatpush.bf16.msra.mxu0 %v4572_v29  ;;  %v2631_v27 = vpop.f32.mrf.mxu2  ;;  %v4601_v29 = vld [vmem:[%s9710_s1 + $0x4a8] sm:$0xf0]  ;;  %v2607_v63 = vpop.f32.mrf.mxu0  ;;  %v4657_v44 = vld [vmem:[%s9710_s1 + $0x518] sm:$0xf0]  ;;  %v4596_v61 = vor.u32 %v6135_v52, %v4593_v39  ;;  %v6223_v55 = vld [vmem:[%s9710_s1 + $0x754] sm:$0xf] }
 0x109   :  { %2870 = vmatpush.bf16.msra.mxu1 %v4636_v30  ;;  %v6153_v30 = vld [vmem:[%s9710_s1 + $0x524] sm:$0xf]  ;;  %v2632_v60 = vadd.f32 %v2631_v27, %v2619_v10  ;;  %v2644_v37 = vpop.f32.mrf.mxu3  ;;  %v2620_v47 = vpop.f32.mrf.mxu1  ;;  %v4604_v34 = vor.u32 %v6137_v42, %v4601_v29  ;;  %v4833_v14 = vld [vmem:[%s9710_s1 + $0x678] sm:$0xf0]  ;;  %v6243_v42 = vld [vmem:[%s9710_s1 + $0x7f4] sm:$0xf] }
 0x10a   :  { %2883 = vmatpush.bf16.msra.mxu2 %v4700_v21  ;;  %v4665_v21 = vld [vmem:[%s9710_s1 + $0x528] sm:$0xf0]  ;;  %v4836_v29 = vor.u32 %v6195_v13, %v4833_v14  ;;  %v4817_v39 = vld [vmem:[%s9710_s1 + $0x658] sm:$0xf0] }
 0x10b   :  { %2896 = vmatpush.bf16.msra.mxu3 %v4764_v41  ;;  %v4729_v41 = vld [vmem:[%s9710_s1 + $0x5a8] sm:$0xf0]  ;;  %v8394_v49 = vadd.f32 %v2644_v37, %v2632_v60  ;;  %v6193_v60 = vld [vmem:[%s9710_s1 + $0x664] sm:$0xf]  ;;  %v4881_v54 = vld [vmem:[%s9710_s1 + $0x6d8] sm:$0xf0] }
 0x10c   :  { %2858 = vmatpush.bf16.msra.mxu0 %v4564_v50  ;;  %v4668_v50 = vor.u32 %v6153_v30, %v4665_v21  ;;  %v4732_v53 = vor.u32 %v6169_v62, %v4729_v41  ;;  %v4825_v37 = vld [vmem:[%s9710_s1 + $0x668] sm:$0xf0]  ;;  %v6209_v62 = vld [vmem:[%s9710_s1 + $0x6e4] sm:$0xf]  ;;  %v5009_v57 = vld [vmem:[%s9710_s1 + $0x7d8] sm:$0xf0] }
 0x10d   :  { %2871 = vmatpush.bf16.msra.mxu1 %v4628_v48  ;;  %v6119_v48 = vld [vmem:[%s9710_s1 + $0x414] sm:$0xf]  ;;  %v4889_v63 = vld [vmem:[%s9710_s1 + $0x6e8] sm:$0xf0] }
 0x10e   :  { %2884 = vmatpush.bf16.msra.mxu2 %v4692_v51  ;;  %v4529_v51 = vld [vmem:[%s9710_s1 + $0x418] sm:$0xf0]  ;;  %v4953_v47 = vld [vmem:[%s9710_s1 + $0x768] sm:$0xf0] }
 0x10f   :  { %2897 = vmatpush.bf16.msra.mxu3 %v4756_v40  ;;  %v6151_v40 = vld [vmem:[%s9710_s1 + $0x514] sm:$0xf]  ;;  %v4532_v56 = vor.u32 %v6119_v48, %v4529_v51  ;;  %v4828_v48 = vor.u32 %v6193_v60, %v4825_v37  ;;  %v4892_v51 = vor.u32 %v6209_v62, %v4889_v63  ;;  %v6185_v60 = vld [vmem:[%s9710_s1 + $0x624] sm:$0xf]  ;;  %v4793_v37 = vld [vmem:[%s9710_s1 + $0x628] sm:$0xf0] }
 0x110   :  { %2859 = vmatpush.bf16.msra.mxu0 %v4556_v0  ;;  %v4660_v0 = vor.u32 %v6151_v40, %v4657_v44  ;;  %v2633_v10 = vpop.f32.mrf.mxu2  ;;  %v6207_v40 = vld [vmem:[%s9710_s1 + $0x6d4] sm:$0xf]  ;;  %v6201_v62 = vld [vmem:[%s9710_s1 + $0x6a4] sm:$0xf] }
 0x111   :  { %2872 = vmatpush.bf16.msra.mxu1 %v4620_v3  ;;  %v4585_v3 = vld [vmem:[%s9710_s1 + $0x488] sm:$0xf0]  ;;  %v2646_v15 = vpop.f32.mrf.mxu3 }
 0x112   :  { %2885 = vmatpush.bf16.msra.mxu2 %v4684_v4  ;;  %v6149_v4 = vld [vmem:[%s9710_s1 + $0x504] sm:$0xf]  ;;  %v4588_v25 = vor.u32 %v6133_v1, %v4585_v3  ;;  %v4873_v3 = vld [vmem:[%s9710_s1 + $0x6c8] sm:$0xf0] }
 0x113   :  { %2898 = vmatpush.bf16.msra.mxu3 %v4748_v35  ;;  %v4713_v35 = vld [vmem:[%s9710_s1 + $0x588] sm:$0xf0]  ;;  %v4652_v36 = vor.u32 %v6149_v4, %v4649_v6  ;;  %v6205_v1 = vld [vmem:[%s9710_s1 + $0x6c4] sm:$0xf] }
 0x114   :  { %2860 = vmatpush.bf16.msra.mxu0 %v4548_v17  ;;  %v4897_v17 = vld [vmem:[%s9710_s1 + $0x6f8] sm:$0xf0]  ;;  %v4716_v27 = vor.u32 %v6165_v9, %v4713_v35  ;;  %v6221_v4 = vld [vmem:[%s9710_s1 + $0x744] sm:$0xf]  ;;  %v5001_v35 = vld [vmem:[%s9710_s1 + $0x7c8] sm:$0xf0] }
 0x115   :  { %2873 = vmatpush.bf16.msra.mxu1 %v4612_v20  ;;  %v6227_v20 = vld [vmem:[%s9710_s1 + $0x774] sm:$0xf]  ;;  %v4900_v30 = vor.u32 %v6211_v11, %v4897_v17  ;;  %v6237_v9 = vld [vmem:[%s9710_s1 + $0x7c4] sm:$0xf]  ;;  %v4876_v11 = vor.u32 %v6205_v1, %v4873_v3  ;;  %v4801_v17 = vld [vmem:[%s9710_s1 + $0x638] sm:$0xf0] }
 0x116   :  { %2886 = vmatpush.bf16.msra.mxu2 %v4676_v23  ;;  %v4961_v23 = vld [vmem:[%s9710_s1 + $0x778] sm:$0xf0]  ;;  %v6181_v3 = vld [vmem:[%s9710_s1 + $0x604] sm:$0xf] }
 0x117   :  { %2899 = vmatpush.bf16.msra.mxu3 %v4740_v43  ;;  %v5025_v43 = vld [vmem:[%s9710_s1 + $0x7f8] sm:$0xf0]  ;;  %v4964_v21 = vor.u32 %v6227_v20, %v4961_v23  ;;  %v6203_v20 = vld [vmem:[%s9710_s1 + $0x6b4] sm:$0xf] }
 0x118   :  { %2861 = vmatpush.bf16.msra.mxu0 %v4540_v46  ;;  %v5028_v41 = vor.u32 %v6243_v42, %v5025_v43  ;;  %v6225_v46 = vld [vmem:[%s9710_s1 + $0x764] sm:$0xf]  ;;  %v4929_v42 = vld [vmem:[%s9710_s1 + $0x738] sm:$0xf0]  ;;  %v6235_v43 = vld [vmem:[%s9710_s1 + $0x7b4] sm:$0xf] }
 0x119   :  { %2874 = vmatpush.bf16.msra.mxu1 %v4604_v34  ;;  %v6241_v34 = vld [vmem:[%s9710_s1 + $0x7e4] sm:$0xf]  ;;  %v4956_v52 = vor.u32 %v6225_v46, %v4953_v47  ;;  %v4857_v46 = vld [vmem:[%s9710_s1 + $0x6a8] sm:$0xf0]  ;;  %v4977_v1 = vld [vmem:[%s9710_s1 + $0x798] sm:$0xf0] }
 0x11a   :  { %2887 = vmatpush.bf16.msra.mxu2 %v4668_v50  ;;  %v5017_v50 = vld [vmem:[%s9710_s1 + $0x7e8] sm:$0xf0]  ;;  %v6217_v47 = vld [vmem:[%s9710_s1 + $0x724] sm:$0xf] }
 0x11b   :  { %2900 = vmatpush.bf16.msra.mxu3 %v4732_v53  ;;  %v6191_v53 = vld [vmem:[%s9710_s1 + $0x654] sm:$0xf]  ;;  %v5020_v44 = vor.u32 %v6241_v34, %v5017_v50  ;;  %v4921_v34 = vld [vmem:[%s9710_s1 + $0x728] sm:$0xf0] }
 0x11c   :  { %2862 = vmatpush.bf16.msra.mxu0 %v4532_v56  ;;  %v4945_v56 = vld [vmem:[%s9710_s1 + $0x758] sm:$0xf0]  ;;  %v4820_v58 = vor.u32 %v6191_v53, %v4817_v39  ;;  %v4796_v39 = vor.u32 %v6185_v60, %v4793_v37 }
 0x11d   :  { %2875 = vmatpush.bf16.msra.mxu1 %v4596_v61  ;;  %v4884_v61 = vor.u32 %v6207_v40, %v4881_v54  ;;  %v4860_v54 = vor.u32 %v6201_v62, %v4857_v46  ;;  %v5081_v46 = vld [vmem:[%s9710_s1 + $0x868] sm:$0xf0] }
 0x11e   :  { %2888 = vmatpush.bf16.msra.mxu2 %v4660_v0  ;;  %v4948_v0 = vor.u32 %v6223_v55, %v4945_v56  ;;  %v4924_v55 = vor.u32 %v6217_v47, %v4921_v34  ;;  %v6183_v56 = vld [vmem:[%s9710_s1 + $0x614] sm:$0xf]  ;;  %v6273_v47 = vld [vmem:[%s9710_s1 + $0x8e4] sm:$0xf] }
 0x11f   :  { %2901 = vmatpush.bf16.msra.mxu3 %v4724_v5  ;;  %v4937_v5 = vld [vmem:[%s9710_s1 + $0x748] sm:$0xf0] }
 0x120   :  { %2863 = vmatpush.bf16.msra.mxu0 %v4524_v16  ;;  %v2657_v6 = vpop.f32.mrf.mxu0  ;;  %v4940_v15 = vor.u32 %v6221_v4, %v4937_v5  ;;  %v6187_v16 = vld [vmem:[%s9710_s1 + $0x634] sm:$0xf]  ;;  %v4777_v4 = vld [vmem:[%s9710_s1 + $0x608] sm:$0xf0] }
 0x121   :  { %2876 = vmatpush.bf16.msra.mxu1 %v4588_v25  ;;  %v2658_v10 = vadd.f32 %v2657_v6, %v8394_v49  ;;  %v2670_v14 = vpop.f32.mrf.mxu1  ;;  %v5004_v49 = vor.u32 %v6237_v9, %v5001_v35  ;;  %v4865_v25 = vld [vmem:[%s9710_s1 + $0x6b8] sm:$0xf0]  ;;  %v6197_v9 = vld [vmem:[%s9710_s1 + $0x684] sm:$0xf]  ;;  %v4841_v35 = vld [vmem:[%s9710_s1 + $0x688] sm:$0xf0] }
 0x122   :  { %2889 = vmatpush.bf16.msra.mxu2 %v4652_v36  ;;  %v6219_v36 = vld [vmem:[%s9710_s1 + $0x734] sm:$0xf] }
 0x123   :  { %2902 = vmatpush.bf16.msra.mxu3 %v4716_v27  ;;  %2864 = vmatmul.bf16.vlgmr.msra.gmra.mxu0 %v7233_v24  ;;  %v6239_v24 = vld [vmem:[%s9710_s1 + $0x7d4] sm:$0xf]  ;;  %v2671_v23 = vadd.f32 %v2670_v14, %v2658_v10  ;;  %v4993_v27 = vld [vmem:[%s9710_s1 + $0x7b8] sm:$0xf0]  ;;  %v6213_v10 = vld [vmem:[%s9710_s1 + $0x704] sm:$0xf] }
 0x124   :  { %2908 = vmatpush.bf16.msrb.mxu0 %v4836_v29  ;;  %2877 = vmatmul.bf16.vlgmr.msra.gmra.mxu1 %v7250_v18  ;;  %v4809_v18 = vld [vmem:[%s9710_s1 + $0x648] sm:$0xf0]  ;;  %v4804_v29 = vor.u32 %v6187_v16, %v4801_v17  ;;  %v6259_v17 = vld [vmem:[%s9710_s1 + $0x874] sm:$0xf] }
 0x125   :  { %2921 = vmatpush.bf16.msrb.mxu1 %v4900_v30  ;;  %2890 = vmatmul.bf16.vlgmr.msra.gmra.mxu2 %v7246_v28  ;;  %v6189_v28 = vld [vmem:[%s9710_s1 + $0x644] sm:$0xf]  ;;  %v4868_v30 = vor.u32 %v6203_v20, %v4865_v25  ;;  %v4905_v14 = vld [vmem:[%s9710_s1 + $0x708] sm:$0xf0]  ;;  %v5089_v20 = vld [vmem:[%s9710_s1 + $0x878] sm:$0xf0]  ;;  %v4780_v25 = vor.u32 %v6181_v3, %v4777_v4 }
 0x126   :  { %2934 = vmatpush.bf16.msrb.mxu2 %v4964_v21  ;;  %2903 = vmatmul.bf16.vlgmr.msra.gmra.mxu3 %v7260_v31  ;;  %v5012_v31 = vor.u32 %v6239_v24, %v5009_v57  ;;  %v4812_v13 = vor.u32 %v6189_v28, %v4809_v18  ;;  %v4932_v21 = vor.u32 %v6219_v36, %v4929_v42  ;;  %v4785_v24 = vld [vmem:[%s9710_s1 + $0x618] sm:$0xf0]  ;;  %v6199_v57 = vld [vmem:[%s9710_s1 + $0x694] sm:$0xf]  ;;  %v6269_v3 = vld [vmem:[%s9710_s1 + $0x8c4] sm:$0xf] }
 0x127   :  { %2947 = vmatpush.bf16.msrb.mxu3 %v5028_v41  ;;  %v4996_v41 = vor.u32 %v6235_v43, %v4993_v27  ;;  %v4913_v28 = vld [vmem:[%s9710_s1 + $0x718] sm:$0xf0]  ;;  %v6231_v18 = vld [vmem:[%s9710_s1 + $0x794] sm:$0xf]  ;;  %v4844_v27 = vor.u32 %v6197_v9, %v4841_v35  ;;  %v5092_v37 = vor.u32 %v6259_v17, %v5089_v20  ;;  %v5129_v4 = vld [vmem:[%s9710_s1 + $0x8c8] sm:$0xf0] }
 0x128   :  { %2909 = vmatpush.bf16.msrb.mxu0 %v4828_v48  ;;  %v2683_v63 = vpop.f32.mrf.mxu2  ;;  %v2659_v53 = vpop.f32.mrf.mxu0  ;;  %v5153_v36 = vld [vmem:[%s9710_s1 + $0x8f8] sm:$0xf0]  ;;  %v6291_v42 = vld [vmem:[%s9710_s1 + $0x974] sm:$0xf]  ;;  %v6301_v35 = vld [vmem:[%s9710_s1 + $0x9c4] sm:$0xf] }
 0x129   :  { %2922 = vmatpush.bf16.msrb.mxu1 %v4892_v51  ;;  %v2684_v50 = vadd.f32 %v2683_v63, %v2671_v23  ;;  %v2696_v48 = vpop.f32.mrf.mxu3  ;;  %v6233_v51 = vld [vmem:[%s9710_s1 + $0x7a4] sm:$0xf]  ;;  %v2672_v40 = vpop.f32.mrf.mxu1  ;;  %v5217_v43 = vld [vmem:[%s9710_s1 + $0x978] sm:$0xf0]  ;;  %v5273_v53 = vld [vmem:[%s9710_s1 + $0x9e8] sm:$0xf0] }
 0x12a   :  { %2935 = vmatpush.bf16.msrb.mxu2 %v4956_v52  ;;  %v4985_v52 = vld [vmem:[%s9710_s1 + $0x7a8] sm:$0xf0]  ;;  %v6257_v63 = vld [vmem:[%s9710_s1 + $0x864] sm:$0xf]  ;;  %v6251_v17 = vld [vmem:[%s9710_s1 + $0x834] sm:$0xf] }
 0x12b   :  { %2948 = vmatpush.bf16.msrb.mxu3 %v5020_v44  ;;  %v8593_v44 = vadd.f32 %v2696_v48, %v2684_v50  ;;  %v5145_v50 = vld [vmem:[%s9710_s1 + $0x8e8] sm:$0xf0]  ;;  %v6289_v48 = vld [vmem:[%s9710_s1 + $0x964] sm:$0xf]  ;;  %v5057_v20 = vld [vmem:[%s9710_s1 + $0x838] sm:$0xf0] }
 0x12c   :  { %2910 = vmatpush.bf16.msrb.mxu0 %v4820_v58  ;;  %v4988_v58 = vor.u32 %v6233_v51, %v4985_v52  ;;  %v5209_v51 = vld [vmem:[%s9710_s1 + $0x968] sm:$0xf0]  ;;  %v6305_v52 = vld [vmem:[%s9710_s1 + $0x9e4] sm:$0xf]  ;;  %v5148_v40 = vor.u32 %v6273_v47, %v5145_v50 }
 0x12d   :  { %2923 = vmatpush.bf16.msrb.mxu1 %v4884_v61  ;;  %v4849_v61 = vld [vmem:[%s9710_s1 + $0x698] sm:$0xf0]  ;;  %v6281_v47 = vld [vmem:[%s9710_s1 + $0x924] sm:$0xf] }
 0x12e   :  { %2936 = vmatpush.bf16.msrb.mxu2 %v4948_v0  ;;  %v6215_v0 = vld [vmem:[%s9710_s1 + $0x714] sm:$0xf]  ;;  %v4852_v5 = vor.u32 %v6199_v57, %v4849_v61  ;;  %v5276_v57 = vor.u32 %v6305_v52, %v5273_v53  ;;  %v5241_v52 = vld [vmem:[%s9710_s1 + $0x9a8] sm:$0xf0] }
 0x12f   :  { %2949 = vmatpush.bf16.msrb.mxu3 %v5012_v31  ;;  %v4788_v31 = vor.u32 %v6183_v56, %v4785_v24  ;;  %v4916_v6 = vor.u32 %v6215_v0, %v4913_v28  ;;  %v5073_v56 = vld [vmem:[%s9710_s1 + $0x858] sm:$0xf0]  ;;  %v6271_v24 = vld [vmem:[%s9710_s1 + $0x8d4] sm:$0xf] }
 0x130   :  { %2911 = vmatpush.bf16.msrb.mxu0 %v4812_v13  ;;  %v4980_v13 = vor.u32 %v6231_v18, %v4977_v1  ;;  %v2685_v16 = vpop.f32.mrf.mxu2  ;;  %v6287_v61 = vld [vmem:[%s9710_s1 + $0x954] sm:$0xf]  ;;  %v5201_v0 = vld [vmem:[%s9710_s1 + $0x958] sm:$0xf0] }
 0x131   :  { %2924 = vmatpush.bf16.msrb.mxu1 %v4876_v11  ;;  %v6229_v11 = vld [vmem:[%s9710_s1 + $0x784] sm:$0xf]  ;;  %v2698_v23 = vpop.f32.mrf.mxu3  ;;  %v5265_v28 = vld [vmem:[%s9710_s1 + $0x9d8] sm:$0xf0] }
 0x132   :  { %2937 = vmatpush.bf16.msrb.mxu2 %v4940_v15  ;;  %v4969_v15 = vld [vmem:[%s9710_s1 + $0x788] sm:$0xf0] }
 0x133   :  { %2950 = vmatpush.bf16.msrb.mxu3 %v5004_v49  ;;  %v6275_v49 = vld [vmem:[%s9710_s1 + $0x8f4] sm:$0xf]  ;;  %v4972_v60 = vor.u32 %v6229_v11, %v4969_v15  ;;  %v5132_v15 = vor.u32 %v6269_v3, %v5129_v4  ;;  %v6261_v4 = vld [vmem:[%s9710_s1 + $0x884] sm:$0xf] }
 0x134   :  { %2912 = vmatpush.bf16.msrb.mxu0 %v4804_v29  ;;  %v4908_v29 = vor.u32 %v6213_v10, %v4905_v14  ;;  %v5156_v62 = vor.u32 %v6275_v49, %v5153_v36  ;;  %v5257_v10 = vld [vmem:[%s9710_s1 + $0x9c8] sm:$0xf0]  ;;  %v6267_v49 = vld [vmem:[%s9710_s1 + $0x8b4] sm:$0xf] }
 0x135   :  { %2925 = vmatpush.bf16.msrb.mxu1 %v4868_v30  ;;  %v6307_v30 = vld [vmem:[%s9710_s1 + $0x9f4] sm:$0xf] }
 0x136   :  { %2938 = vmatpush.bf16.msrb.mxu2 %v4932_v21  ;;  %v5281_v21 = vld [vmem:[%s9710_s1 + $0x9f8] sm:$0xf0]  ;;  %v6283_v36 = vld [vmem:[%s9710_s1 + $0x934] sm:$0xf] }
 0x137   :  { %2951 = vmatpush.bf16.msrb.mxu3 %v4996_v41  ;;  %v5220_v41 = vor.u32 %v6291_v42, %v5217_v43  ;;  %v5284_v34 = vor.u32 %v6307_v30, %v5281_v21  ;;  %v5185_v42 = vld [vmem:[%s9710_s1 + $0x938] sm:$0xf0]  ;;  %v6299_v43 = vld [vmem:[%s9710_s1 + $0x9b4] sm:$0xf] }
 0x138   :  { %2913 = vmatpush.bf16.msrb.mxu0 %v4796_v39  ;;  %v5084_v39 = vor.u32 %v6257_v63, %v5081_v46  ;;  %v5188_v21 = vor.u32 %v6283_v36, %v5185_v42  ;;  %v5113_v46 = vld [vmem:[%s9710_s1 + $0x8a8] sm:$0xf0]  ;;  %v6371_v42 = vld [vmem:[%s9710_s1 + $0xbf4] sm:$0xf] }
 0x139   :  { %2926 = vmatpush.bf16.msrb.mxu1 %v4860_v54  ;;  %v5212_v54 = vor.u32 %v6289_v48, %v5209_v51  ;;  %v6297_v51 = vld [vmem:[%s9710_s1 + $0x9a4] sm:$0xf] }
 0x13a   :  { %2939 = vmatpush.bf16.msrb.mxu2 %v4924_v55  ;;  %v6255_v55 = vld [vmem:[%s9710_s1 + $0x854] sm:$0xf] }
 0x13b   :  { %2952 = vmatpush.bf16.msrb.mxu3 %v4988_v58  ;;  %v5137_v58 = vld [vmem:[%s9710_s1 + $0x8d8] sm:$0xf0]  ;;  %v5076_v18 = vor.u32 %v6255_v55, %v5073_v56 }
 0x13c   :  { %2914 = vmatpush.bf16.msrb.mxu0 %v4788_v31  ;;  %v5140_v1 = vor.u32 %v6271_v24, %v5137_v58  ;;  %v5204_v31 = vor.u32 %v6287_v61, %v5201_v0  ;;  %v6247_v24 = vld [vmem:[%s9710_s1 + $0x814] sm:$0xf]  ;;  %v5244_v61 = vor.u32 %v6297_v51, %v5241_v52  ;;  %v5105_v0 = vld [vmem:[%s9710_s1 + $0x898] sm:$0xf0] }
 0x13d   :  { %2927 = vmatpush.bf16.msrb.mxu1 %v4852_v5  ;;  %v6285_v5 = vld [vmem:[%s9710_s1 + $0x944] sm:$0xf]  ;;  %v6263_v58 = vld [vmem:[%s9710_s1 + $0x894] sm:$0xf] }
 0x13e   :  { %2940 = vmatpush.bf16.msrb.mxu2 %v4916_v6  ;;  %v5193_v6 = vld [vmem:[%s9710_s1 + $0x948] sm:$0xf0]  ;;  %v5108_v3 = vor.u32 %v6263_v58, %v5105_v0  ;;  %v5521_v58 = vld [vmem:[%s9710_s1 + $0xbd8] sm:$0xf0]  ;;  %v6317_v0 = vld [vmem:[%s9710_s1 + $0xa44] sm:$0xf] }
 0x13f   :  { %2953 = vmatpush.bf16.msrb.mxu3 %v4980_v13  ;;  %v5196_v16 = vor.u32 %v6285_v5, %v5193_v6  ;;  %v5097_v5 = vld [vmem:[%s9710_s1 + $0x888] sm:$0xf0]  ;;  %v6277_v6 = vld [vmem:[%s9710_s1 + $0x904] sm:$0xf] }
 0x140   :  { %2915 = vmatpush.bf16.msrb.mxu0 %v4780_v25  ;;  %v2709_v9 = vpop.f32.mrf.mxu0  ;;  %v5121_v25 = vld [vmem:[%s9710_s1 + $0x8b8] sm:$0xf0] }
 0x141   :  { %2928 = vmatpush.bf16.msrb.mxu1 %v4844_v27  ;;  %v2710_v13 = vadd.f32 %v2709_v9, %v8593_v44  ;;  %v2722_v11 = vpop.f32.mrf.mxu1  ;;  %v5260_v44 = vor.u32 %v6301_v35, %v5257_v10  ;;  %v5249_v27 = vld [vmem:[%s9710_s1 + $0x9b8] sm:$0xf0]  ;;  %v5124_v30 = vor.u32 %v6267_v49, %v5121_v25  ;;  %v5161_v35 = vld [vmem:[%s9710_s1 + $0x908] sm:$0xf0]  ;;  %v6293_v10 = vld [vmem:[%s9710_s1 + $0x984] sm:$0xf]  ;;  %v5100_v25 = vor.u32 %v6261_v4, %v5097_v5 }
 0x142   :  { %2941 = vmatpush.bf16.msrb.mxu2 %v4908_v29  ;;  %v5060_v29 = vor.u32 %v6251_v17, %v5057_v20  ;;  %v5409_v49 = vld [vmem:[%s9710_s1 + $0xaf8] sm:$0xf0]  ;;  %v5164_v36 = vor.u32 %v6277_v6, %v5161_v35  ;;  %v6315_v35 = vld [vmem:[%s9710_s1 + $0xa34] sm:$0xf] }
 0x143   :  { %2954 = vmatpush.bf16.msrb.mxu3 %v4972_v60  ;;  %2916 = vmatmul.bf16.vlgmr.msrb.gmra.mxu0 %v7456_v26  ;;  %v6303_v26 = vld [vmem:[%s9710_s1 + $0x9d4] sm:$0xf]  ;;  %v2723_v23 = vadd.f32 %v2722_v11, %v2710_v13  ;;  %v6249_v60 = vld [vmem:[%s9710_s1 + $0x824] sm:$0xf]  ;;  %v5225_v13 = vld [vmem:[%s9710_s1 + $0x988] sm:$0xf0] }
 0x144   :  { %2960 = vmatpush.bf16.msra.mxu0 %v5092_v37  ;;  %2929 = vmatmul.bf16.vlgmr.msrb.gmra.mxu1 %v7473_v59  ;;  %v5065_v59 = vld [vmem:[%s9710_s1 + $0x848] sm:$0xf0]  ;;  %v6323_v11 = vld [vmem:[%s9710_s1 + $0xa74] sm:$0xf] }
 0x145   :  { %2973 = vmatpush.bf16.msra.mxu1 %v5156_v62  ;;  %2942 = vmatmul.bf16.vlgmr.msrb.gmra.mxu2 %v7469_v19  ;;  %v6253_v19 = vld [vmem:[%s9710_s1 + $0x844] sm:$0xf]  ;;  %v5049_v37 = vld [vmem:[%s9710_s1 + $0x828] sm:$0xf0] }
 0x146   :  { %2986 = vmatpush.bf16.msra.mxu2 %v5220_v41  ;;  %2955 = vmatmul.bf16.vlgmr.msrb.gmra.mxu3 %v7483_v33  ;;  %v5268_v33 = vor.u32 %v6303_v26, %v5265_v28  ;;  %v5068_v14 = vor.u32 %v6253_v19, %v5065_v59  ;;  %v6265_v62 = vld [vmem:[%s9710_s1 + $0x8a4] sm:$0xf]  ;;  %v5252_v41 = vor.u32 %v6299_v43, %v5249_v27  ;;  %v6279_v26 = vld [vmem:[%s9710_s1 + $0x914] sm:$0xf]  ;;  %v5169_v28 = vld [vmem:[%s9710_s1 + $0x918] sm:$0xf0] }
 0x147   :  { %2999 = vmatpush.bf16.msra.mxu3 %v5284_v34  ;;  %v5177_v34 = vld [vmem:[%s9710_s1 + $0x928] sm:$0xf0]  ;;  %v5116_v55 = vor.u32 %v6265_v62, %v5113_v46  ;;  %v6245_v19 = vld [vmem:[%s9710_s1 + $0x804] sm:$0xf]  ;;  %v5537_v43 = vld [vmem:[%s9710_s1 + $0xbf8] sm:$0xf0]  ;;  %v5228_v27 = vor.u32 %v6293_v10, %v5225_v13 }
 0x148   :  { %2961 = vmatpush.bf16.msra.mxu0 %v5084_v39  ;;  %v2735_v63 = vpop.f32.mrf.mxu2  ;;  %v2711_v53 = vpop.f32.mrf.mxu0  ;;  %v5052_v39 = vor.u32 %v6249_v60, %v5049_v37  ;;  %v5180_v56 = vor.u32 %v6281_v47, %v5177_v34  ;;  %v5033_v59 = vld [vmem:[%s9710_s1 + $0x808] sm:$0xf0]  ;;  %v6321_v60 = vld [vmem:[%s9710_s1 + $0xa64] sm:$0xf]  ;;  %v5313_v10 = vld [vmem:[%s9710_s1 + $0xa38] sm:$0xf0] }
 0x149   :  { %2974 = vmatpush.bf16.msra.mxu1 %v5148_v40  ;;  %v2736_v50 = vadd.f32 %v2735_v63, %v2723_v23  ;;  %v2748_v48 = vpop.f32.mrf.mxu3  ;;  %v2724_v40 = vpop.f32.mrf.mxu1  ;;  %v5036_v20 = vor.u32 %v6245_v19, %v5033_v59  ;;  %v5473_v23 = vld [vmem:[%s9710_s1 + $0xb78] sm:$0xf0]  ;;  %v5337_v37 = vld [vmem:[%s9710_s1 + $0xa68] sm:$0xf0]  ;;  %v6337_v62 = vld [vmem:[%s9710_s1 + $0xae4] sm:$0xf] }
 0x14a   :  { %2987 = vmatpush.bf16.msra.mxu2 %v5212_v54  ;;  %v5401_v63 = vld [vmem:[%s9710_s1 + $0xae8] sm:$0xf0]  ;;  %v6353_v46 = vld [vmem:[%s9710_s1 + $0xb64] sm:$0xf]  ;;  %v6319_v53 = vld [vmem:[%s9710_s1 + $0xa54] sm:$0xf] }
 0x14b   :  { %3000 = vmatpush.bf16.msra.mxu3 %v5276_v57  ;;  %v8792_v54 = vadd.f32 %v2748_v48, %v2736_v50  ;;  %v5041_v57 = vld [vmem:[%s9710_s1 + $0x818] sm:$0xf0]  ;;  %v5465_v47 = vld [vmem:[%s9710_s1 + $0xb68] sm:$0xf0]  ;;  %v6369_v34 = vld [vmem:[%s9710_s1 + $0xbe4] sm:$0xf]  ;;  %v5340_v48 = vor.u32 %v6321_v60, %v5337_v37  ;;  %v5404_v51 = vor.u32 %v6337_v62, %v5401_v63 }
 0x14c   :  { %2962 = vmatpush.bf16.msra.mxu0 %v5076_v18  ;;  %v6295_v18 = vld [vmem:[%s9710_s1 + $0x994] sm:$0xf]  ;;  %v5529_v50 = vld [vmem:[%s9710_s1 + $0xbe8] sm:$0xf0]  ;;  %v5468_v52 = vor.u32 %v6353_v46, %v5465_v47  ;;  %v6349_v19 = vld [vmem:[%s9710_s1 + $0xb44] sm:$0xf] }
 0x14d   :  { %2975 = vmatpush.bf16.msra.mxu1 %v5140_v1  ;;  %v5233_v1 = vld [vmem:[%s9710_s1 + $0x998] sm:$0xf0]  ;;  %v6335_v40 = vld [vmem:[%s9710_s1 + $0xad4] sm:$0xf]  ;;  %v5449_v59 = vld [vmem:[%s9710_s1 + $0xb48] sm:$0xf0] }
 0x14e   :  { %2988 = vmatpush.bf16.msra.mxu2 %v5204_v31  ;;  %v5044_v31 = vor.u32 %v6247_v24, %v5041_v57  ;;  %v5236_v9 = vor.u32 %v6295_v18, %v5233_v1  ;;  %v6351_v24 = vld [vmem:[%s9710_s1 + $0xb54] sm:$0xf]  ;;  %v5457_v57 = vld [vmem:[%s9710_s1 + $0xb58] sm:$0xf0]  ;;  %v5369_v60 = vld [vmem:[%s9710_s1 + $0xaa8] sm:$0xf0] }
 0x14f   :  { %3001 = vmatpush.bf16.msra.mxu3 %v5268_v33  ;;  %v5172_v33 = vor.u32 %v6279_v26, %v5169_v28  ;;  %v5321_v26 = vld [vmem:[%s9710_s1 + $0xa48] sm:$0xf0]  ;;  %v6333_v28 = vld [vmem:[%s9710_s1 + $0xac4] sm:$0xf]  ;;  %v6331_v13 = vld [vmem:[%s9710_s1 + $0xab4] sm:$0xf] }
 0x150   :  { %2963 = vmatpush.bf16.msra.mxu0 %v5068_v14  ;;  %v2737_v14 = vpop.f32.mrf.mxu2  ;;  %v5324_v4 = vor.u32 %v6317_v0, %v5321_v26  ;;  %v6345_v37 = vld [vmem:[%s9710_s1 + $0xb24] sm:$0xf]  ;;  %v5433_v62 = vld [vmem:[%s9710_s1 + $0xb28] sm:$0xf0] }
 0x151   :  { %2976 = vmatpush.bf16.msra.mxu1 %v5132_v15  ;;  %v5345_v15 = vld [vmem:[%s9710_s1 + $0xa78] sm:$0xf0]  ;;  %v2750_v17 = vpop.f32.mrf.mxu3  ;;  %v6361_v46 = vld [vmem:[%s9710_s1 + $0xba4] sm:$0xf]  ;;  %v5497_v47 = vld [vmem:[%s9710_s1 + $0xba8] sm:$0xf0] }
 0x152   :  { %2989 = vmatpush.bf16.msra.mxu2 %v5196_v16  ;;  %v6339_v16 = vld [vmem:[%s9710_s1 + $0xaf4] sm:$0xf] }
 0x153   :  { %3002 = vmatpush.bf16.msra.mxu3 %v5260_v44  ;;  %v6355_v44 = vld [vmem:[%s9710_s1 + $0xb74] sm:$0xf] }
 0x154   :  { %2964 = vmatpush.bf16.msra.mxu0 %v5060_v29  ;;  %v5348_v29 = vor.u32 %v6323_v11, %v5345_v15  ;;  %v6347_v17 = vld [vmem:[%s9710_s1 + $0xb34] sm:$0xf] }
 0x155   :  { %2977 = vmatpush.bf16.msra.mxu1 %v5124_v30  ;;  %v5412_v30 = vor.u32 %v6339_v16, %v5409_v49  ;;  %v5377_v16 = vld [vmem:[%s9710_s1 + $0xab8] sm:$0xf0]  ;;  %v6363_v49 = vld [vmem:[%s9710_s1 + $0xbb4] sm:$0xf] }
 0x156   :  { %2990 = vmatpush.bf16.msra.mxu2 %v5188_v21  ;;  %v5476_v21 = vor.u32 %v6355_v44, %v5473_v23  ;;  %v5505_v44 = vld [vmem:[%s9710_s1 + $0xbb8] sm:$0xf0] }
 0x157   :  { %3003 = vmatpush.bf16.msra.mxu3 %v5252_v41  ;;  %v5540_v41 = vor.u32 %v6371_v42, %v5537_v43  ;;  %v6313_v43 = vld [vmem:[%s9710_s1 + $0xa24] sm:$0xf] }
 0x158   :  { %2965 = vmatpush.bf16.msra.mxu0 %v5052_v39  ;;  %v5329_v39 = vld [vmem:[%s9710_s1 + $0xa58] sm:$0xf0] }
 0x159   :  { %2978 = vmatpush.bf16.msra.mxu1 %v5116_v55  ;;  %v5532_v55 = vor.u32 %v6369_v34, %v5529_v50 }
 0x15a   :  { %2991 = vmatpush.bf16.msra.mxu2 %v5180_v56  ;;  %v5393_v56 = vld [vmem:[%s9710_s1 + $0xad8] sm:$0xf0] }
 0x15b   :  { %3004 = vmatpush.bf16.msra.mxu3 %v5244_v61  ;;  %v5332_v61 = vor.u32 %v6319_v53, %v5329_v39  ;;  %v6311_v53 = vld [vmem:[%s9710_s1 + $0xa14] sm:$0xf]  ;;  %v5297_v39 = vld [vmem:[%s9710_s1 + $0xa18] sm:$0xf0] }
 0x15c   :  { %2966 = vmatpush.bf16.msra.mxu0 %v5044_v31  ;;  %v5385_v31 = vld [vmem:[%s9710_s1 + $0xac8] sm:$0xf0]  ;;  %v5300_v0 = vor.u32 %v6311_v53, %v5297_v39  ;;  %v5559_v53 = vld [vmem:[%s9712_s3 + $0x20] sm:$0xf] }
 0x15d   :  { %2979 = vmatpush.bf16.msra.mxu1 %v5108_v3  ;;  %v6365_v3 = vld [vmem:[%s9710_s1 + $0xbc4] sm:$0xf]  ;;  %v5388_v6 = vor.u32 %v6333_v28, %v5385_v31  ;;  %v5289_v28 = vld [vmem:[%s9710_s1 + $0xa08] sm:$0xf0] }
 0x15e   :  { %2992 = vmatpush.bf16.msra.mxu2 %v5172_v33  ;;  %v5513_v33 = vld [vmem:[%s9710_s1 + $0xbc8] sm:$0xf0] }
 0x15f   :  { %3005 = vmatpush.bf16.msra.mxu3 %v5236_v9  ;;  %v5452_v9 = vor.u32 %v6349_v19, %v5449_v59  ;;  %v5516_v15 = vor.u32 %v6365_v3, %v5513_v33  ;;  %v6341_v19 = vld [vmem:[%s9710_s1 + $0xb04] sm:$0xf]  ;;  %v5417_v59 = vld [vmem:[%s9710_s1 + $0xb08] sm:$0xf0] }
 0x160   :  { %2967 = vmatpush.bf16.msra.mxu0 %v5036_v20  ;;  %v2761_v5 = vpop.f32.mrf.mxu0  ;;  %v5441_v20 = vld [vmem:[%s9710_s1 + $0xb38] sm:$0xf0]  ;;  %v6357_v3 = vld [vmem:[%s9710_s1 + $0xb84] sm:$0xf] }
 0x161   :  { %2980 = vmatpush.bf16.msra.mxu1 %v5100_v25  ;;  %v2774_v11 = vpop.f32.mrf.mxu1  ;;  %v5316_v25 = vor.u32 %v6315_v35, %v5313_v10  ;;  %v5444_v42 = vor.u32 %v6347_v17, %v5441_v20  ;;  %v6387_v35 = vld [vmem:[%s9712_s3 + $0x74] sm:$0xf]  ;;  %v5601_v10 = vld [vmem:[%s9712_s3 + $0x78] sm:$0xf0]  ;;  %v5591_v17 = vld [vmem:[%s9712_s3 + $0x60] sm:$0xf] }
 0x162   :  { %2993 = vmatpush.bf16.msra.mxu2 %v5164_v36  ;;  %v5380_v36 = vor.u32 %v6331_v13, %v5377_v16  ;;  %v5604_v16 = vor.u32 %v6387_v35, %v5601_v10  ;;  %v6386_v20 = vld [vmem:[%s9712_s3 + $0x64] sm:$0xf0] }
 0x163   :  { %3006 = vmatpush.bf16.msra.mxu3 %v5228_v27  ;;  %2968 = vmatmul.bf16.vlgmr.msra.gmra.mxu0 %v7666_v32  ;;  %v6367_v32 = vld [vmem:[%s9710_s1 + $0xbd4] sm:$0xf]  ;;  %v5305_v27 = vld [vmem:[%s9710_s1 + $0xa28] sm:$0xf0] }
 0x164   :  { %3012 = vmatpush.bf16.msrb.mxu0 %v5348_v29  ;;  %2981 = vmatmul.bf16.vlgmr.msra.gmra.mxu1 %v7679_v22  ;;  %v5460_v22 = vor.u32 %v6351_v24, %v5457_v57  ;;  %v5524_v1 = vor.u32 %v6367_v32, %v5521_v58  ;;  %v6329_v29 = vld [vmem:[%s9710_s1 + $0xaa4] sm:$0xf]  ;;  %v5308_v34 = vor.u32 %v6313_v43, %v5305_v27  ;;  %v5361_v24 = vld [vmem:[%s9710_s1 + $0xa98] sm:$0xf0]  ;;  %v6343_v57 = vld [vmem:[%s9710_s1 + $0xb14] sm:$0xf] }
 0x165   :  { %3025 = vmatpush.bf16.msrb.mxu1 %v5412_v30  ;;  %2994 = vmatmul.bf16.vlgmr.msra.gmra.mxu2 %v7677_v38  ;;  %v5396_v38 = vor.u32 %v6335_v40, %v5393_v56  ;;  %v6327_v40 = vld [vmem:[%s9710_s1 + $0xa94] sm:$0xf]  ;;  %v5500_v56 = vor.u32 %v6361_v46, %v5497_v47  ;;  %v5425_v32 = vld [vmem:[%s9710_s1 + $0xb18] sm:$0xf0] }
 0x166   :  { %3038 = vmatpush.bf16.msrb.mxu2 %v5476_v21  ;;  %3007 = vmatmul.bf16.vlgmr.msra.gmra.mxu3 %v7687_v45  ;;  %v6487_v45 = vld [vmem:[%s9711_s2] sm:$0x3]  ;;  %v5508_v21 = vor.u32 %v6363_v49, %v5505_v44  ;;  %v6359_v58 = vld [vmem:[%s9710_s1 + $0xb94] sm:$0xf]  ;;  %v5428_v26 = vor.u32 %v6343_v57, %v5425_v32  ;;  %v6385_v49 = vld [vmem:[%s9712_s3 + $0x64] sm:$0xf] }
 0x167   :  { %3051 = vmatpush.bf16.msrb.mxu3 %v5540_v41  ;;  %v517_v18 = vperm.slane %v6487_v45, 1  ;;  %v6325_v45 = vld [vmem:[%s9710_s1 + $0xa84] sm:$0xf]  ;;  %v5593_v44 = vld [vmem:[%s9712_s3 + $0x68] sm:$0xf0] }
 0x168   :  { %3013 = vmatpush.bf16.msrb.mxu0 %v5340_v48  ;;  %v2787_v30 = vpop.f32.mrf.mxu2  ;;  %v2763_v48 = vpop.f32.mrf.mxu0  ;;  %v6383_v43 = vld [vmem:[%s9712_s3 + $0x54] sm:$0xf] }
 0x169   :  { %3026 = vmatpush.bf16.msrb.mxu1 %v5404_v51  ;;  %v2762_v14 = vadd.f32 %v2761_v5, %v517_v18  ;;  %v2800_v63 = vpop.f32.mrf.mxu3  ;;  %v5372_v51 = vor.u32 %v6329_v29, %v5369_v60  ;;  %v5353_v18 = vld [vmem:[%s9710_s1 + $0xa88] sm:$0xf0]  ;;  %v5599_v5 = vld [vmem:[%s9712_s3 + $0x70] sm:$0xf]  ;;  %v6379_v47 = vld [vmem:[%s9712_s3 + $0x34] sm:$0xf] }
 0x16a   :  { %3039 = vmatpush.bf16.msrb.mxu2 %v5468_v52  ;;  %v5436_v52 = vor.u32 %v6345_v37, %v5433_v62  ;;  %v5356_v13 = vor.u32 %v6325_v45, %v5353_v18  ;;  %v5567_v62 = vld [vmem:[%s9712_s3 + $0x30] sm:$0xf] }
 0x16b   :  { %3052 = vmatpush.bf16.msrb.mxu3 %v5532_v55  ;;  %v2775_v23 = vadd.f32 %v2774_v11, %v2762_v14  ;;  %v2776_v55 = vpop.f32.mrf.mxu1  ;;  %v5420_v14 = vor.u32 %v6341_v19, %v5417_v59  ;;  %v6373_v59 = vld [vmem:[%s9712_s3 + $0x4] sm:$0xf] }
 0x16c   :  { %3014 = vmatpush.bf16.msrb.mxu0 %v5332_v61  ;;  %v5489_v61 = vld [vmem:[%s9710_s1 + $0xb98] sm:$0xf0]  ;;  %v5561_v55 = vld [vmem:[%s9712_s3 + $0x28] sm:$0xf0] }
 0x16d   :  { %3027 = vmatpush.bf16.msrb.mxu1 %v5396_v38  ;;  %v2788_v41 = vadd.f32 %v2787_v30, %v2775_v23  ;;  %v6309_v38 = vld [vmem:[%s9710_s1 + $0xa04] sm:$0xf]  ;;  %v5492_v31 = vor.u32 %v6359_v58, %v5489_v61  ;;  %v5592_v23 = vor.u32 %v6386_v20, %v5591_v17 }
 0x16e   :  { %3040 = vmatpush.bf16.msrb.mxu2 %v5460_v22  ;;  %v5364_v22 = vor.u32 %v6327_v40, %v5361_v24  ;;  %v6381_v30 = vld [vmem:[%s9712_s3 + $0x44] sm:$0xf] }
 0x16f   :  { %3053 = vmatpush.bf16.msrb.mxu3 %v5524_v1  ;;  %v8993_v50 = vadd.f32 %v2800_v63, %v2788_v41  ;;  %v6380_v41 = vld [vmem:[%s9712_s3 + $0x34] sm:$0xf0]  ;;  %v6377_v40 = vld [vmem:[%s9712_s3 + $0x24] sm:$0xf] }
 0x170   :  { %3015 = vmatpush.bf16.msrb.mxu0 %v5324_v4  ;;  %v2789_v1 = vpop.f32.mrf.mxu2  ;;  %v5481_v4 = vld [vmem:[%s9710_s1 + $0xb88] sm:$0xf0]  ;;  %v5564_v61 = vor.u32 %v6377_v40, %v5561_v55  ;;  %v6398_v40 = vld [vmem:[%s9712_s3 + $0xc4] sm:$0xf0]  ;;  %v6397_v55 = vld [vmem:[%s9712_s3 + $0xc4] sm:$0xf] }
 0x171   :  { %3028 = vmatpush.bf16.msrb.mxu1 %v5388_v6  ;;  %v2802_v33 = vpop.f32.mrf.mxu3  ;;  %v6388_v6 = vld [vmem:[%s9712_s3 + $0x74] sm:$0xf0]  ;;  %v5484_v11 = vor.u32 %v6357_v3, %v5481_v4  ;;  %v5543_v1 = vld [vmem:[%s9712_s3] sm:$0xf]  ;;  %v5545_v3 = vld [vmem:[%s9712_s3 + $0x8] sm:$0xf0] }
 0x172   :  { %3041 = vmatpush.bf16.msrb.mxu2 %v5452_v9  ;;  %v5292_v9 = vor.u32 %v6309_v38, %v5289_v28  ;;  %v6376_v38 = vld [vmem:[%s9712_s3 + $0x14] sm:$0xf0]  ;;  %v5553_v28 = vld [vmem:[%s9712_s3 + $0x18] sm:$0xf0] }
 0x173   :  { %3054 = vmatpush.bf16.msrb.mxu3 %v5516_v15  ;;  %v5600_v15 = vor.u32 %v6388_v6, %v5599_v5  ;;  %v3064_v5 = vmax.f32 %v8792_v54, 0.0  ;;  %v5548_v6 = vor.u32 %v6373_v59, %v5545_v3  ;;  %v5615_v3 = vld [vmem:[%s9712_s3 + $0x90] sm:$0xf] }
 0x174   :  { %3016 = vmatpush.bf16.msrb.mxu0 %v5316_v25  ;;  %v5596_v25 = vor.u32 %v6385_v49, %v5593_v44 }
 0x175   :  { %3029 = vmatpush.bf16.msrb.mxu1 %v5380_v36  ;;  %v5583_v36 = vld [vmem:[%s9712_s3 + $0x50] sm:$0xf] }
 0x176   :  { %3042 = vmatpush.bf16.msrb.mxu2 %v5444_v42  ;;  %v6384_v42 = vld [vmem:[%s9712_s3 + $0x54] sm:$0xf0] }
 0x177   :  { %3055 = vmatpush.bf16.msrb.mxu3 %v5508_v21  ;;  %v5584_v27 = vor.u32 %v6384_v42, %v5583_v36 }
 0x178   :  { %3017 = vmatpush.bf16.msrb.mxu0 %v5308_v34  ;;  %v5569_v34 = vld [vmem:[%s9712_s3 + $0x38] sm:$0xf0] }
 0x179   :  { %3030 = vmatpush.bf16.msrb.mxu1 %v5372_v51  ;;  %v5568_v51 = vor.u32 %v6380_v41, %v5567_v62  ;;  %v5657_v62 = vld [vmem:[%s9712_s3 + $0xe8] sm:$0xf0] }
 0x17a   :  { %3043 = vmatpush.bf16.msrb.mxu2 %v5436_v52  ;;  %v5572_v52 = vor.u32 %v6379_v47, %v5569_v34  ;;  %v6400_v47 = vld [vmem:[%s9712_s3 + $0xd4] sm:$0xf0]  ;;  %v6399_v34 = vld [vmem:[%s9712_s3 + $0xd4] sm:$0xf] }
 0x17b   :  { %3056 = vmatpush.bf16.msrb.mxu3 %v5500_v56 }
 0x17c   :  { %3018 = vmatpush.bf16.msrb.mxu0 %v5300_v0  ;;  %v5551_v0 = vld [vmem:[%s9712_s3 + $0x10] sm:$0xf] }
 0x17d   :  { %3031 = vmatpush.bf16.msrb.mxu1 %v5364_v22  ;;  %v5552_v45 = vor.u32 %v6376_v38, %v5551_v0  ;;  %v5633_v38 = vld [vmem:[%s9712_s3 + $0xb8] sm:$0xf0] }
 0x17e   :  { %3044 = vmatpush.bf16.msrb.mxu2 %v5428_v26  ;;  %v6375_v26 = vld [vmem:[%s9712_s3 + $0x14] sm:$0xf] }
 0x17f   :  { %3057 = vmatpush.bf16.msrb.mxu3 %v5492_v31  ;;  %v5556_v18 = vor.u32 %v6375_v26, %v5553_v28  ;;  %v6374_v31 = vld [vmem:[%s9712_s3 + $0x4] sm:$0xf0]  ;;  %v5623_v28 = vld [vmem:[%s9712_s3 + $0xa0] sm:$0xf] }
 0x180   :  { %3019 = vmatpush.bf16.msrb.mxu0 %v5292_v9  ;;  %v2813_v60 = vpop.f32.mrf.mxu0  ;;  %v5544_v4 = vor.u32 %v6374_v31, %v5543_v1  ;;  %v3066_v9 = vpack.c.bf16 %v3064_v5, %v3064_v5 }
 0x181   :  { %3032 = vmatpush.bf16.msrb.mxu1 %v5356_v13  ;;  %v2814_v63 = vadd.f32 %v2813_v60, %v8993_v50  ;;  %v2826_v46 = vpop.f32.mrf.mxu1  ;;  %v6378_v50 = vld [vmem:[%s9712_s3 + $0x24] sm:$0xf0] }
 0x182   :  { %3045 = vmatpush.bf16.msrb.mxu2 %v5420_v14  ;;  %v5560_v57 = vor.u32 %v6378_v50, %v5559_v53 }
 0x183   :  { %3058 = vmatpush.bf16.msrb.mxu3 %v5484_v11  ;;  %3020 = vmatmul.bf16.vlgmr.msrb.gmra.mxu0 %v7873_v2  ;;  %v5585_v2 = vld [vmem:[%s9712_s3 + $0x58] sm:$0xf0]  ;;  %v2827_v48 = vadd.f32 %v2826_v46, %v2814_v63  ;;  %v5647_v46 = vld [vmem:[%s9712_s3 + $0xd0] sm:$0xf] }
 0x184   :  { %3266 = vmatpush.bf16.msra.mxu0 %v5600_v15  ;;  %3033 = vmatmul.bf16.vlgmr.msrb.gmra.mxu1 %v7886_v8  ;;  %v5588_v29 = vor.u32 %v6383_v43, %v5585_v2  ;;  %v5575_v8 = vld [vmem:[%s9712_s3 + $0x40] sm:$0xf]  ;;  %v5663_v2 = vld [vmem:[%s9712_s3 + $0xf0] sm:$0xf] }
 0x185   :  { %3046 = vmatmul.bf16.vlgmr.msrb.gmra.mxu2 %v7884_v7  ;;  %v6382_v7 = vld [vmem:[%s9712_s3 + $0x44] sm:$0xf0] }
 0x186   :  { %3292 = vmatpush.bf16.msra.mxu2 %v5604_v16  ;;  %3059 = vmatmul.bf16.vlgmr.msrb.gmra.mxu3 %v7894_v12  ;;  %v5577_v12 = vld [vmem:[%s9712_s3 + $0x48] sm:$0xf0]  ;;  %v5576_v21 = vor.u32 %v6382_v7, %v5575_v8 }
 0x187   :  { %v5580_v37 = vor.u32 %v6381_v30, %v5577_v12  ;;  %v5665_v30 = vld [vmem:[%s9712_s3 + $0xf8] sm:$0xf0]  ;;  %v5655_v12 = vld [vmem:[%s9712_s3 + $0xe0] sm:$0xf] }
 0x188   :  { %3267 = vmatpush.bf16.msra.mxu0 %v5592_v23  ;;  %v2839_v39 = vpop.f32.mrf.mxu2  ;;  %v2815_v58 = vpop.f32.mrf.mxu0 }
 0x189   :  { %v2840_v56 = vadd.f32 %v2839_v39, %v2827_v48  ;;  %v2852_v24 = vpop.f32.mrf.mxu3  ;;  %v2828_v22 = vpop.f32.mrf.mxu1  ;;  %v5639_v39 = vld [vmem:[%s9712_s3 + $0xc0] sm:$0xf]  ;;  %v6396_v58 = vld [vmem:[%s9712_s3 + $0xb4] sm:$0xf0] }
 0x18a   :  { %3293 = vmatpush.bf16.msra.mxu2 %v5596_v25 }
 0x18b   :  { %v2853_v32 = vadd.f32 %v2852_v24, %v2840_v56  ;;  %v5641_v56 = vld [vmem:[%s9712_s3 + $0xc8] sm:$0xf0]  ;;  %v5640_v24 = vor.u32 %v6398_v40, %v5639_v39  ;;  %v6418_v39 = vld [vmem:[%s9714_s5 + $0x64] sm:$0xf0] }
 0x18c   :  { %3268 = vmatpush.bf16.msra.mxu0 %v5584_v27  ;;  %v6404_v27 = vld [vmem:[%s9712_s3 + $0xf4] sm:$0xf0] }
 0x18d   :  { %v5664_v7 = vor.u32 %v6404_v27, %v5663_v2 }
 0x18e   :  { %3294 = vmatpush.bf16.msra.mxu2 %v5588_v29  ;;  %v6403_v29 = vld [vmem:[%s9712_s3 + $0xf4] sm:$0xf] }
 0x18f   :  { %v5668_v60 = vor.u32 %v6403_v29, %v5665_v30  ;;  %3279 = vmatpush.bf16.msra.mxu1 %v5664_v7 }
 0x190   :  { %3269 = vmatpush.bf16.msra.mxu0 %v5576_v21  ;;  %v2841_v19 = vpop.f32.mrf.mxu2  ;;  %v6402_v21 = vld [vmem:[%s9712_s3 + $0xe4] sm:$0xf0] }
 0x191   :  { %v2854_v33 = vpop.f32.mrf.mxu3  ;;  %v5656_v41 = vor.u32 %v6402_v21, %v5655_v12  ;;  %3305 = vmatpush.bf16.msra.mxu3 %v5668_v60  ;;  %v5625_v19 = vld [vmem:[%s9712_s3 + $0xa8] sm:$0xf0] }
 0x192   :  { %3295 = vmatpush.bf16.msra.mxu2 %v5580_v37  ;;  %v6401_v37 = vld [vmem:[%s9712_s3 + $0xe4] sm:$0xf]  ;;  %v6392_v33 = vld [vmem:[%s9712_s3 + $0x94] sm:$0xf0] }
 0x193   :  { %v5660_v63 = vor.u32 %v6401_v37, %v5657_v62  ;;  %3280 = vmatpush.bf16.msra.mxu1 %v5656_v41  ;;  %v5616_v5 = vor.u32 %v6392_v33, %v5615_v3  ;;  %v6433_v33 = vld [vmem:[%s9714_s5 + $0xe4] sm:$0xf] }
 0x194   :  { %3270 = vmatpush.bf16.msra.mxu0 %v5568_v51  ;;  %v5648_v51 = vor.u32 %v6400_v47, %v5647_v46 }
 0x195   :  { %3306 = vmatpush.bf16.msra.mxu3 %v5660_v63 }
 0x196   :  { %3296 = vmatpush.bf16.msra.mxu2 %v5572_v52  ;;  %v5649_v52 = vld [vmem:[%s9712_s3 + $0xd8] sm:$0xf0] }
 0x197   :  { %v5652_v50 = vor.u32 %v6399_v34, %v5649_v52  ;;  %3281 = vmatpush.bf16.msra.mxu1 %v5648_v51 }
 0x198   :  { %3271 = vmatpush.bf16.msra.mxu0 %v5560_v57  ;;  %v5644_v57 = vor.u32 %v6397_v55, %v5641_v56  ;;  %v6417_v56 = vld [vmem:[%s9714_s5 + $0x64] sm:$0xf] }
 0x199   :  { %3307 = vmatpush.bf16.msra.mxu3 %v5652_v50  ;;  %v5719_v50 = vld [vmem:[%s9714_s5 + $0x60] sm:$0xf] }
 0x19a   :  { %3297 = vmatpush.bf16.msra.mxu2 %v5564_v61  ;;  %v6395_v61 = vld [vmem:[%s9712_s3 + $0xb4] sm:$0xf] }
 0x19b   :  { %3282 = vmatpush.bf16.msra.mxu1 %v5640_v24  ;;  %v5636_v22 = vor.u32 %v6395_v61, %v5633_v38  ;;  %v5721_v24 = vld [vmem:[%s9714_s5 + $0x68] sm:$0xf0]  ;;  %v6436_v61 = vld [vmem:[%s9714_s5 + $0xf4] sm:$0xf0]  ;;  %v5793_v38 = vld [vmem:[%s9714_s5 + $0xf8] sm:$0xf0] }
 0x19c   :  { %3272 = vmatpush.bf16.msra.mxu0 %v5552_v45  ;;  %v6394_v45 = vld [vmem:[%s9712_s3 + $0xa4] sm:$0xf0] }
 0x19d   :  { %3308 = vmatpush.bf16.msra.mxu3 %v5644_v57  ;;  %v5624_v31 = vor.u32 %v6394_v45, %v5623_v28  ;;  %v5791_v57 = vld [vmem:[%s9714_s5 + $0xf0] sm:$0xf] }
 0x19e   :  { %3298 = vmatpush.bf16.msra.mxu2 %v5556_v18  ;;  %v6393_v18 = vld [vmem:[%s9712_s3 + $0xa4] sm:$0xf]  ;;  %v5711_v45 = vld [vmem:[%s9714_s5 + $0x50] sm:$0xf] }
 0x19f   :  { %v5628_v59 = vor.u32 %v6393_v18, %v5625_v19  ;;  %v6416_v18 = vld [vmem:[%s9714_s5 + $0x54] sm:$0xf0]  ;;  %v5783_v19 = vld [vmem:[%s9714_s5 + $0xe0] sm:$0xf] }
 0x1a0   :  { %3273 = vmatpush.bf16.msra.mxu0 %v5544_v4  ;;  %v2865_v35 = vpop.f32.mrf.mxu0  ;;  %v6391_v4 = vld [vmem:[%s9712_s3 + $0x94] sm:$0xf] }
 0x1a1   :  { %v2866_v10 = vadd.f32 %v2865_v35, %v2853_v32  ;;  %v2878_v13 = vpop.f32.mrf.mxu1  ;;  %v5631_v32 = vld [vmem:[%s9712_s3 + $0xb0] sm:$0xf]  ;;  %3309 = vmatpush.bf16.msra.mxu3 %v5636_v22  ;;  %v5724_v22 = vor.u32 %v6417_v56, %v5721_v24  ;;  %v6408_v56 = vld [vmem:[%s9714_s5 + $0x14] sm:$0xf0]  ;;  %v6407_v24 = vld [vmem:[%s9714_s5 + $0x14] sm:$0xf] }
 0x1a2   :  { %3299 = vmatpush.bf16.msra.mxu2 %v5548_v6  ;;  %v5632_v0 = vor.u32 %v6396_v58, %v5631_v32  ;;  %v5617_v6 = vld [vmem:[%s9712_s3 + $0x98] sm:$0xf0]  ;;  %v5720_v58 = vor.u32 %v6418_v39, %v5719_v50 }
 0x1a3   :  { %3274 = vmatmul.bf16.vlgmr.msra.gmra.mxu0 %v3066_v9  ;;  %v2879_v14 = vadd.f32 %v2878_v13, %v2866_v10 }
 0x1a4   :  { %3283 = vmatpush.bf16.msra.mxu1 %v5632_v0  ;;  %v6435_v0 = vld [vmem:[%s9714_s5 + $0xf4] sm:$0xf] }
 0x1a5   :  { %3300 = vmatmul.bf16.vlgmr.msra.gmra.mxu2 %v3066_v9  ;;  %3310 = vmatpush.bf16.msra.mxu3 %v5628_v59  ;;  %v5620_v9 = vor.u32 %v6391_v4, %v5617_v6  ;;  %v5796_v28 = vor.u32 %v6435_v0, %v5793_v38  ;;  %v6434_v59 = vld [vmem:[%s9714_s5 + $0xe4] sm:$0xf0]  ;;  %v5785_v4 = vld [vmem:[%s9714_s5 + $0xe8] sm:$0xf0]  ;;  %v5703_v6 = vld [vmem:[%s9714_s5 + $0x40] sm:$0xf] }
 0x1a6   :  { %v5784_v3 = vor.u32 %v6434_v59, %v5783_v19  ;;  %v6426_v0 = vld [vmem:[%s9714_s5 + $0xa4] sm:$0xf0]  ;;  %v6425_v38 = vld [vmem:[%s9714_s5 + $0xa4] sm:$0xf]  ;;  %v5673_v19 = vld [vmem:[%s9714_s5 + $0x8] sm:$0xf0] }
 0x1a8   :  { %v2891_v11 = vpop.f32.mrf.mxu2  ;;  %v2867_v17 = vpop.f32.mrf.mxu0  ;;  %3284 = vmatpush.bf16.msra.mxu1 %v5624_v31  ;;  %v5713_v31 = vld [vmem:[%s9714_s5 + $0x58] sm:$0xf0] }
 0x1a9   :  { %v2892_v15 = vadd.f32 %v2891_v11, %v2879_v14  ;;  %v2904_v16 = vpop.f32.mrf.mxu3  ;;  %v2880_v20 = vpop.f32.mrf.mxu1  ;;  %3311 = vmatpush.bf16.msra.mxu3 %v5620_v9  ;;  %v5607_v11 = vld [vmem:[%s9712_s3 + $0x80] sm:$0xf]  ;;  %v6414_v9 = vld [vmem:[%s9714_s5 + $0x44] sm:$0xf0] }
 0x1ab   :  { %v9145_v49 = vadd.f32 %v2904_v16, %v2892_v15  ;;  %v6390_v15 = vld [vmem:[%s9712_s3 + $0x84] sm:$0xf0]  ;;  %v6389_v16 = vld [vmem:[%s9712_s3 + $0x84] sm:$0xf] }
 0x1ac   :  { %3285 = vmatpush.bf16.msra.mxu1 %v5616_v5  ;;  %v5608_v20 = vor.u32 %v6390_v15, %v5607_v11  ;;  %v5788_v5 = vor.u32 %v6433_v33, %v5785_v4  ;;  %v6431_v11 = vld [vmem:[%s9714_s5 + $0xd4] sm:$0xf]  ;;  %v6413_v15 = vld [vmem:[%s9714_s5 + $0x44] sm:$0xf]  ;;  %v6424_v33 = vld [vmem:[%s9714_s5 + $0x94] sm:$0xf0] }
 0x1ad   :  { %v6423_v4 = vld [vmem:[%s9714_s5 + $0x94] sm:$0xf] }
 0x1b0   :  { %v2893_v44 = vpop.f32.mrf.mxu2  ;;  %3286 = vmatpush.bf16.msra.mxu1 %v5608_v20 }
 0x1b1   :  { %v2906_v54 = vpop.f32.mrf.mxu3 }
 0x1c0   :  { %v9147_v23 = vpop.f32.mrf.mxu0 }
 0x1c1   :  { %v9149_v25 = vpop.f32.mrf.mxu1  ;;  %v2918_v35 = vadd.f32 %v9147_v23, %v9145_v49  ;;  %v5609_v49 = vld [vmem:[%s9712_s3 + $0x88] sm:$0xf0] }
 0x1c2   :  { %v5612_v44 = vor.u32 %v6389_v16, %v5609_v49  ;;  %v5705_v16 = vld [vmem:[%s9714_s5 + $0x48] sm:$0xf0] }
 0x1c3   :  { %v2931_v54 = vadd.f32 %v9149_v25, %v2918_v35  ;;  %v5712_v35 = vor.u32 %v6416_v18, %v5711_v45  ;;  %v5671_v45 = vld [vmem:[%s9714_s5] sm:$0xf]  ;;  %v6406_v18 = vld [vmem:[%s9714_s5 + $0x4] sm:$0xf0] }
 0x1c4   :  { %3312 = vmatpush.bf16.msra.mxu3 %v5612_v44  ;;  %v5767_v44 = vld [vmem:[%s9714_s5 + $0xc0] sm:$0xf] }
 0x1c8   :  { %v9151_v36 = vpop.f32.mrf.mxu2  ;;  %v2919_v43 = vpop.f32.mrf.mxu0  ;;  %3559 = vmatpush.bf16.msrb.mxu3 %v5796_v28 }
 0x1c9   :  { %v9153_v42 = vpop.f32.mrf.mxu3  ;;  %v2932_v8 = vpop.f32.mrf.mxu1  ;;  %v2944_v23 = vadd.f32 %v9151_v36, %v2931_v54  ;;  %v5727_v36 = vld [vmem:[%s9714_s5 + $0x70] sm:$0xf]  ;;  %v6430_v54 = vld [vmem:[%s9714_s5 + $0xc4] sm:$0xf0] }
 0x1cb   :  { %v2957_v27 = vadd.f32 %v9153_v42, %v2944_v23  ;;  %v6420_v42 = vld [vmem:[%s9714_s5 + $0x74] sm:$0xf0]  ;;  %v6429_v23 = vld [vmem:[%s9714_s5 + $0xc4] sm:$0xf] }
 0x1cc   :  { %v5728_v52 = vor.u32 %v6420_v42, %v5727_v36  ;;  %3560 = vmatpush.bf16.msrb.mxu3 %v5788_v5  ;;  %v6409_v36 = vld [vmem:[%s9714_s5 + $0x24] sm:$0xf]  ;;  %v5689_v42 = vld [vmem:[%s9714_s5 + $0x28] sm:$0xf0] }
 0x1ce   :  { %3520 = vmatpush.bf16.msrb.mxu0 %v5728_v52 }
 0x1d0   :  { %v2945_v48 = vpop.f32.mrf.mxu2 }
 0x1d1   :  { %v2958_v53 = vpop.f32.mrf.mxu3  ;;  %v6419_v48 = vld [vmem:[%s9714_s5 + $0x74] sm:$0xf] }
 0x1d2   :  { %v5729_v53 = vld [vmem:[%s9714_s5 + $0x78] sm:$0xf0]  ;;  %3521 = vmatpush.bf16.msrb.mxu0 %v5720_v58 }
 0x1d3   :  { %v5732_v55 = vor.u32 %v6419_v48, %v5729_v53  ;;  %v5692_v53 = vor.u32 %v6409_v36, %v5689_v42  ;;  %v6465_v42 = vld [vmem:[%s9716_s7 + $0xe4] sm:$0xf] }
 0x1d5   :  { %3546 = vmatpush.bf16.msrb.mxu2 %v5732_v55  ;;  %v5679_v55 = vld [vmem:[%s9714_s5 + $0x10] sm:$0xf] }
 0x1d6   :  { %3522 = vmatpush.bf16.msrb.mxu0 %v5712_v35  ;;  %v5735_v35 = vld [vmem:[%s9714_s5 + $0x80] sm:$0xf] }
 0x1d9   :  { %3547 = vmatpush.bf16.msrb.mxu2 %v5724_v22 }
 0x1e0   :  { %v2969_v26 = vpop.f32.mrf.mxu0 }
 0x1e1   :  { %v2982_v1 = vpop.f32.mrf.mxu1  ;;  %v2970_v29 = vadd.f32 %v2969_v26, %v2957_v27  ;;  %v5792_v26 = vor.u32 %v6436_v61, %v5791_v57  ;;  %v5708_v27 = vor.u32 %v6413_v15, %v5705_v16  ;;  %v5680_v57 = vor.u32 %v6408_v56, %v5679_v55  ;;  %v5751_v61 = vld [vmem:[%s9714_s5 + $0xa0] sm:$0xf]  ;;  %v5855_v16 = vld [vmem:[%s9716_s7 + $0x70] sm:$0xf]  ;;  %v6464_v56 = vld [vmem:[%s9716_s7 + $0xd4] sm:$0xf0] }
 0x1e2   :  { %v5752_v22 = vor.u32 %v6426_v0, %v5751_v61  ;;  %v5903_v55 = vld [vmem:[%s9716_s7 + $0xd0] sm:$0xf]  ;;  %v3100_v61 = vld [vmem:[%s9713_s4] sm:$0x3]  ;;  %s3994_s4 = sshll.u32 %s6514_s27, 4  ;;  %s3995_s4 = int_to_ptr.vmem [resolvable:$true] %s3994_s4 }
 0x1e3   :  { %v2983_v8 = vadd.f32 %v2982_v1, %v2970_v29  ;;  %v6415_v1 = vld [vmem:[%s9714_s5 + $0x54] sm:$0xf]  ;;  %3533 = vmatpush.bf16.msrb.mxu1 %v5792_v26  ;;  %v5695_v29 = vld [vmem:[%s9714_s5 + $0x30] sm:$0xf]  ;;  %v5753_v26 = vld [vmem:[%s9714_s5 + $0xa8] sm:$0xf0]  ;;  %v5904_v0 = vor.u32 %v6464_v56, %v5903_v55 }
 0x1e4   :  { %v5756_v28 = vor.u32 %v6425_v38, %v5753_v26  ;;  %v5801_v56 = vld [vmem:[%s9716_s7 + $0x8] sm:$0xf0] }
 0x1e7   :  { %3534 = vmatpush.bf16.msrb.mxu1 %v5784_v3  ;;  %v5743_v3 = vld [vmem:[%s9714_s5 + $0x90] sm:$0xf] }
 0x1e8   :  { %v2995_v10 = vpop.f32.mrf.mxu2  ;;  %v2971_v14 = vpop.f32.mrf.mxu0  ;;  %v5744_v5 = vor.u32 %v6424_v33, %v5743_v3 }
 0x1e9   :  { %v3008_v13 = vpop.f32.mrf.mxu3  ;;  %v2984_v17 = vpop.f32.mrf.mxu1  ;;  %v2996_v7 = vadd.f32 %v2995_v10, %v2983_v8  ;;  %v5716_v10 = vor.u32 %v6415_v1, %v5713_v31  ;;  %v6432_v14 = vld [vmem:[%s9714_s5 + $0xd4] sm:$0xf0]  ;;  %v6405_v1 = vld [vmem:[%s9714_s5 + $0x4] sm:$0xf]  ;;  %v5672_v31 = vor.u32 %v6406_v18, %v5671_v45  ;;  %v3102_v18 = vperm.slane %v3100_v61, 0 }
 0x1ea   :  { %v5777_v17 = vld [vmem:[%s9714_s5 + $0xd8] sm:$0xf0]  ;;  %v6412_v8 = vld [vmem:[%s9714_s5 + $0x34] sm:$0xf0]  ;;  %v5676_v59 = vor.u32 %v6405_v1, %v5673_v19  ;;  %v6443_v1 = vld [vmem:[%s9716_s7 + $0x34] sm:$0xf] }
 0x1eb   :  { %v3009_v30 = vadd.f32 %v3008_v13, %v2996_v7  ;;  %v5775_v13 = vld [vmem:[%s9714_s5 + $0xd0] sm:$0xf]  ;;  %v5780_v49 = vor.u32 %v6431_v11, %v5777_v17  ;;  %3548 = vmatpush.bf16.msrb.mxu2 %v5716_v10  ;;  %v6411_v7 = vld [vmem:[%s9714_s5 + $0x34] sm:$0xf]  ;;  %v6422_v10 = vld [vmem:[%s9714_s5 + $0x84] sm:$0xf0] }
 0x1ec   :  { %v5776_v20 = vor.u32 %v6432_v14, %v5775_v13  ;;  %v6421_v13 = vld [vmem:[%s9714_s5 + $0x84] sm:$0xf]  ;;  %v5736_v14 = vor.u32 %v6422_v10, %v5735_v35  ;;  %v5737_v11 = vld [vmem:[%s9714_s5 + $0x88] sm:$0xf0]  ;;  %v6452_v17 = vld [vmem:[%s9716_s7 + $0x74] sm:$0xf0] }
 0x1ed   :  { %3561 = vmatpush.bf16.msrb.mxu3 %v5780_v49  ;;  %v5740_v15 = vor.u32 %v6421_v13, %v5737_v11  ;;  %v5856_v49 = vor.u32 %v6452_v17, %v5855_v16  ;;  %v6444_v45 = vld [vmem:[%s9716_s7 + $0x34] sm:$0xf0]  ;;  %v6462_v17 = vld [vmem:[%s9716_s7 + $0xc4] sm:$0xf0] }
 0x1ee   :  { %3535 = vmatpush.bf16.msrb.mxu1 %v5776_v20  ;;  %v6451_v20 = vld [vmem:[%s9716_s7 + $0x74] sm:$0xf] }
 0x1ef   :  { %3549 = vmatpush.bf16.msrb.mxu2 %v5708_v27  ;;  %v5849_v27 = vld [vmem:[%s9716_s7 + $0x68] sm:$0xf0] }
 0x1f0   :  { %v2997_v43 = vpop.f32.mrf.mxu2 }
 0x1f1   :  { %v3010_v2 = vpop.f32.mrf.mxu3  ;;  %v5769_v43 = vld [vmem:[%s9714_s5 + $0xc8] sm:$0xf0] }
 0x1f2   :  { %v5704_v2 = vor.u32 %v6414_v9, %v5703_v6  ;;  %v5745_v6 = vld [vmem:[%s9714_s5 + $0x98] sm:$0xf0] }
 0x1f3   :  { %v5748_v9 = vor.u32 %v6423_v4, %v5745_v6  ;;  %v3103_v4 = vperm.slane %v3100_v61, 1 }
 0x1f4   :  { %3523 = vmatpush.bf16.msrb.mxu0 %v5704_v2  ;;  %v6449_v2 = vld [vmem:[%s9716_s7 + $0x64] sm:$0xf] }
 0x200   :  { %v3021_v12 = vpop.f32.mrf.mxu0 }
 0x201   :  { %v3034_v21 = vpop.f32.mrf.mxu1  ;;  %v3022_v60 = vadd.f32 %v3021_v12, %v3009_v30  ;;  %v5697_v30 = vld [vmem:[%s9714_s5 + $0x38] sm:$0xf0]  ;;  %v5768_v12 = vor.u32 %v6430_v54, %v5767_v44  ;;  %v5847_v54 = vld [vmem:[%s9716_s7 + $0x60] sm:$0xf] }
 0x202   :  { %v5857_v44 = vld [vmem:[%s9716_s7 + $0x78] sm:$0xf0] }
 0x203   :  { %v3035_v37 = vadd.f32 %v3034_v21, %v3022_v60  ;;  %v5772_v21 = vor.u32 %v6429_v23, %v5769_v43  ;;  %v5759_v60 = vld [vmem:[%s9714_s5 + $0xb0] sm:$0xf]  ;;  %3536 = vmatpush.bf16.msrb.mxu1 %v5768_v12  ;;  %v6450_v23 = vld [vmem:[%s9716_s7 + $0x64] sm:$0xf0]  ;;  %v5860_v43 = vor.u32 %v6451_v20, %v5857_v44  ;;  %v5921_v12 = vld [vmem:[%s9716_s7 + $0xf8] sm:$0xf0] }
 0x205   :  { %3562 = vmatpush.bf16.msrb.mxu3 %v5772_v21  ;;  %v5852_v21 = vor.u32 %v6449_v2, %v5849_v27  ;;  %v5817_v27 = vld [vmem:[%s9716_s7 + $0x28] sm:$0xf0] }
 0x208   :  { %v3047_v62 = vpop.f32.mrf.mxu2  ;;  %v3023_v25 = vpop.f32.mrf.mxu0 }
 0x209   :  { %v3048_v41 = vadd.f32 %v3047_v62, %v3035_v37  ;;  %v3060_v63 = vpop.f32.mrf.mxu3  ;;  %v3036_v46 = vpop.f32.mrf.mxu1  ;;  %v6428_v37 = vld [vmem:[%s9714_s5 + $0xb4] sm:$0xf0]  ;;  %v6427_v62 = vld [vmem:[%s9714_s5 + $0xb4] sm:$0xf]  ;;  %v5700_v25 = vor.u32 %v6411_v7, %v5697_v30 }
 0x20a   :  { %v5687_v46 = vld [vmem:[%s9714_s5 + $0x20] sm:$0xf]  ;;  %v5760_v48 = vor.u32 %v6428_v37, %v5759_v60  ;;  %v6468_v7 = vld [vmem:[%s9716_s7 + $0xf4] sm:$0xf0]  ;;  %v6467_v30 = vld [vmem:[%s9716_s7 + $0xf4] sm:$0xf] }
 0x20b   :  { %v3061_v47 = vadd.f32 %v3060_v63, %v3048_v41  ;;  %v5761_v41 = vld [vmem:[%s9714_s5 + $0xb8] sm:$0xf0]  ;;  %v5696_v63 = vor.u32 %v6412_v8, %v5695_v29  ;;  %3550 = vmatpush.bf16.msrb.mxu2 %v5700_v25  ;;  %v5919_v29 = vld [vmem:[%s9716_s7 + $0xf0] sm:$0xf]  ;;  %v5848_v8 = vor.u32 %v6450_v23, %v5847_v54  ;;  %v5924_v37 = vor.u32 %v6467_v30, %v5921_v12  ;;  %v5815_v54 = vld [vmem:[%s9716_s7 + $0x20] sm:$0xf] }
 0x20c   :  { %3537 = vmatpush.bf16.msrb.mxu1 %v5760_v48  ;;  %v5920_v60 = vor.u32 %v6468_v7, %v5919_v29  ;;  %v5841_v25 = vld [vmem:[%s9716_s7 + $0x58] sm:$0xf0]  ;;  %v5913_v48 = vld [vmem:[%s9716_s7 + $0xe8] sm:$0xf0]  ;;  %v6442_v23 = vld [vmem:[%s9716_s7 + $0x24] sm:$0xf0] }
 0x20d   :  { %v3065_v34 = vmax.f32 %v3061_v47, 0.0  ;;  %3524 = vmatpush.bf16.msrb.mxu0 %v5696_v63  ;;  %v6447_v63 = vld [vmem:[%s9716_s7 + $0x54] sm:$0xf]  ;;  %v5816_v2 = vor.u32 %v6442_v23, %v5815_v54  ;;  %v5887_v29 = vld [vmem:[%s9716_s7 + $0xb0] sm:$0xf] }
 0x20e   :  { %v6459_v12 = vld [vmem:[%s9716_s7 + $0xb4] sm:$0xf] }
 0x20f   :  { %v3067_v51 = vpack.c.bf16 %v3065_v34, %v3065_v34  ;;  %v6410_v34 = vld [vmem:[%s9714_s5 + $0x24] sm:$0xf0]  ;;  %3551 = vmatpush.bf16.msrb.mxu2 %v5692_v53  ;;  %v5831_v53 = vld [vmem:[%s9716_s7 + $0x40] sm:$0xf] }
 0x210   :  { %v3049_v40 = vpop.f32.mrf.mxu2  ;;  %v5688_v52 = vor.u32 %v6410_v34, %v5687_v46  ;;  %3538 = vmatpush.bf16.msrb.mxu1 %v5752_v22  ;;  %v5911_v46 = vld [vmem:[%s9716_s7 + $0xe0] sm:$0xf]  ;;  %v6466_v34 = vld [vmem:[%s9716_s7 + $0xe4] sm:$0xf0] }
 0x211   :  { %v3062_v32 = vpop.f32.mrf.mxu3  ;;  %3287 = vmatmul.bf16.vlgmr.msra.gmra.mxu1 %v3067_v51  ;;  %3313 = vmatmul.bf16.vlgmr.msra.gmra.mxu3 %v3067_v51  ;;  %v5764_v51 = vor.u32 %v6427_v62, %v5761_v41  ;;  %v5839_v62 = vld [vmem:[%s9716_s7 + $0x50] sm:$0xf]  ;;  %v6448_v41 = vld [vmem:[%s9716_s7 + $0x54] sm:$0xf0]  ;;  %v5912_v36 = vor.u32 %v6466_v34, %v5911_v46  ;;  %v5879_v34 = vld [vmem:[%s9716_s7 + $0xa0] sm:$0xf] }
 0x212   :  { %3525 = vmatpush.bf16.msrb.mxu0 %v5688_v52  ;;  %v5681_v32 = vld [vmem:[%s9714_s5 + $0x18] sm:$0xf0]  ;;  %v5916_v52 = vor.u32 %v6465_v42, %v5913_v48  ;;  %v6457_v48 = vld [vmem:[%s9716_s7 + $0xa4] sm:$0xf] }
 0x213   :  { %3563 = vmatpush.bf16.msrb.mxu3 %v5764_v51  ;;  %v5684_v58 = vor.u32 %v6407_v24, %v5681_v32  ;;  %v5840_v51 = vor.u32 %v6448_v41, %v5839_v62  ;;  %v6463_v24 = vld [vmem:[%s9716_s7 + $0xd4] sm:$0xf]  ;;  %v5833_v32 = vld [vmem:[%s9716_s7 + $0x48] sm:$0xf0]  ;;  %v6440_v62 = vld [vmem:[%s9716_s7 + $0x14] sm:$0xf0] }
 0x214   :  { %3539 = vmatpush.bf16.msrb.mxu1 %v5744_v5  ;;  %v6439_v41 = vld [vmem:[%s9716_s7 + $0x14] sm:$0xf] }
 0x215   :  { %3552 = vmatpush.bf16.msrb.mxu2 %v5684_v58  ;;  %v5905_v58 = vld [vmem:[%s9716_s7 + $0xd8] sm:$0xf0] }
 0x216   :  { %3526 = vmatpush.bf16.msrb.mxu0 %v5680_v57  ;;  %v6445_v57 = vld [vmem:[%s9716_s7 + $0x44] sm:$0xf]  ;;  %v5908_v38 = vor.u32 %v6463_v24, %v5905_v58  ;;  %v6455_v58 = vld [vmem:[%s9716_s7 + $0x94] sm:$0xf] }
 0x217   :  { %3564 = vmatpush.bf16.msrb.mxu3 %v5756_v28  ;;  %v5836_v26 = vor.u32 %v6445_v57, %v5833_v32  ;;  %v5823_v28 = vld [vmem:[%s9716_s7 + $0x30] sm:$0xf]  ;;  %v6456_v32 = vld [vmem:[%s9716_s7 + $0x94] sm:$0xf0] }
 0x218   :  { %3540 = vmatpush.bf16.msrb.mxu1 %v5736_v14  ;;  %v5824_v19 = vor.u32 %v6444_v45, %v5823_v28  ;;  %v5871_v57 = vld [vmem:[%s9716_s7 + $0x90] sm:$0xf]  ;;  %v6453_v28 = vld [vmem:[%s9716_s7 + $0x84] sm:$0xf] }
 0x219   :  { %3553 = vmatpush.bf16.msrb.mxu2 %v5676_v59  ;;  %v5872_v61 = vor.u32 %v6456_v32, %v5871_v57 }
 0x21a   :  { %3527 = vmatpush.bf16.msrb.mxu0 %v5672_v31  ;;  %v5825_v31 = vld [vmem:[%s9716_s7 + $0x38] sm:$0xf0] }
 0x21b   :  { %3565 = vmatpush.bf16.msrb.mxu3 %v5748_v9  ;;  %v5828_v59 = vor.u32 %v6443_v1, %v5825_v31  ;;  %v6476_v31 = vld [vmem:[%s9718_s9 + $0x38] sm:$0xff] }
 0x21c   :  { %3787 = vmatpush.bf16.msra.mxu1 %v5920_v60 }
 0x21d   :  { %3800 = vmatpush.bf16.msra.mxu2 %v5860_v43  ;;  %v6441_v43 = vld [vmem:[%s9716_s7 + $0x24] sm:$0xf] }
 0x21e   :  { %3774 = vmatpush.bf16.msra.mxu0 %v5856_v49  ;;  %v5897_v49 = vld [vmem:[%s9716_s7 + $0xc8] sm:$0xf0]  ;;  %v5820_v7 = vor.u32 %v6441_v43, %v5817_v27 }
 0x21f   :  { %3566 = vmatpush.bf16.msrb.mxu3 %v5740_v15 }
 0x220   :  { %v9379_v47 = vpop.f32.mrf.mxu0  ;;  %3788 = vmatpush.bf16.msra.mxu1 %v5912_v36  ;;  %v6458_v36 = vld [vmem:[%s9716_s7 + $0xa4] sm:$0xf0] }
 0x221   :  { %3801 = vmatpush.bf16.msra.mxu2 %v5852_v21  ;;  %v3276_v3 = vadd.f32 %v9379_v47, %v3102_v18  ;;  %v5895_v47 = vld [vmem:[%s9716_s7 + $0xc0] sm:$0xf]  ;;  %v5889_v21 = vld [vmem:[%s9716_s7 + $0xb8] sm:$0xf0]  ;;  %v5880_v42 = vor.u32 %v6458_v36, %v5879_v34  ;;  %v5865_v18 = vld [vmem:[%s9716_s7 + $0x88] sm:$0xf0] }
 0x222   :  { %3775 = vmatpush.bf16.msra.mxu0 %v5848_v8  ;;  %v5896_v20 = vor.u32 %v6462_v17, %v5895_v47  ;;  %v6460_v8 = vld [vmem:[%s9716_s7 + $0xb4] sm:$0xf0]  ;;  %v5892_v60 = vor.u32 %v6459_v12, %v5889_v21  ;;  %v5868_v1 = vor.u32 %v6453_v28, %v5865_v18  ;;  %v6479_v12 = vld [vmem:[%s9718_s9 + $0x50] sm:$0xff]  ;;  %v6469_v21 = vld [vmem:[%s9718_s9] sm:$0xff] }
 0x223   :  { %3813 = vmatpush.bf16.msra.mxu3 %v5924_v37  ;;  %v5888_v30 = vor.u32 %v6460_v8, %v5887_v29  ;;  %v5807_v37 = vld [vmem:[%s9716_s7 + $0x10] sm:$0xf]  ;;  %v6481_v29 = vld [vmem:[%s9718_s9 + $0x60] sm:$0xff] }
 0x224   :  { %3789 = vmatpush.bf16.msra.mxu1 %v5904_v0  ;;  %v5873_v0 = vld [vmem:[%s9716_s7 + $0x98] sm:$0xf0]  ;;  %v6471_v8 = vld [vmem:[%s9718_s9 + $0x10] sm:$0xff] }
 0x226   :  { %3776 = vmatpush.bf16.msra.mxu0 %v5840_v51  ;;  %v5881_v51 = vld [vmem:[%s9716_s7 + $0xa8] sm:$0xf0] }
 0x227   :  { %3814 = vmatpush.bf16.msra.mxu3 %v5916_v52  ;;  %v5884_v52 = vor.u32 %v6457_v48, %v5881_v51 }
 0x228   :  { %v9390_v50 = vpop.f32.mrf.mxu2  ;;  %v3277_v39 = vpop.f32.mrf.mxu0  ;;  %3790 = vmatpush.bf16.msra.mxu1 %v5896_v20 }
 0x229   :  { %v6446_v39 = vld [vmem:[%s9716_s7 + $0x44] sm:$0xf0]  ;;  %v3302_v9 = vadd.f32 %v9390_v50, %v3103_v4  ;;  %v6461_v50 = vld [vmem:[%s9716_s7 + $0xc4] sm:$0xf] }
 0x22a   :  { %v5832_v22 = vor.u32 %v6446_v39, %v5831_v53  ;;  %v5900_v44 = vor.u32 %v6461_v50, %v5897_v49  ;;  %v5799_v53 = vld [vmem:[%s9716_s7] sm:$0xf]  ;;  %v6438_v39 = vld [vmem:[%s9716_s7 + $0x4] sm:$0xf0] }
 0x22b   :  { %3815 = vmatpush.bf16.msra.mxu3 %v5908_v38  ;;  %v5800_v55 = vor.u32 %v6438_v39, %v5799_v53  ;;  %v5876_v38 = vor.u32 %v6455_v58, %v5873_v0  ;;  %v6482_v4 = vld [vmem:[%s9718_s9 + $0x68] sm:$0xff] }
 0x22c   :  { %3777 = vmatpush.bf16.msra.mxu0 %v5832_v22  ;;  %3791 = vmatpush.bf16.msra.mxu1 %v5888_v30  ;;  %v5863_v22 = vld [vmem:[%s9716_s7 + $0x80] sm:$0xf]  ;;  %v6470_v30 = vld [vmem:[%s9718_s9 + $0x8] sm:$0xff] }
 0x22f   :  { %3816 = vmatpush.bf16.msra.mxu3 %v5900_v44 }
 0x230   :  { %v3303_v40 = vpop.f32.mrf.mxu2  ;;  %3778 = vmatpush.bf16.msra.mxu0 %v5824_v19  ;;  %3792 = vmatpush.bf16.msra.mxu1 %v5880_v42  ;;  %v6484_v19 = vld [vmem:[%s9718_s9 + $0x78] sm:$0xff] }
 0x231   :  { %v5844_v40 = vor.u32 %v6447_v63, %v5841_v25  ;;  %v5808_v63 = vor.u32 %v6440_v62, %v5807_v37  ;;  %v5809_v25 = vld [vmem:[%s9716_s7 + $0x18] sm:$0xf0]  ;;  %v6477_v37 = vld [vmem:[%s9718_s9 + $0x40] sm:$0xff] }
 0x232   :  { %v5812_v46 = vor.u32 %v6439_v41, %v5809_v25  ;;  %v3608_v62 = vld [vmem:[%s9717_s8] sm:$0x3] }
 0x233   :  { %3802 = vmatpush.bf16.msra.mxu2 %v5844_v40  ;;  %3817 = vmatpush.bf16.msra.mxu3 %v5892_v60  ;;  %v6437_v40 = vld [vmem:[%s9716_s7 + $0x4] sm:$0xf]  ;;  %v6478_v60 = vld [vmem:[%s9718_s9 + $0x48] sm:$0xff]  ;;  %v3611_v42 = vperm.slane %v3608_v62, 1 }
 0x234   :  { %3779 = vmatpush.bf16.msra.mxu0 %v5816_v2  ;;  %v5804_v24 = vor.u32 %v6437_v40, %v5801_v56  ;;  %3793 = vmatpush.bf16.msra.mxu1 %v5872_v61  ;;  %v6486_v61 = vld [vmem:[%s9719_s10] ss:$0 sm:$0xff] }
 0x237   :  { %3803 = vmatpush.bf16.msra.mxu2 %v5836_v26  ;;  %3818 = vmatpush.bf16.msra.mxu3 %v5884_v52  ;;  %v6454_v26 = vld [vmem:[%s9716_s7 + $0x84] sm:$0xf0] }
 0x238   :  { %3780 = vmatpush.bf16.msra.mxu0 %v5808_v63  ;;  %v5864_v45 = vor.u32 %v6454_v26, %v5863_v22  ;;  %v3610_v63 = vperm.slane %v3608_v62, 0 }
 0x23a   :  { %3794 = vmatpush.bf16.msra.mxu1 %v5864_v45 }
 0x23b   :  { %3804 = vmatpush.bf16.msra.mxu2 %v5828_v59  ;;  %3819 = vmatpush.bf16.msra.mxu3 %v5876_v38  ;;  %v6475_v59 = vld [vmem:[%s9718_s9 + $0x30] sm:$0xff] }
 0x23c   :  { %3781 = vmatpush.bf16.msra.mxu0 %v5800_v55 }
 0x23f   :  { %3805 = vmatpush.bf16.msra.mxu2 %v5820_v7  ;;  %3820 = vmatpush.bf16.msra.mxu3 %v5868_v1  ;;  %v6480_v7 = vld [vmem:[%s9718_s9 + $0x58] sm:$0xff] }
 0x243   :  { %3806 = vmatpush.bf16.msra.mxu2 %v5812_v46 }
 0x247   :  { %3807 = vmatpush.bf16.msra.mxu2 %v5804_v24 }
 0x28e   :  { %v3288_v33 = vpop.f32.mrf.mxu1 }
 0x28f   :  { %v3289_v5 = vadd.f32 %v3288_v33, %v3276_v3  ;;  %v6483_v3 = vld [vmem:[%s9718_s9 + $0x70] sm:$0xff]  ;;  %v6474_v33 = vld [vmem:[%s9718_s9 + $0x28] sm:$0xff] }
 0x291   :  { %v3318_v6 = vmax.f32 %v3289_v5, 0.0  ;;  %v3354_v5 = vld [vmem:[%s9715_s6] sm:$0x3] }
 0x293   :  { %v3320_v35 = vpack.c.bf16 %v3318_v6, %v3318_v6  ;;  %v6473_v6 = vld [vmem:[%s9718_s9 + $0x20] sm:$0xff] }
 0x294   :  { %v3314_v10 = vpop.f32.mrf.mxu3 }
 0x295   :  { %v3315_v13 = vadd.f32 %v3314_v10, %v3302_v9  ;;  %3528 = vmatmul.bf16.vlgmr.msrb.gmra.mxu0 %v3320_v35  ;;  %3554 = vmatmul.bf16.vlgmr.msrb.gmra.mxu2 %v3320_v35  ;;  %v3356_v35 = vperm.slane %v3354_v5, 0  ;;  %v6472_v10 = vld [vmem:[%s9718_s9 + $0x18] sm:$0xff] }
 0x296   :  { %v3290_v14 = vpop.f32.mrf.mxu1  ;;  %3962 = vmatpush.bf16.msrb.mxu0 %v6476_v31 }
 0x297   :  { %v3319_v11 = vmax.f32 %v3315_v13, 0.0 }
 0x299   :  { %v3321_v15 = vpack.c.bf16 %v3319_v11, %v3319_v11 }
 0x29a   :  { %3963 = vmatpush.bf16.msrb.mxu0 %v6475_v59 }
 0x29b   :  { %3541 = vmatmul.bf16.vlgmr.msrb.gmra.mxu1 %v3321_v15  ;;  %3567 = vmatmul.bf16.vlgmr.msrb.gmra.mxu3 %v3321_v15 }
 0x29c   :  { %v3316_v16 = vpop.f32.mrf.mxu3  ;;  %3975 = vmatpush.bf16.msrb.mxu1 %v6484_v19 }
 0x29d   :  { %v3357_v16 = vperm.slane %v3354_v5, 1 }
 0x29e   :  { %3964 = vmatpush.bf16.msrb.mxu0 %v6474_v33 }
 0x2a0   :  { %3976 = vmatpush.bf16.msrb.mxu1 %v6483_v3 }
 0x2a2   :  { %3965 = vmatpush.bf16.msrb.mxu0 %v6473_v6 }
 0x2a4   :  { %3977 = vmatpush.bf16.msrb.mxu1 %v6482_v4 }
 0x2a6   :  { %3966 = vmatpush.bf16.msrb.mxu0 %v6472_v10 }
 0x2a8   :  { %3978 = vmatpush.bf16.msrb.mxu1 %v6481_v29 }
 0x2aa   :  { %3967 = vmatpush.bf16.msrb.mxu0 %v6471_v8 }
 0x2ac   :  { %3979 = vmatpush.bf16.msrb.mxu1 %v6480_v7 }
 0x2ae   :  { %3968 = vmatpush.bf16.msrb.mxu0 %v6470_v30 }
 0x2b0   :  { %3980 = vmatpush.bf16.msrb.mxu1 %v6479_v12 }
 0x2b2   :  { %3969 = vmatpush.bf16.msrb.mxu0 %v6469_v21 }
 0x2b4   :  { %3981 = vmatpush.bf16.msrb.mxu1 %v6478_v60 }
 0x2b8   :  { %3982 = vmatpush.bf16.msrb.mxu1 %v6477_v37 }
 0x312   :  { %v3529_v9 = vpop.f32.mrf.mxu0 }
 0x313   :  { %v3530_v13 = vadd.f32 %v3529_v9, %v3356_v35 }
 0x318   :  { %v3542_v14 = vpop.f32.mrf.mxu1  ;;  %v3555_v11 = vpop.f32.mrf.mxu2 }
 0x319   :  { %v3543_v15 = vadd.f32 %v3542_v14, %v3530_v13  ;;  %v3556_v20 = vadd.f32 %v3555_v11, %v3357_v16 }
 0x31a   :  { %v3531_v47 = vpop.f32.mrf.mxu0 }
 0x31b   :  { %v3572_v17 = vmax.f32 %v3543_v15, 0.0 }
 0x31d   :  { %v3574_v50 = vpack.c.bf16 %v3572_v17, %v3572_v17 }
 0x31e   :  { %v3568_v49 = vpop.f32.mrf.mxu3 }
 0x31f   :  { %v3569_v44 = vadd.f32 %v3568_v49, %v3556_v20  ;;  %3782 = vmatmul.bf16.vlgmr.msra.gmra.mxu0 %v3574_v50  ;;  %3808 = vmatmul.bf16.vlgmr.msra.gmra.mxu2 %v3574_v50 }
 0x320   :  { %v3544_v54 = vpop.f32.mrf.mxu1  ;;  %v3557_v23 = vpop.f32.mrf.mxu2 }
 0x321   :  { %v3573_v43 = vmax.f32 %v3569_v44, 0.0 }
 0x323   :  { %v3575_v2 = vpack.c.bf16 %v3573_v43, %v3573_v43 }
 0x325   :  { %3795 = vmatmul.bf16.vlgmr.msra.gmra.mxu1 %v3575_v2  ;;  %3821 = vmatmul.bf16.vlgmr.msra.gmra.mxu3 %v3575_v2 }
 0x326   :  { %v3570_v27 = vpop.f32.mrf.mxu3 }
 0x39c   :  { %v3783_v41 = vpop.f32.mrf.mxu0 }
 0x39d   :  { %v3784_v25 = vadd.f32 %v3783_v41, %v3610_v63 }
 0x3a2   :  { %v3796_v46 = vpop.f32.mrf.mxu1  ;;  %v3809_v34 = vpop.f32.mrf.mxu2 }
 0x3a3   :  { %v3797_v36 = vadd.f32 %v3796_v46, %v3784_v25  ;;  %v3810_v53 = vadd.f32 %v3809_v34, %v3611_v42 }
 0x3a4   :  { %v3785_v48 = vpop.f32.mrf.mxu0 }
 0x3a5   :  { %v3826_v51 = vmax.f32 %v3797_v36, 0.0 }
 0x3a7   :  { %v3828_v52 = vpack.c.bf16 %v3826_v51, %v3826_v51 }
 0x3a8   :  { %v3822_v39 = vpop.f32.mrf.mxu3 }
 0x3a9   :  { %v3823_v40 = vadd.f32 %v3822_v39, %v3810_v53  ;;  %3970 = vmatmul.bf16.vlgmr.msrb.gmra.mxu0 %v3828_v52 }
 0x3aa   :  { %v3798_v55 = vpop.f32.mrf.mxu1  ;;  %v3811_v56 = vpop.f32.mrf.mxu2 }
 0x3ab   :  { %v3827_v24 = vmax.f32 %v3823_v40, 0.0 }
 0x3ad   :  { %v3829_v57 = vpack.c.bf16 %v3827_v24, %v3827_v24 }
 0x3af   :  { %3983 = vmatmul.bf16.vlgmr.msrb.gmra.mxu1 %v3829_v57 }
 0x3b0   :  { %v3824_v32 = vpop.f32.mrf.mxu3 }
 0x426   :  { %v3971_v58 = vpop.f32.mrf.mxu0 }
 0x427   :  { %v3972_v0 = vadd.f32 %v6486_v61, %v3971_v58 }
 0x42c   :  { %v3984_v38 = vpop.f32.mrf.mxu1 }
 0x42d   :  { %v3985_v22 = vadd.f32 %v3984_v38, %v3972_v0 }
 0x42e   :  { %v3973_v26 = vpop.f32.mrf.mxu0 }
 0x42f   :  { %3988 = vst [vmem:[#allocation2] sm:$0x3] %v3985_v22 }
 0x430   :  { %3999 = dma.vmem_to_hbm [thread:$0]  %s3995_s4, 32, %s3997_s30, [#allocation3]  }
 0x434   :  { %v3986_v28 = vpop.f32.mrf.mxu1 }
 0x435   :  { %6512 = dma.done.wait [#allocation3], 32  }
 0x436   :  { %6513 = vsyncadd [#allocation3], 4294967264 }
 0x437   :  { %4004 = vsyncpa [#allocation3], 1 }

</bundles_post_ra>
